<compile_context>
chip_gen: v6e
topology: v6e:2x2x1
jax: 0.10.0
libtpu: 0.0.40
codegen_flags: <defaults>
</compile_context>

<pallas_src>
import functools

import jax
import jax.numpy as jnp
from jax import lax
from jax.experimental import pallas as pl
from jax.experimental.pallas import tpu as pltpu


_LANE = 128      # f32 lane width
_SUBLANE = 8     # f32 sublane count

_VMEM = pl.BlockSpec(memory_space=pltpu.MemorySpace.VMEM)


# ----------------------------- Pallas kernel -------------------------------

def fused_lstm_fc_kernel(x_ref, wih1_ref, whh1_ref, b1_ref,
                         wih2_ref, whh2_ref, b2_ref,
                         fcw_ref, fcb_ref,
                         out_ref,
                         gx_ref,
                         *, seq_len, batch, unroll):
    """Fused 2-layer LSTM + FC head.

    x_ref:    (T*B, Din)  bf16  time-major, batch-padded, flattened input
    wih1_ref: (Din, 4H)   bf16  layer-1 input weights (H = padded hidden)
    whh1_ref: (H,   4H)   bf16  layer-1 recurrent weights
    b1_ref:   (1,   4H)   f32   layer-1 bias (b_ih + b_hh)
    wih2/whh2/b2:               layer-2 equivalents (input dim = H)
    fcw_ref:  (1, H)      f32   FC weight as a row vector
    fcb_ref:  (1, 1)      f32   FC bias
    out_ref:  (B, 1)      f32   model output (padded batch)
    gx_ref:   (T*B, 4H)   f32   VMEM scratch: hoisted layer-1 projections

    Gate column order (packed at param time): [i, f, o | g].
    """
    T = seq_len
    B = batch
    H = whh1_ref.shape[0]          # padded hidden size (multiple of 128)

    def cell(gates, c):
        # gate blocks land exactly on 128-lane boundaries (H is 128-padded);
        # sigmoid gates are contiguous -> a single EUP launch over 3H lanes.
        sig = jax.nn.sigmoid(gates[:, 0:3 * H])
        i_g = sig[:, 0 * H:1 * H]
        f_g = sig[:, 1 * H:2 * H]
        o_g = sig[:, 2 * H:3 * H]
        g_g = jnp.tanh(gates[:, 3 * H:4 * H])
        c_new = f_g * c + i_g * g_g
        h_new = o_g * jnp.tanh(c_new)
        return h_new, c_new

    zeros = jnp.zeros((B, H), jnp.float32)

    # Hoisted layer-1 input projection with the bias folded in: one big
    # bf16 x bf16 MXU matmul (f32 accumulate) off the serial critical path.
    gx_ref[...] = (jnp.dot(x_ref[...], wih1_ref[...],
                           preferred_element_type=jnp.float32)
                   + b1_ref[...])

    whh1 = whh1_ref[...]
    wih2 = wih2_ref[...]
    whh2 = whh2_ref[...]
    b2 = b2_ref[...]

    def step(t, carry):
        h1, c1, h2, c2 = carry
        row = pl.multiple_of(t * B, B)           # sublane-aligned start

        # ---- layer-1 step t (serial chain #1; bias already in gx) ----
        g1 = (gx_ref[pl.ds(row, B), :]
              + jnp.dot(h1.astype(whh1.dtype), whh1,
                        preferred_element_type=jnp.float32))
        h1n, c1n = cell(g1, c1)

        # ---- layer-2 step t (serial chain #2). Depends on h1n of THIS
        # step only, so when unrolled it interleaves with layer-1 step t+1,
        # filling MXU/EUP latency bubbles. ----
        g2 = (jnp.dot(h1n.astype(wih2.dtype), wih2,
                      preferred_element_type=jnp.float32)
              + b2
              + jnp.dot(h2.astype(whh2.dtype), whh2,
                        preferred_element_type=jnp.float32))
        h2n, c2n = cell(g2, c2)

        return (h1n, c1n, h2n, c2n)

    _, _, h2_last, _ = lax.fori_loop(0, T, step,
                                     (zeros, zeros, zeros, zeros),
                                     unroll=unroll)

    # ---------------- fused FC head: VPU multiply + lane reduce -------------
    out_ref[...] = (jnp.sum(h2_last * fcw_ref[...], axis=1, keepdims=True)
                    + fcb_ref[...])


# ----------------------------- wrapper --------------------------------------

def _round_up(x, m):
    return (x + m - 1) // m * m


def _nbytes(a):
    return a.size * a.dtype.itemsize


def lstm_model_forward(x, padded_params):
    """x: (B, T, input_size) -> (B,)   (matches PyTorch forward, eval mode)."""
    B, T, Din = x.shape
    Bp = _round_up(B, _SUBLANE)
    Hp = padded_params["whh1"].shape[0]

    # time-major, batch padded to the sublane count, flattened, cast to bf16
    # for the MXU (f32 accumulation happens inside the kernel).
    x_tm = jnp.transpose(x, (1, 0, 2))                      # (T, B, Din)
    x_tm = jnp.pad(x_tm, ((0, 0), (0, Bp - B), (0, 0)))     # (T, Bp, Din)
    x2d = x_tm.reshape(T * Bp, Din).astype(jnp.bfloat16)

    # full unroll at toy T, partial unroll (scheduler visibility without
    # vreg-spill pressure) for larger T.
    unroll = T if T <= 8 else 4

    gx_bytes = T * Bp * 4 * Hp * 4
    resident = (_nbytes(x2d) + gx_bytes + Bp * 1 * 4
                + sum(_nbytes(padded_params[k]) for k in
                      ("wih1", "whh1", "b1", "wih2", "whh2", "b2",
                       "fc_w_row", "fc_b")))
    vmem_limit = int(min(max(2 * resident, 16 << 20), 48 << 20))

    kernel = functools.partial(fused_lstm_fc_kernel,
                               seq_len=T, batch=Bp, unroll=unroll)
    out = pl.pallas_call(
        kernel,
        out_shape=jax.ShapeDtypeStruct((Bp, 1), jnp.float32),
        in_specs=[_VMEM] * 9,
        out_specs=_VMEM,
        scratch_shapes=[
            pltpu.VMEM((T * Bp, 4 * Hp), jnp.float32),   # hoisted projections
        ],
        compiler_params=pltpu.CompilerParams(vmem_limit_bytes=vmem_limit),
    )(x2d,
      padded_params["wih1"], padded_params["whh1"], padded_params["b1"],
      padded_params["wih2"], padded_params["whh2"], padded_params["b2"],
      padded_params["fc_w_row"], padded_params["fc_b"])
    return out[:B, 0]                                       # drop batch padding


# ----------------------------- params ---------------------------------------

def init_params(key, input_size, hidden_size, num_layers):
    """Logical (unpadded) parameters; weights transposed vs. PyTorch.
    Gate order in the 4H dim matches nn.LSTM: [i, f, g, o]."""
    params = {"lstm": []}
    bound = 1.0 / jnp.sqrt(hidden_size)
    din = input_size
    for _ in range(num_layers):
        key, k1, k2, k3, k4 = jax.random.split(key, 5)
        wih = jax.random.uniform(k1, (din, 4 * hidden_size), jnp.float32,
                                 -bound, bound)
        whh = jax.random.uniform(k2, (hidden_size, 4 * hidden_size),
                                 jnp.float32, -bound, bound)
        b_ih = jax.random.uniform(k3, (4 * hidden_size,), jnp.float32,
                                  -bound, bound)
        b_hh = jax.random.uniform(k4, (4 * hidden_size,), jnp.float32,
                                  -bound, bound)
        params["lstm"].append(
            {"wih": wih, "whh": whh, "b": (b_ih + b_hh)[None, :]})
        din = hidden_size
    key, k1, k2 = jax.random.split(key, 3)
    params["fc_w"] = jax.random.uniform(k1, (hidden_size, 1), jnp.float32,
                                        -bound, bound)
    params["fc_b"] = jax.random.uniform(k2, (1, 1), jnp.float32,
                                        -bound, bound)
    return params


# source gate order is [i, f, g, o] (nn.LSTM); kernel packs to [i, f, o, g]
# so the three sigmoid gates are contiguous and the tanh gate is last.
_GATE_ORDER = (0, 1, 3, 2)   # new block index -> source gate index


def _pad_gate_cols(w, H, Hp):
    """(rows, 4H) -> (rows, 4Hp): each gate block is placed (in [i,f,o,g]
    order) at a 128-aligned offset g*Hp; padding columns are zero so padded
    hidden units stay identically 0 through the recurrence."""
    out = jnp.zeros((w.shape[0], 4 * Hp), w.dtype)
    for new_g, src_g in enumerate(_GATE_ORDER):
        out = out.at[:, new_g * Hp: new_g * Hp + H].set(
            w[:, src_g * H:(src_g + 1) * H])
    return out


def _pad_rows(w, Hp):
    return jnp.pad(w, ((0, Hp - w.shape[0]), (0, 0)))


def pad_params_for_kernel(params, hidden_size):
    """Zero-pad H -> multiple of 128 (lane-aligned gate blocks), reorder the
    gate columns to [i,f,o,g], and cast the matmul weights to bf16 (biases
    and the FC head stay f32)."""
    assert len(params["lstm"]) == 2, "fused kernel implements num_layers=2"
    H = hidden_size
    Hp = _round_up(max(H, _LANE), _LANE)
    l1, l2 = params["lstm"]
    bf16 = jnp.bfloat16
    return {
        "wih1": _pad_gate_cols(l1["wih"], H, Hp).astype(bf16),           # (Din, 4Hp)
        "whh1": _pad_rows(_pad_gate_cols(l1["whh"], H, Hp), Hp).astype(bf16),  # (Hp, 4Hp)
        "b1": _pad_gate_cols(l1["b"], H, Hp),                            # (1, 4Hp) f32
        "wih2": _pad_rows(_pad_gate_cols(l2["wih"], H, Hp), Hp).astype(bf16),  # (Hp, 4Hp)
        "whh2": _pad_rows(_pad_gate_cols(l2["whh"], H, Hp), Hp).astype(bf16),  # (Hp, 4Hp)
        "b2": _pad_gate_cols(l2["b"], H, Hp),                            # (1, 4Hp) f32
        "fc_w_row": jnp.pad(params["fc_w"][:, 0][None, :],
                            ((0, 0), (0, Hp - H))),                      # (1, Hp) f32
        "fc_b": params["fc_b"],                                          # (1, 1) f32
    }


# ----------------------------- reference (pure JAX, f32) ---------------------

def reference_forward(x, params):
    h_seq = jnp.transpose(x, (1, 0, 2))
    for layer in params["lstm"]:
        T, B, _ = h_seq.shape
        H = layer["whh"].shape[0]

        def step(carry, x_t, layer=layer, H=H):
            h, c = carry
            gates = x_t @ layer["wih"] + h @ layer["whh"] + layer["b"]
            i_g = jax.nn.sigmoid(gates[:, 0 * H:1 * H])
            f_g = jax.nn.sigmoid(gates[:, 1 * H:2 * H])
            g_g = jnp.tanh(gates[:, 2 * H:3 * H])
            o_g = jax.nn.sigmoid(gates[:, 3 * H:4 * H])
            c_new = f_g * c + i_g * g_g
            h_new = o_g * jnp.tanh(c_new)
            return (h_new, c_new), h_new

        init = (jnp.zeros((B, H), jnp.float32), jnp.zeros((B, H), jnp.float32))
        _, h_seq = lax.scan(step, init, h_seq)
    h_last = h_seq[-1]
    return (h_last @ params["fc_w"] + params["fc_b"])[:, 0]


# ----------------------------- main ------------------------------------------

if __name__ == "__main__":
    batch, seq, input_size, hidden_size, num_layers = 2, 8, 16, 64, 2

    key = jax.random.PRNGKey(0)
    key, kx, kp = jax.random.split(key, 3)
    x = jax.random.normal(kx, (batch, seq, input_size), jnp.float32)
    params = init_params(kp, input_size, hidden_size, num_layers)
    padded = pad_params_for_kernel(params, hidden_size)

    out = jax.block_until_ready(lstm_model_forward(x, padded))
    ref = jax.block_until_ready(reference_forward(x, params))

    assert out.shape == (batch,), out.shape
    # bf16 MXU operands (f32 accumulate) -> relaxed tolerance vs. f32 reference
    assert jnp.allclose(out, ref, atol=3e-2, rtol=3e-2), (out, ref)
    print("KERNEL_OK")
</pallas_src>

<mosaic_0001>
module attributes {stable_mosaic.version = 11 : i64} {
  func.func @fused_lstm_fc_kernel(%arg0: memref<64x16xbf16, #tpu.memory_space<vmem>>, %arg1: memref<16x512xbf16, #tpu.memory_space<vmem>>, %arg2: memref<128x512xbf16, #tpu.memory_space<vmem>>, %arg3: memref<1x512xf32, #tpu.memory_space<vmem>>, %arg4: memref<128x512xbf16, #tpu.memory_space<vmem>>, %arg5: memref<128x512xbf16, #tpu.memory_space<vmem>>, %arg6: memref<1x512xf32, #tpu.memory_space<vmem>>, %arg7: memref<1x128xf32, #tpu.memory_space<vmem>>, %arg8: memref<1x1xf32, #tpu.memory_space<vmem>>, %arg9: memref<8x1xf32, #tpu.memory_space<vmem>>, %arg10: memref<64x512xf32, #tpu.memory_space<vmem>>) attributes {dimension_semantics = [], scalar_prefetch = 0 : i64, scratch_operands = 1 : i64, tpu.core_type = #tpu.core_type<tc>} {
    %cst = arith.constant 0.000000e+00 : f32
    %0 = vector.broadcast %cst : f32 to vector<8x128xf32>
    %c0 = arith.constant 0 : index
    %c0_0 = arith.constant 0 : index
    %1 = vector.load %arg0[%c0, %c0_0] : memref<64x16xbf16, #tpu.memory_space<vmem>>, vector<64x16xbf16>
    %c0_1 = arith.constant 0 : index
    %c0_2 = arith.constant 0 : index
    %2 = vector.load %arg1[%c0_1, %c0_2] : memref<16x512xbf16, #tpu.memory_space<vmem>>, vector<16x512xbf16>
    %cst_3 = arith.constant dense<0.000000e+00> : vector<64x512xf32>
    %3 = tpu.matmul %1, %2, %cst_3 {dimension_numbers = #tpu.dot_dimension_numbers<[1], [0], [0], [1], [0, 0, 1, 1], [], []>} : vector<64x16xbf16>, vector<16x512xbf16>, vector<64x512xf32> -> vector<64x512xf32>
    %c0_4 = arith.constant 0 : index
    %c0_5 = arith.constant 0 : index
    %4 = vector.load %arg3[%c0_4, %c0_5] : memref<1x512xf32, #tpu.memory_space<vmem>>, vector<1x512xf32>
    %5 = vector.broadcast %4 : vector<1x512xf32> to vector<64x512xf32>
    %6 = arith.addf %3, %5 : vector<64x512xf32>
    %c0_6 = arith.constant 0 : index
    %c0_7 = arith.constant 0 : index
    %7 = vector.load %arg10[%c0_6, %c0_7] : memref<64x512xf32, #tpu.memory_space<vmem>>, vector<64x512xf32>
    tpu.vector_store %arg10[%c0_6, %c0_7], %6 {strides = array<i32>} : memref<64x512xf32, #tpu.memory_space<vmem>>, vector<64x512xf32>,
    %c0_8 = arith.constant 0 : index
    %c0_9 = arith.constant 0 : index
    %8 = vector.load %arg2[%c0_8, %c0_9] : memref<128x512xbf16, #tpu.memory_space<vmem>>, vector<128x512xbf16>
    %c0_10 = arith.constant 0 : index
    %c0_11 = arith.constant 0 : index
    %9 = vector.load %arg4[%c0_10, %c0_11] : memref<128x512xbf16, #tpu.memory_space<vmem>>, vector<128x512xbf16>
    %c0_12 = arith.constant 0 : index
    %c0_13 = arith.constant 0 : index
    %10 = vector.load %arg5[%c0_12, %c0_13] : memref<128x512xbf16, #tpu.memory_space<vmem>>, vector<128x512xbf16>
    %c0_14 = arith.constant 0 : index
    %c0_15 = arith.constant 0 : index
    %11 = vector.load %arg6[%c0_14, %c0_15] : memref<1x512xf32, #tpu.memory_space<vmem>>, vector<1x512xf32>
    %c0_i32 = arith.constant 0 : i32
    %c8_i32 = arith.constant 8 : i32
    %12 = arith.muli %c0_i32, %c8_i32 : i32
    %13 = tpu.assume_multiple %12, 8 : i32
    %14 = arith.index_cast %13 : i32 to index
    %c0_16 = arith.constant 0 : index
    %15 = vector.load %arg10[%14, %c0_16] : memref<64x512xf32, #tpu.memory_space<vmem>>, vector<8x512xf32>
    %16 = arith.truncf %0 : vector<8x128xf32> to vector<8x128xbf16>
    %cst_17 = arith.constant dense<0.000000e+00> : vector<8x512xf32>
    %17 = tpu.matmul %16, %8, %cst_17 {dimension_numbers = #tpu.dot_dimension_numbers<[1], [0], [0], [1], [0, 0, 1, 1], [], []>} : vector<8x128xbf16>, vector<128x512xbf16>, vector<8x512xf32> -> vector<8x512xf32>
    %18 = arith.addf %15, %17 : vector<8x512xf32>
    %19 = vector.extract_strided_slice %18 {offsets = [0, 0], sizes = [8, 384], strides = [1, 1]} : vector<8x512xf32> to vector<8x384xf32>
    %20 = arith.negf %19 : vector<8x384xf32>
    %21 = math.exp %20 : vector<8x384xf32>
    %cst_18 = arith.constant 1.000000e+00 : f32
    %22 = vector.broadcast %cst_18 : f32 to vector<8x384xf32>
    %23 = arith.addf %22, %21 : vector<8x384xf32>
    %24 = arith.divf %22, %23 : vector<8x384xf32>
    %25 = vector.extract_strided_slice %24 {offsets = [0, 0], sizes = [8, 128], strides = [1, 1]} : vector<8x384xf32> to vector<8x128xf32>
    %26 = vector.extract_strided_slice %24 {offsets = [0, 128], sizes = [8, 128], strides = [1, 1]} : vector<8x384xf32> to vector<8x128xf32>
    %27 = vector.extract_strided_slice %24 {offsets = [0, 256], sizes = [8, 128], strides = [1, 1]} : vector<8x384xf32> to vector<8x128xf32>
    %28 = vector.extract_strided_slice %18 {offsets = [0, 384], sizes = [8, 128], strides = [1, 1]} : vector<8x512xf32> to vector<8x128xf32>
    %29 = math.tanh %28 : vector<8x128xf32>
    %30 = arith.mulf %26, %0 : vector<8x128xf32>
    %31 = arith.mulf %25, %29 : vector<8x128xf32>
    %32 = arith.addf %30, %31 : vector<8x128xf32>
    %33 = math.tanh %32 : vector<8x128xf32>
    %34 = arith.mulf %27, %33 : vector<8x128xf32>
    %35 = arith.truncf %34 : vector<8x128xf32> to vector<8x128xbf16>
    %cst_19 = arith.constant dense<0.000000e+00> : vector<8x512xf32>
    %36 = tpu.matmul %35, %9, %cst_19 {dimension_numbers = #tpu.dot_dimension_numbers<[1], [0], [0], [1], [0, 0, 1, 1], [], []>} : vector<8x128xbf16>, vector<128x512xbf16>, vector<8x512xf32> -> vector<8x512xf32>
    %37 = vector.broadcast %11 : vector<1x512xf32> to vector<8x512xf32>
    %38 = arith.addf %36, %37 : vector<8x512xf32>
    %39 = arith.truncf %0 : vector<8x128xf32> to vector<8x128xbf16>
    %cst_20 = arith.constant dense<0.000000e+00> : vector<8x512xf32>
    %40 = tpu.matmul %39, %10, %cst_20 {dimension_numbers = #tpu.dot_dimension_numbers<[1], [0], [0], [1], [0, 0, 1, 1], [], []>} : vector<8x128xbf16>, vector<128x512xbf16>, vector<8x512xf32> -> vector<8x512xf32>
    %41 = arith.addf %38, %40 : vector<8x512xf32>
    %42 = vector.extract_strided_slice %41 {offsets = [0, 0], sizes = [8, 384], strides = [1, 1]} : vector<8x512xf32> to vector<8x384xf32>
    %43 = arith.negf %42 : vector<8x384xf32>
    %44 = math.exp %43 : vector<8x384xf32>
    %cst_21 = arith.constant 1.000000e+00 : f32
    %45 = vector.broadcast %cst_21 : f32 to vector<8x384xf32>
    %46 = arith.addf %45, %44 : vector<8x384xf32>
    %47 = arith.divf %45, %46 : vector<8x384xf32>
    %48 = vector.extract_strided_slice %47 {offsets = [0, 0], sizes = [8, 128], strides = [1, 1]} : vector<8x384xf32> to vector<8x128xf32>
    %49 = vector.extract_strided_slice %47 {offsets = [0, 128], sizes = [8, 128], strides = [1, 1]} : vector<8x384xf32> to vector<8x128xf32>
    %50 = vector.extract_strided_slice %47 {offsets = [0, 256], sizes = [8, 128], strides = [1, 1]} : vector<8x384xf32> to vector<8x128xf32>
    %51 = vector.extract_strided_slice %41 {offsets = [0, 384], sizes = [8, 128], strides = [1, 1]} : vector<8x512xf32> to vector<8x128xf32>
    %52 = math.tanh %51 : vector<8x128xf32>
    %53 = arith.mulf %49, %0 : vector<8x128xf32>
    %54 = arith.mulf %48, %52 : vector<8x128xf32>
    %55 = arith.addf %53, %54 : vector<8x128xf32>
    %56 = math.tanh %55 : vector<8x128xf32>
    %57 = arith.mulf %50, %56 : vector<8x128xf32>
    %c1_i32 = arith.constant 1 : i32
    %c8_i32_22 = arith.constant 8 : i32
    %58 = arith.muli %c1_i32, %c8_i32_22 : i32
    %59 = tpu.assume_multiple %58, 8 : i32
    %60 = arith.index_cast %59 : i32 to index
    %c0_23 = arith.constant 0 : index
    %61 = vector.load %arg10[%60, %c0_23] : memref<64x512xf32, #tpu.memory_space<vmem>>, vector<8x512xf32>
    %62 = arith.truncf %34 : vector<8x128xf32> to vector<8x128xbf16>
    %cst_24 = arith.constant dense<0.000000e+00> : vector<8x512xf32>
    %63 = tpu.matmul %62, %8, %cst_24 {dimension_numbers = #tpu.dot_dimension_numbers<[1], [0], [0], [1], [0, 0, 1, 1], [], []>} : vector<8x128xbf16>, vector<128x512xbf16>, vector<8x512xf32> -> vector<8x512xf32>
    %64 = arith.addf %61, %63 : vector<8x512xf32>
    %65 = vector.extract_strided_slice %64 {offsets = [0, 0], sizes = [8, 384], strides = [1, 1]} : vector<8x512xf32> to vector<8x384xf32>
    %66 = arith.negf %65 : vector<8x384xf32>
    %67 = math.exp %66 : vector<8x384xf32>
    %cst_25 = arith.constant 1.000000e+00 : f32
    %68 = vector.broadcast %cst_25 : f32 to vector<8x384xf32>
    %69 = arith.addf %68, %67 : vector<8x384xf32>
    %70 = arith.divf %68, %69 : vector<8x384xf32>
    %71 = vector.extract_strided_slice %70 {offsets = [0, 0], sizes = [8, 128], strides = [1, 1]} : vector<8x384xf32> to vector<8x128xf32>
    %72 = vector.extract_strided_slice %70 {offsets = [0, 128], sizes = [8, 128], strides = [1, 1]} : vector<8x384xf32> to vector<8x128xf32>
    %73 = vector.extract_strided_slice %70 {offsets = [0, 256], sizes = [8, 128], strides = [1, 1]} : vector<8x384xf32> to vector<8x128xf32>
    %74 = vector.extract_strided_slice %64 {offsets = [0, 384], sizes = [8, 128], strides = [1, 1]} : vector<8x512xf32> to vector<8x128xf32>
    %75 = math.tanh %74 : vector<8x128xf32>
    %76 = arith.mulf %72, %32 : vector<8x128xf32>
    %77 = arith.mulf %71, %75 : vector<8x128xf32>
    %78 = arith.addf %76, %77 : vector<8x128xf32>
    %79 = math.tanh %78 : vector<8x128xf32>
    %80 = arith.mulf %73, %79 : vector<8x128xf32>
    %81 = arith.truncf %80 : vector<8x128xf32> to vector<8x128xbf16>
    %cst_26 = arith.constant dense<0.000000e+00> : vector<8x512xf32>
    %82 = tpu.matmul %81, %9, %cst_26 {dimension_numbers = #tpu.dot_dimension_numbers<[1], [0], [0], [1], [0, 0, 1, 1], [], []>} : vector<8x128xbf16>, vector<128x512xbf16>, vector<8x512xf32> -> vector<8x512xf32>
    %83 = vector.broadcast %11 : vector<1x512xf32> to vector<8x512xf32>
    %84 = arith.addf %82, %83 : vector<8x512xf32>
    %85 = arith.truncf %57 : vector<8x128xf32> to vector<8x128xbf16>
    %cst_27 = arith.constant dense<0.000000e+00> : vector<8x512xf32>
    %86 = tpu.matmul %85, %10, %cst_27 {dimension_numbers = #tpu.dot_dimension_numbers<[1], [0], [0], [1], [0, 0, 1, 1], [], []>} : vector<8x128xbf16>, vector<128x512xbf16>, vector<8x512xf32> -> vector<8x512xf32>
    %87 = arith.addf %84, %86 : vector<8x512xf32>
    %88 = vector.extract_strided_slice %87 {offsets = [0, 0], sizes = [8, 384], strides = [1, 1]} : vector<8x512xf32> to vector<8x384xf32>
    %89 = arith.negf %88 : vector<8x384xf32>
    %90 = math.exp %89 : vector<8x384xf32>
    %cst_28 = arith.constant 1.000000e+00 : f32
    %91 = vector.broadcast %cst_28 : f32 to vector<8x384xf32>
    %92 = arith.addf %91, %90 : vector<8x384xf32>
    %93 = arith.divf %91, %92 : vector<8x384xf32>
    %94 = vector.extract_strided_slice %93 {offsets = [0, 0], sizes = [8, 128], strides = [1, 1]} : vector<8x384xf32> to vector<8x128xf32>
    %95 = vector.extract_strided_slice %93 {offsets = [0, 128], sizes = [8, 128], strides = [1, 1]} : vector<8x384xf32> to vector<8x128xf32>
    %96 = vector.extract_strided_slice %93 {offsets = [0, 256], sizes = [8, 128], strides = [1, 1]} : vector<8x384xf32> to vector<8x128xf32>
    %97 = vector.extract_strided_slice %87 {offsets = [0, 384], sizes = [8, 128], strides = [1, 1]} : vector<8x512xf32> to vector<8x128xf32>
    %98 = math.tanh %97 : vector<8x128xf32>
    %99 = arith.mulf %95, %55 : vector<8x128xf32>
    %100 = arith.mulf %94, %98 : vector<8x128xf32>
    %101 = arith.addf %99, %100 : vector<8x128xf32>
    %102 = math.tanh %101 : vector<8x128xf32>
    %103 = arith.mulf %96, %102 : vector<8x128xf32>
    %c2_i32 = arith.constant 2 : i32
    %c8_i32_29 = arith.constant 8 : i32
    %104 = arith.muli %c2_i32, %c8_i32_29 : i32
    %105 = tpu.assume_multiple %104, 8 : i32
    %106 = arith.index_cast %105 : i32 to index
    %c0_30 = arith.constant 0 : index
    %107 = vector.load %arg10[%106, %c0_30] : memref<64x512xf32, #tpu.memory_space<vmem>>, vector<8x512xf32>
    %108 = arith.truncf %80 : vector<8x128xf32> to vector<8x128xbf16>
    %cst_31 = arith.constant dense<0.000000e+00> : vector<8x512xf32>
    %109 = tpu.matmul %108, %8, %cst_31 {dimension_numbers = #tpu.dot_dimension_numbers<[1], [0], [0], [1], [0, 0, 1, 1], [], []>} : vector<8x128xbf16>, vector<128x512xbf16>, vector<8x512xf32> -> vector<8x512xf32>
    %110 = arith.addf %107, %109 : vector<8x512xf32>
    %111 = vector.extract_strided_slice %110 {offsets = [0, 0], sizes = [8, 384], strides = [1, 1]} : vector<8x512xf32> to vector<8x384xf32>
    %112 = arith.negf %111 : vector<8x384xf32>
    %113 = math.exp %112 : vector<8x384xf32>
    %cst_32 = arith.constant 1.000000e+00 : f32
    %114 = vector.broadcast %cst_32 : f32 to vector<8x384xf32>
    %115 = arith.addf %114, %113 : vector<8x384xf32>
    %116 = arith.divf %114, %115 : vector<8x384xf32>
    %117 = vector.extract_strided_slice %116 {offsets = [0, 0], sizes = [8, 128], strides = [1, 1]} : vector<8x384xf32> to vector<8x128xf32>
    %118 = vector.extract_strided_slice %116 {offsets = [0, 128], sizes = [8, 128], strides = [1, 1]} : vector<8x384xf32> to vector<8x128xf32>
    %119 = vector.extract_strided_slice %116 {offsets = [0, 256], sizes = [8, 128], strides = [1, 1]} : vector<8x384xf32> to vector<8x128xf32>
    %120 = vector.extract_strided_slice %110 {offsets = [0, 384], sizes = [8, 128], strides = [1, 1]} : vector<8x512xf32> to vector<8x128xf32>
    %121 = math.tanh %120 : vector<8x128xf32>
    %122 = arith.mulf %118, %78 : vector<8x128xf32>
    %123 = arith.mulf %117, %121 : vector<8x128xf32>
    %124 = arith.addf %122, %123 : vector<8x128xf32>
    %125 = math.tanh %124 : vector<8x128xf32>
    %126 = arith.mulf %119, %125 : vector<8x128xf32>
    %127 = arith.truncf %126 : vector<8x128xf32> to vector<8x128xbf16>
    %cst_33 = arith.constant dense<0.000000e+00> : vector<8x512xf32>
    %128 = tpu.matmul %127, %9, %cst_33 {dimension_numbers = #tpu.dot_dimension_numbers<[1], [0], [0], [1], [0, 0, 1, 1], [], []>} : vector<8x128xbf16>, vector<128x512xbf16>, vector<8x512xf32> -> vector<8x512xf32>
    %129 = vector.broadcast %11 : vector<1x512xf32> to vector<8x512xf32>
    %130 = arith.addf %128, %129 : vector<8x512xf32>
    %131 = arith.truncf %103 : vector<8x128xf32> to vector<8x128xbf16>
    %cst_34 = arith.constant dense<0.000000e+00> : vector<8x512xf32>
    %132 = tpu.matmul %131, %10, %cst_34 {dimension_numbers = #tpu.dot_dimension_numbers<[1], [0], [0], [1], [0, 0, 1, 1], [], []>} : vector<8x128xbf16>, vector<128x512xbf16>, vector<8x512xf32> -> vector<8x512xf32>
    %133 = arith.addf %130, %132 : vector<8x512xf32>
    %134 = vector.extract_strided_slice %133 {offsets = [0, 0], sizes = [8, 384], strides = [1, 1]} : vector<8x512xf32> to vector<8x384xf32>
    %135 = arith.negf %134 : vector<8x384xf32>
    %136 = math.exp %135 : vector<8x384xf32>
    %cst_35 = arith.constant 1.000000e+00 : f32
    %137 = vector.broadcast %cst_35 : f32 to vector<8x384xf32>
    %138 = arith.addf %137, %136 : vector<8x384xf32>
    %139 = arith.divf %137, %138 : vector<8x384xf32>
    %140 = vector.extract_strided_slice %139 {offsets = [0, 0], sizes = [8, 128], strides = [1, 1]} : vector<8x384xf32> to vector<8x128xf32>
    %141 = vector.extract_strided_slice %139 {offsets = [0, 128], sizes = [8, 128], strides = [1, 1]} : vector<8x384xf32> to vector<8x128xf32>
    %142 = vector.extract_strided_slice %139 {offsets = [0, 256], sizes = [8, 128], strides = [1, 1]} : vector<8x384xf32> to vector<8x128xf32>
    %143 = vector.extract_strided_slice %133 {offsets = [0, 384], sizes = [8, 128], strides = [1, 1]} : vector<8x512xf32> to vector<8x128xf32>
    %144 = math.tanh %143 : vector<8x128xf32>
    %145 = arith.mulf %141, %101 : vector<8x128xf32>
    %146 = arith.mulf %140, %144 : vector<8x128xf32>
    %147 = arith.addf %145, %146 : vector<8x128xf32>
    %148 = math.tanh %147 : vector<8x128xf32>
    %149 = arith.mulf %142, %148 : vector<8x128xf32>
    %c3_i32 = arith.constant 3 : i32
    %c8_i32_36 = arith.constant 8 : i32
    %150 = arith.muli %c3_i32, %c8_i32_36 : i32
    %151 = tpu.assume_multiple %150, 8 : i32
    %152 = arith.index_cast %151 : i32 to index
    %c0_37 = arith.constant 0 : index
    %153 = vector.load %arg10[%152, %c0_37] : memref<64x512xf32, #tpu.memory_space<vmem>>, vector<8x512xf32>
    %154 = arith.truncf %126 : vector<8x128xf32> to vector<8x128xbf16>
    %cst_38 = arith.constant dense<0.000000e+00> : vector<8x512xf32>
    %155 = tpu.matmul %154, %8, %cst_38 {dimension_numbers = #tpu.dot_dimension_numbers<[1], [0], [0], [1], [0, 0, 1, 1], [], []>} : vector<8x128xbf16>, vector<128x512xbf16>, vector<8x512xf32> -> vector<8x512xf32>
    %156 = arith.addf %153, %155 : vector<8x512xf32>
    %157 = vector.extract_strided_slice %156 {offsets = [0, 0], sizes = [8, 384], strides = [1, 1]} : vector<8x512xf32> to vector<8x384xf32>
    %158 = arith.negf %157 : vector<8x384xf32>
    %159 = math.exp %158 : vector<8x384xf32>
    %cst_39 = arith.constant 1.000000e+00 : f32
    %160 = vector.broadcast %cst_39 : f32 to vector<8x384xf32>
    %161 = arith.addf %160, %159 : vector<8x384xf32>
    %162 = arith.divf %160, %161 : vector<8x384xf32>
    %163 = vector.extract_strided_slice %162 {offsets = [0, 0], sizes = [8, 128], strides = [1, 1]} : vector<8x384xf32> to vector<8x128xf32>
    %164 = vector.extract_strided_slice %162 {offsets = [0, 128], sizes = [8, 128], strides = [1, 1]} : vector<8x384xf32> to vector<8x128xf32>
    %165 = vector.extract_strided_slice %162 {offsets = [0, 256], sizes = [8, 128], strides = [1, 1]} : vector<8x384xf32> to vector<8x128xf32>
    %166 = vector.extract_strided_slice %156 {offsets = [0, 384], sizes = [8, 128], strides = [1, 1]} : vector<8x512xf32> to vector<8x128xf32>
    %167 = math.tanh %166 : vector<8x128xf32>
    %168 = arith.mulf %164, %124 : vector<8x128xf32>
    %169 = arith.mulf %163, %167 : vector<8x128xf32>
    %170 = arith.addf %168, %169 : vector<8x128xf32>
    %171 = math.tanh %170 : vector<8x128xf32>
    %172 = arith.mulf %165, %171 : vector<8x128xf32>
    %173 = arith.truncf %172 : vector<8x128xf32> to vector<8x128xbf16>
    %cst_40 = arith.constant dense<0.000000e+00> : vector<8x512xf32>
    %174 = tpu.matmul %173, %9, %cst_40 {dimension_numbers = #tpu.dot_dimension_numbers<[1], [0], [0], [1], [0, 0, 1, 1], [], []>} : vector<8x128xbf16>, vector<128x512xbf16>, vector<8x512xf32> -> vector<8x512xf32>
    %175 = vector.broadcast %11 : vector<1x512xf32> to vector<8x512xf32>
    %176 = arith.addf %174, %175 : vector<8x512xf32>
    %177 = arith.truncf %149 : vector<8x128xf32> to vector<8x128xbf16>
    %cst_41 = arith.constant dense<0.000000e+00> : vector<8x512xf32>
    %178 = tpu.matmul %177, %10, %cst_41 {dimension_numbers = #tpu.dot_dimension_numbers<[1], [0], [0], [1], [0, 0, 1, 1], [], []>} : vector<8x128xbf16>, vector<128x512xbf16>, vector<8x512xf32> -> vector<8x512xf32>
    %179 = arith.addf %176, %178 : vector<8x512xf32>
    %180 = vector.extract_strided_slice %179 {offsets = [0, 0], sizes = [8, 384], strides = [1, 1]} : vector<8x512xf32> to vector<8x384xf32>
    %181 = arith.negf %180 : vector<8x384xf32>
    %182 = math.exp %181 : vector<8x384xf32>
    %cst_42 = arith.constant 1.000000e+00 : f32
    %183 = vector.broadcast %cst_42 : f32 to vector<8x384xf32>
    %184 = arith.addf %183, %182 : vector<8x384xf32>
    %185 = arith.divf %183, %184 : vector<8x384xf32>
    %186 = vector.extract_strided_slice %185 {offsets = [0, 0], sizes = [8, 128], strides = [1, 1]} : vector<8x384xf32> to vector<8x128xf32>
    %187 = vector.extract_strided_slice %185 {offsets = [0, 128], sizes = [8, 128], strides = [1, 1]} : vector<8x384xf32> to vector<8x128xf32>
    %188 = vector.extract_strided_slice %185 {offsets = [0, 256], sizes = [8, 128], strides = [1, 1]} : vector<8x384xf32> to vector<8x128xf32>
    %189 = vector.extract_strided_slice %179 {offsets = [0, 384], sizes = [8, 128], strides = [1, 1]} : vector<8x512xf32> to vector<8x128xf32>
    %190 = math.tanh %189 : vector<8x128xf32>
    %191 = arith.mulf %187, %147 : vector<8x128xf32>
    %192 = arith.mulf %186, %190 : vector<8x128xf32>
    %193 = arith.addf %191, %192 : vector<8x128xf32>
    %194 = math.tanh %193 : vector<8x128xf32>
    %195 = arith.mulf %188, %194 : vector<8x128xf32>
    %c4_i32 = arith.constant 4 : i32
    %c8_i32_43 = arith.constant 8 : i32
    %196 = arith.muli %c4_i32, %c8_i32_43 : i32
    %197 = tpu.assume_multiple %196, 8 : i32
    %198 = arith.index_cast %197 : i32 to index
    %c0_44 = arith.constant 0 : index
    %199 = vector.load %arg10[%198, %c0_44] : memref<64x512xf32, #tpu.memory_space<vmem>>, vector<8x512xf32>
    %200 = arith.truncf %172 : vector<8x128xf32> to vector<8x128xbf16>
    %cst_45 = arith.constant dense<0.000000e+00> : vector<8x512xf32>
    %201 = tpu.matmul %200, %8, %cst_45 {dimension_numbers = #tpu.dot_dimension_numbers<[1], [0], [0], [1], [0, 0, 1, 1], [], []>} : vector<8x128xbf16>, vector<128x512xbf16>, vector<8x512xf32> -> vector<8x512xf32>
    %202 = arith.addf %199, %201 : vector<8x512xf32>
    %203 = vector.extract_strided_slice %202 {offsets = [0, 0], sizes = [8, 384], strides = [1, 1]} : vector<8x512xf32> to vector<8x384xf32>
    %204 = arith.negf %203 : vector<8x384xf32>
    %205 = math.exp %204 : vector<8x384xf32>
    %cst_46 = arith.constant 1.000000e+00 : f32
    %206 = vector.broadcast %cst_46 : f32 to vector<8x384xf32>
    %207 = arith.addf %206, %205 : vector<8x384xf32>
    %208 = arith.divf %206, %207 : vector<8x384xf32>
    %209 = vector.extract_strided_slice %208 {offsets = [0, 0], sizes = [8, 128], strides = [1, 1]} : vector<8x384xf32> to vector<8x128xf32>
    %210 = vector.extract_strided_slice %208 {offsets = [0, 128], sizes = [8, 128], strides = [1, 1]} : vector<8x384xf32> to vector<8x128xf32>
    %211 = vector.extract_strided_slice %208 {offsets = [0, 256], sizes = [8, 128], strides = [1, 1]} : vector<8x384xf32> to vector<8x128xf32>
    %212 = vector.extract_strided_slice %202 {offsets = [0, 384], sizes = [8, 128], strides = [1, 1]} : vector<8x512xf32> to vector<8x128xf32>
    %213 = math.tanh %212 : vector<8x128xf32>
    %214 = arith.mulf %210, %170 : vector<8x128xf32>
    %215 = arith.mulf %209, %213 : vector<8x128xf32>
    %216 = arith.addf %214, %215 : vector<8x128xf32>
    %217 = math.tanh %216 : vector<8x128xf32>
    %218 = arith.mulf %211, %217 : vector<8x128xf32>
    %219 = arith.truncf %218 : vector<8x128xf32> to vector<8x128xbf16>
    %cst_47 = arith.constant dense<0.000000e+00> : vector<8x512xf32>
    %220 = tpu.matmul %219, %9, %cst_47 {dimension_numbers = #tpu.dot_dimension_numbers<[1], [0], [0], [1], [0, 0, 1, 1], [], []>} : vector<8x128xbf16>, vector<128x512xbf16>, vector<8x512xf32> -> vector<8x512xf32>
    %221 = vector.broadcast %11 : vector<1x512xf32> to vector<8x512xf32>
    %222 = arith.addf %220, %221 : vector<8x512xf32>
    %223 = arith.truncf %195 : vector<8x128xf32> to vector<8x128xbf16>
    %cst_48 = arith.constant dense<0.000000e+00> : vector<8x512xf32>
    %224 = tpu.matmul %223, %10, %cst_48 {dimension_numbers = #tpu.dot_dimension_numbers<[1], [0], [0], [1], [0, 0, 1, 1], [], []>} : vector<8x128xbf16>, vector<128x512xbf16>, vector<8x512xf32> -> vector<8x512xf32>
    %225 = arith.addf %222, %224 : vector<8x512xf32>
    %226 = vector.extract_strided_slice %225 {offsets = [0, 0], sizes = [8, 384], strides = [1, 1]} : vector<8x512xf32> to vector<8x384xf32>
    %227 = arith.negf %226 : vector<8x384xf32>
    %228 = math.exp %227 : vector<8x384xf32>
    %cst_49 = arith.constant 1.000000e+00 : f32
    %229 = vector.broadcast %cst_49 : f32 to vector<8x384xf32>
    %230 = arith.addf %229, %228 : vector<8x384xf32>
    %231 = arith.divf %229, %230 : vector<8x384xf32>
    %232 = vector.extract_strided_slice %231 {offsets = [0, 0], sizes = [8, 128], strides = [1, 1]} : vector<8x384xf32> to vector<8x128xf32>
    %233 = vector.extract_strided_slice %231 {offsets = [0, 128], sizes = [8, 128], strides = [1, 1]} : vector<8x384xf32> to vector<8x128xf32>
    %234 = vector.extract_strided_slice %231 {offsets = [0, 256], sizes = [8, 128], strides = [1, 1]} : vector<8x384xf32> to vector<8x128xf32>
    %235 = vector.extract_strided_slice %225 {offsets = [0, 384], sizes = [8, 128], strides = [1, 1]} : vector<8x512xf32> to vector<8x128xf32>
    %236 = math.tanh %235 : vector<8x128xf32>
    %237 = arith.mulf %233, %193 : vector<8x128xf32>
    %238 = arith.mulf %232, %236 : vector<8x128xf32>
    %239 = arith.addf %237, %238 : vector<8x128xf32>
    %240 = math.tanh %239 : vector<8x128xf32>
    %241 = arith.mulf %234, %240 : vector<8x128xf32>
    %c5_i32 = arith.constant 5 : i32
    %c8_i32_50 = arith.constant 8 : i32
    %242 = arith.muli %c5_i32, %c8_i32_50 : i32
    %243 = tpu.assume_multiple %242, 8 : i32
    %244 = arith.index_cast %243 : i32 to index
    %c0_51 = arith.constant 0 : index
    %245 = vector.load %arg10[%244, %c0_51] : memref<64x512xf32, #tpu.memory_space<vmem>>, vector<8x512xf32>
    %246 = arith.truncf %218 : vector<8x128xf32> to vector<8x128xbf16>
    %cst_52 = arith.constant dense<0.000000e+00> : vector<8x512xf32>
    %247 = tpu.matmul %246, %8, %cst_52 {dimension_numbers = #tpu.dot_dimension_numbers<[1], [0], [0], [1], [0, 0, 1, 1], [], []>} : vector<8x128xbf16>, vector<128x512xbf16>, vector<8x512xf32> -> vector<8x512xf32>
    %248 = arith.addf %245, %247 : vector<8x512xf32>
    %249 = vector.extract_strided_slice %248 {offsets = [0, 0], sizes = [8, 384], strides = [1, 1]} : vector<8x512xf32> to vector<8x384xf32>
    %250 = arith.negf %249 : vector<8x384xf32>
    %251 = math.exp %250 : vector<8x384xf32>
    %cst_53 = arith.constant 1.000000e+00 : f32
    %252 = vector.broadcast %cst_53 : f32 to vector<8x384xf32>
    %253 = arith.addf %252, %251 : vector<8x384xf32>
    %254 = arith.divf %252, %253 : vector<8x384xf32>
    %255 = vector.extract_strided_slice %254 {offsets = [0, 0], sizes = [8, 128], strides = [1, 1]} : vector<8x384xf32> to vector<8x128xf32>
    %256 = vector.extract_strided_slice %254 {offsets = [0, 128], sizes = [8, 128], strides = [1, 1]} : vector<8x384xf32> to vector<8x128xf32>
    %257 = vector.extract_strided_slice %254 {offsets = [0, 256], sizes = [8, 128], strides = [1, 1]} : vector<8x384xf32> to vector<8x128xf32>
    %258 = vector.extract_strided_slice %248 {offsets = [0, 384], sizes = [8, 128], strides = [1, 1]} : vector<8x512xf32> to vector<8x128xf32>
    %259 = math.tanh %258 : vector<8x128xf32>
    %260 = arith.mulf %256, %216 : vector<8x128xf32>
    %261 = arith.mulf %255, %259 : vector<8x128xf32>
    %262 = arith.addf %260, %261 : vector<8x128xf32>
    %263 = math.tanh %262 : vector<8x128xf32>
    %264 = arith.mulf %257, %263 : vector<8x128xf32>
    %265 = arith.truncf %264 : vector<8x128xf32> to vector<8x128xbf16>
    %cst_54 = arith.constant dense<0.000000e+00> : vector<8x512xf32>
    %266 = tpu.matmul %265, %9, %cst_54 {dimension_numbers = #tpu.dot_dimension_numbers<[1], [0], [0], [1], [0, 0, 1, 1], [], []>} : vector<8x128xbf16>, vector<128x512xbf16>, vector<8x512xf32> -> vector<8x512xf32>
    %267 = vector.broadcast %11 : vector<1x512xf32> to vector<8x512xf32>
    %268 = arith.addf %266, %267 : vector<8x512xf32>
    %269 = arith.truncf %241 : vector<8x128xf32> to vector<8x128xbf16>
    %cst_55 = arith.constant dense<0.000000e+00> : vector<8x512xf32>
    %270 = tpu.matmul %269, %10, %cst_55 {dimension_numbers = #tpu.dot_dimension_numbers<[1], [0], [0], [1], [0, 0, 1, 1], [], []>} : vector<8x128xbf16>, vector<128x512xbf16>, vector<8x512xf32> -> vector<8x512xf32>
    %271 = arith.addf %268, %270 : vector<8x512xf32>
    %272 = vector.extract_strided_slice %271 {offsets = [0, 0], sizes = [8, 384], strides = [1, 1]} : vector<8x512xf32> to vector<8x384xf32>
    %273 = arith.negf %272 : vector<8x384xf32>
    %274 = math.exp %273 : vector<8x384xf32>
    %cst_56 = arith.constant 1.000000e+00 : f32
    %275 = vector.broadcast %cst_56 : f32 to vector<8x384xf32>
    %276 = arith.addf %275, %274 : vector<8x384xf32>
    %277 = arith.divf %275, %276 : vector<8x384xf32>
    %278 = vector.extract_strided_slice %277 {offsets = [0, 0], sizes = [8, 128], strides = [1, 1]} : vector<8x384xf32> to vector<8x128xf32>
    %279 = vector.extract_strided_slice %277 {offsets = [0, 128], sizes = [8, 128], strides = [1, 1]} : vector<8x384xf32> to vector<8x128xf32>
    %280 = vector.extract_strided_slice %277 {offsets = [0, 256], sizes = [8, 128], strides = [1, 1]} : vector<8x384xf32> to vector<8x128xf32>
    %281 = vector.extract_strided_slice %271 {offsets = [0, 384], sizes = [8, 128], strides = [1, 1]} : vector<8x512xf32> to vector<8x128xf32>
    %282 = math.tanh %281 : vector<8x128xf32>
    %283 = arith.mulf %279, %239 : vector<8x128xf32>
    %284 = arith.mulf %278, %282 : vector<8x128xf32>
    %285 = arith.addf %283, %284 : vector<8x128xf32>
    %286 = math.tanh %285 : vector<8x128xf32>
    %287 = arith.mulf %280, %286 : vector<8x128xf32>
    %c6_i32 = arith.constant 6 : i32
    %c8_i32_57 = arith.constant 8 : i32
    %288 = arith.muli %c6_i32, %c8_i32_57 : i32
    %289 = tpu.assume_multiple %288, 8 : i32
    %290 = arith.index_cast %289 : i32 to index
    %c0_58 = arith.constant 0 : index
    %291 = vector.load %arg10[%290, %c0_58] : memref<64x512xf32, #tpu.memory_space<vmem>>, vector<8x512xf32>
    %292 = arith.truncf %264 : vector<8x128xf32> to vector<8x128xbf16>
    %cst_59 = arith.constant dense<0.000000e+00> : vector<8x512xf32>
    %293 = tpu.matmul %292, %8, %cst_59 {dimension_numbers = #tpu.dot_dimension_numbers<[1], [0], [0], [1], [0, 0, 1, 1], [], []>} : vector<8x128xbf16>, vector<128x512xbf16>, vector<8x512xf32> -> vector<8x512xf32>
    %294 = arith.addf %291, %293 : vector<8x512xf32>
    %295 = vector.extract_strided_slice %294 {offsets = [0, 0], sizes = [8, 384], strides = [1, 1]} : vector<8x512xf32> to vector<8x384xf32>
    %296 = arith.negf %295 : vector<8x384xf32>
    %297 = math.exp %296 : vector<8x384xf32>
    %cst_60 = arith.constant 1.000000e+00 : f32
    %298 = vector.broadcast %cst_60 : f32 to vector<8x384xf32>
    %299 = arith.addf %298, %297 : vector<8x384xf32>
    %300 = arith.divf %298, %299 : vector<8x384xf32>
    %301 = vector.extract_strided_slice %300 {offsets = [0, 0], sizes = [8, 128], strides = [1, 1]} : vector<8x384xf32> to vector<8x128xf32>
    %302 = vector.extract_strided_slice %300 {offsets = [0, 128], sizes = [8, 128], strides = [1, 1]} : vector<8x384xf32> to vector<8x128xf32>
    %303 = vector.extract_strided_slice %300 {offsets = [0, 256], sizes = [8, 128], strides = [1, 1]} : vector<8x384xf32> to vector<8x128xf32>
    %304 = vector.extract_strided_slice %294 {offsets = [0, 384], sizes = [8, 128], strides = [1, 1]} : vector<8x512xf32> to vector<8x128xf32>
    %305 = math.tanh %304 : vector<8x128xf32>
    %306 = arith.mulf %302, %262 : vector<8x128xf32>
    %307 = arith.mulf %301, %305 : vector<8x128xf32>
    %308 = arith.addf %306, %307 : vector<8x128xf32>
    %309 = math.tanh %308 : vector<8x128xf32>
    %310 = arith.mulf %303, %309 : vector<8x128xf32>
    %311 = arith.truncf %310 : vector<8x128xf32> to vector<8x128xbf16>
    %cst_61 = arith.constant dense<0.000000e+00> : vector<8x512xf32>
    %312 = tpu.matmul %311, %9, %cst_61 {dimension_numbers = #tpu.dot_dimension_numbers<[1], [0], [0], [1], [0, 0, 1, 1], [], []>} : vector<8x128xbf16>, vector<128x512xbf16>, vector<8x512xf32> -> vector<8x512xf32>
    %313 = vector.broadcast %11 : vector<1x512xf32> to vector<8x512xf32>
    %314 = arith.addf %312, %313 : vector<8x512xf32>
    %315 = arith.truncf %287 : vector<8x128xf32> to vector<8x128xbf16>
    %cst_62 = arith.constant dense<0.000000e+00> : vector<8x512xf32>
    %316 = tpu.matmul %315, %10, %cst_62 {dimension_numbers = #tpu.dot_dimension_numbers<[1], [0], [0], [1], [0, 0, 1, 1], [], []>} : vector<8x128xbf16>, vector<128x512xbf16>, vector<8x512xf32> -> vector<8x512xf32>
    %317 = arith.addf %314, %316 : vector<8x512xf32>
    %318 = vector.extract_strided_slice %317 {offsets = [0, 0], sizes = [8, 384], strides = [1, 1]} : vector<8x512xf32> to vector<8x384xf32>
    %319 = arith.negf %318 : vector<8x384xf32>
    %320 = math.exp %319 : vector<8x384xf32>
    %cst_63 = arith.constant 1.000000e+00 : f32
    %321 = vector.broadcast %cst_63 : f32 to vector<8x384xf32>
    %322 = arith.addf %321, %320 : vector<8x384xf32>
    %323 = arith.divf %321, %322 : vector<8x384xf32>
    %324 = vector.extract_strided_slice %323 {offsets = [0, 0], sizes = [8, 128], strides = [1, 1]} : vector<8x384xf32> to vector<8x128xf32>
    %325 = vector.extract_strided_slice %323 {offsets = [0, 128], sizes = [8, 128], strides = [1, 1]} : vector<8x384xf32> to vector<8x128xf32>
    %326 = vector.extract_strided_slice %323 {offsets = [0, 256], sizes = [8, 128], strides = [1, 1]} : vector<8x384xf32> to vector<8x128xf32>
    %327 = vector.extract_strided_slice %317 {offsets = [0, 384], sizes = [8, 128], strides = [1, 1]} : vector<8x512xf32> to vector<8x128xf32>
    %328 = math.tanh %327 : vector<8x128xf32>
    %329 = arith.mulf %325, %285 : vector<8x128xf32>
    %330 = arith.mulf %324, %328 : vector<8x128xf32>
    %331 = arith.addf %329, %330 : vector<8x128xf32>
    %332 = math.tanh %331 : vector<8x128xf32>
    %333 = arith.mulf %326, %332 : vector<8x128xf32>
    %c7_i32 = arith.constant 7 : i32
    %c8_i32_64 = arith.constant 8 : i32
    %334 = arith.muli %c7_i32, %c8_i32_64 : i32
    %335 = tpu.assume_multiple %334, 8 : i32
    %336 = arith.index_cast %335 : i32 to index
    %c0_65 = arith.constant 0 : index
    %337 = vector.load %arg10[%336, %c0_65] : memref<64x512xf32, #tpu.memory_space<vmem>>, vector<8x512xf32>
    %338 = arith.truncf %310 : vector<8x128xf32> to vector<8x128xbf16>
    %cst_66 = arith.constant dense<0.000000e+00> : vector<8x512xf32>
    %339 = tpu.matmul %338, %8, %cst_66 {dimension_numbers = #tpu.dot_dimension_numbers<[1], [0], [0], [1], [0, 0, 1, 1], [], []>} : vector<8x128xbf16>, vector<128x512xbf16>, vector<8x512xf32> -> vector<8x512xf32>
    %340 = arith.addf %337, %339 : vector<8x512xf32>
    %341 = vector.extract_strided_slice %340 {offsets = [0, 0], sizes = [8, 384], strides = [1, 1]} : vector<8x512xf32> to vector<8x384xf32>
    %342 = arith.negf %341 : vector<8x384xf32>
    %343 = math.exp %342 : vector<8x384xf32>
    %cst_67 = arith.constant 1.000000e+00 : f32
    %344 = vector.broadcast %cst_67 : f32 to vector<8x384xf32>
    %345 = arith.addf %344, %343 : vector<8x384xf32>
    %346 = arith.divf %344, %345 : vector<8x384xf32>
    %347 = vector.extract_strided_slice %346 {offsets = [0, 0], sizes = [8, 128], strides = [1, 1]} : vector<8x384xf32> to vector<8x128xf32>
    %348 = vector.extract_strided_slice %346 {offsets = [0, 128], sizes = [8, 128], strides = [1, 1]} : vector<8x384xf32> to vector<8x128xf32>
    %349 = vector.extract_strided_slice %346 {offsets = [0, 256], sizes = [8, 128], strides = [1, 1]} : vector<8x384xf32> to vector<8x128xf32>
    %350 = vector.extract_strided_slice %340 {offsets = [0, 384], sizes = [8, 128], strides = [1, 1]} : vector<8x512xf32> to vector<8x128xf32>
    %351 = math.tanh %350 : vector<8x128xf32>
    %352 = arith.mulf %348, %308 : vector<8x128xf32>
    %353 = arith.mulf %347, %351 : vector<8x128xf32>
    %354 = arith.addf %352, %353 : vector<8x128xf32>
    %355 = math.tanh %354 : vector<8x128xf32>
    %356 = arith.mulf %349, %355 : vector<8x128xf32>
    %357 = arith.truncf %356 : vector<8x128xf32> to vector<8x128xbf16>
    %cst_68 = arith.constant dense<0.000000e+00> : vector<8x512xf32>
    %358 = tpu.matmul %357, %9, %cst_68 {dimension_numbers = #tpu.dot_dimension_numbers<[1], [0], [0], [1], [0, 0, 1, 1], [], []>} : vector<8x128xbf16>, vector<128x512xbf16>, vector<8x512xf32> -> vector<8x512xf32>
    %359 = vector.broadcast %11 : vector<1x512xf32> to vector<8x512xf32>
    %360 = arith.addf %358, %359 : vector<8x512xf32>
    %361 = arith.truncf %333 : vector<8x128xf32> to vector<8x128xbf16>
    %cst_69 = arith.constant dense<0.000000e+00> : vector<8x512xf32>
    %362 = tpu.matmul %361, %10, %cst_69 {dimension_numbers = #tpu.dot_dimension_numbers<[1], [0], [0], [1], [0, 0, 1, 1], [], []>} : vector<8x128xbf16>, vector<128x512xbf16>, vector<8x512xf32> -> vector<8x512xf32>
    %363 = arith.addf %360, %362 : vector<8x512xf32>
    %364 = vector.extract_strided_slice %363 {offsets = [0, 0], sizes = [8, 384], strides = [1, 1]} : vector<8x512xf32> to vector<8x384xf32>
    %365 = arith.negf %364 : vector<8x384xf32>
    %366 = math.exp %365 : vector<8x384xf32>
    %cst_70 = arith.constant 1.000000e+00 : f32
    %367 = vector.broadcast %cst_70 : f32 to vector<8x384xf32>
    %368 = arith.addf %367, %366 : vector<8x384xf32>
    %369 = arith.divf %367, %368 : vector<8x384xf32>
    %370 = vector.extract_strided_slice %369 {offsets = [0, 0], sizes = [8, 128], strides = [1, 1]} : vector<8x384xf32> to vector<8x128xf32>
    %371 = vector.extract_strided_slice %369 {offsets = [0, 128], sizes = [8, 128], strides = [1, 1]} : vector<8x384xf32> to vector<8x128xf32>
    %372 = vector.extract_strided_slice %369 {offsets = [0, 256], sizes = [8, 128], strides = [1, 1]} : vector<8x384xf32> to vector<8x128xf32>
    %373 = vector.extract_strided_slice %363 {offsets = [0, 384], sizes = [8, 128], strides = [1, 1]} : vector<8x512xf32> to vector<8x128xf32>
    %374 = math.tanh %373 : vector<8x128xf32>
    %375 = arith.mulf %371, %331 : vector<8x128xf32>
    %376 = arith.mulf %370, %374 : vector<8x128xf32>
    %377 = arith.addf %375, %376 : vector<8x128xf32>
    %378 = math.tanh %377 : vector<8x128xf32>
    %379 = arith.mulf %372, %378 : vector<8x128xf32>
    %c8_i32_71 = arith.constant 8 : i32
    %c0_72 = arith.constant 0 : index
    %c0_73 = arith.constant 0 : index
    %380 = vector.load %arg7[%c0_72, %c0_73] : memref<1x128xf32, #tpu.memory_space<vmem>>, vector<1x128xf32>
    %381 = vector.broadcast %380 : vector<1x128xf32> to vector<8x128xf32>
    %382 = arith.mulf %379, %381 : vector<8x128xf32>
    %cst_74 = arith.constant dense<0.000000e+00> : vector<8xf32>
    %383 = vector.multi_reduction <add>, %382, %cst_74 [1] : vector<8x128xf32> to vector<8xf32>
    %384 = vector.shape_cast %383 : vector<8xf32> to vector<8x1xf32>
    %c0_75 = arith.constant 0 : index
    %c0_76 = arith.constant 0 : index
    %385 = vector.load %arg8[%c0_75, %c0_76] : memref<1x1xf32, #tpu.memory_space<vmem>>, vector<1x1xf32>
    %386 = vector.broadcast %385 : vector<1x1xf32> to vector<8x1xf32>
    %387 = arith.addf %384, %386 : vector<8x1xf32>
    %c0_77 = arith.constant 0 : index
    %c0_78 = arith.constant 0 : index
    %388 = vector.load %arg9[%c0_77, %c0_78] : memref<8x1xf32, #tpu.memory_space<vmem>>, vector<8x1xf32>
    tpu.vector_store %arg9[%c0_77, %c0_78], %387 {strides = array<i32>} : memref<8x1xf32, #tpu.memory_space<vmem>>, vector<8x1xf32>,
    return
  }
}

</mosaic_0001>

<bundles_post_ra>
// kernel: tpu_custom_call.1
= control target key start
LH: loop header
LB: loop body
LE: loop exit
PB: predicated region body
PF: predicated region fallthrough
CT: control target
= control target key end

     0   :  { %s6085_s0 = inlined_call_operand.vmem [shape: bf16[64,16], index: 0, kind: input, shape index: {}]   ;;  %s6086_s1 = inlined_call_operand.vmem [shape: bf16[16,512], index: 1, kind: input, shape index: {}]   ;;  %s6087_s2 = inlined_call_operand.hbm [shape: bf16[128,512], index: 2, kind: input, shape index: {}]   ;;  %s6088_s3 = inlined_call_operand.vmem [shape: f32[1,512], index: 3, kind: input, shape index: {}]   ;;  %s6089_s4 = inlined_call_operand.hbm [shape: bf16[128,512], index: 4, kind: input, shape index: {}]   ;;  %s6090_s5 = inlined_call_operand.hbm [shape: bf16[128,512], index: 5, kind: input, shape index: {}]   ;;  %s6091_s6 = inlined_call_operand.vmem [shape: f32[1,512], index: 6, kind: input, shape index: {}]   ;;  %s6092_s7 = inlined_call_operand.vmem [shape: f32[1,128], index: 7, kind: input, shape index: {}]   ;;  %s6093_s8 = inlined_call_operand.<no memory space> [shape: f32[1,1], index: 8, kind: input, shape index: {}]   ;;  %s6094_s9 = inlined_call_operand.vmem [shape: f32[8,1], index: 9, kind: output, shape index: {}]  }
   0x1   :  { %v14_v0 = vstv %s6093_s8 }
   0x2   :  { %15 = vst [vmem:[#allocation3] sm:$0x1] %v14_v0 }
   0x3   :  { %16 = vsyncpa [#allocation5], 0 }
   0x4   :  { %17 = vsyncpa [#allocation7], 0  ;;  %s4293_s11 = smov [#allocation6]   ;;  %s4294_s13 = smov [#allocation4]  }
   0x5   :  { %s41_s12 = sshll.u32 %s4293_s11, 4  ;;  %s27_s14 = sshll.u32 %s4294_s13, 4  ;;  %s42_s12 = int_to_ptr.vmem [resolvable:$true] %s41_s12  ;;  %s28_s14 = int_to_ptr.vmem [resolvable:$true] %s27_s14 }
   0x6   :  { %s4237_s15 = scalar_lea.vmem %s42_s12, 4096  ;;  %p4242_p1 = scmp.lt.s32.totalorder %s42_s12, %s42_s12 }
   0x7   :  { %p4238_p0 = scmp.ne.s32.totalorder %s42_s12, %s4237_s15  ;;  %p4243_p2 = scmp.lt.s32.totalorder %s4237_s15, %s4237_s15 }
   0x9   :  { %p4244_p3 = por %p4243_p2, %p4242_p1 }
   0xb   :  { %p4245_p4 = pnand %p4244_p3, %p4238_p0 }
   0xd   :  { %4248 = shalt.err (!%p4245_p4)
}
   0xe   :  { %s4295_s16 = smov 256   ;;  %s4296_s17 = smov 16  }
   0xf   :  { %47 = dma.hbm_to_vmem [thread:$0]  %s6089_s4, 4096, %s42_s12, [#allocation7], %s4295_s16, %s4295_s16, %s4296_s17  }
  0x10   :  { %s4257_s19 = scalar_lea.vmem %s28_s14, 4096  ;;  %p4262_p6 = scmp.lt.s32.totalorder %s28_s14, %s28_s14 }
  0x11   :  { %p4258_p5 = scmp.ne.s32.totalorder %s28_s14, %s4257_s19  ;;  %p4263_p7 = scmp.lt.s32.totalorder %s4257_s19, %s4257_s19 }
  0x13   :  { %p4264_p8 = por %p4263_p7, %p4262_p6 }
  0x15   :  { %p4265_p9 = pnand %p4264_p8, %p4258_p5 }
  0x17   :  { %4268 = shalt.err (!%p4265_p9)
}
  0x18   :  { %33 = dma.hbm_to_vmem [thread:$0]  %s6087_s2, 4096, %s28_s14, [#allocation5], %s4295_s16, %s4295_s16, %s4296_s17  }
  0x19   :  { %s4297_s22 = smov [#allocation8]  }
  0x1a   :  { %s53_s23 = sshll.u32 %s4297_s22, 4  ;;  %s54_s23 = int_to_ptr.vmem [resolvable:$true] %s53_s23 }
  0x1b   :  { %s4277_s24 = scalar_lea.vmem %s54_s23, 4096  ;;  %p4282_p11 = scmp.lt.s32.totalorder %s54_s23, %s54_s23 }
  0x1c   :  { %p4278_p10 = scmp.ne.s32.totalorder %s54_s23, %s4277_s24  ;;  %p4283_p12 = scmp.lt.s32.totalorder %s4277_s24, %s4277_s24 }
  0x1e   :  { %p4284_p13 = por %p4283_p12, %p4282_p11 }
  0x20   :  { %p4285_p0 = pnand %p4284_p13, %p4278_p10 }
  0x22   :  { %4288 = shalt.err (!%p4285_p0)
}
  0x23   :  { %59 = dma.hbm_to_vmem [thread:$0]  %s6090_s5, 4096, %s54_s23, [#allocation7], %s4295_s16, %s4295_s16, %s4296_s17  }
  0x24   :  { %4289 = dma.done.wait [#allocation5], 4096  }
  0x25   :  { %4290 = vsyncadd [#allocation5], 4294963200 }
  0x26   :  { %4291 = dma.done.wait [#allocation7], 8192  }
  0x27   :  { %4292 = vsyncadd [#allocation7], 4294959104  ;;  %v6095_v1 = vmov 0   ;;  %v3627_v2 = vld [vmem:[%s6086_s1 + $0x4] ss:$16 sps:$4 sm:$0xff]   ;;  %vm150_vm0 = vcmask 130048  }
  0x28   :  { %195 = vmatprep.mubr.bf16.mxu0 %v6095_v1  ;;  %268 = vmatprep.mubr.bf16.mxu1 %v6095_v1  ;;  %v3629_v3 = vld [vmem:[%s6086_s1 + $0xc] ss:$16 sps:$4 sm:$0xff]   ;;  %v3631_v4 = vld [vmem:[%s6086_s1] ss:$16 sps:$4 sm:$0xff]   ;;  %v3632_v5 = vld [vmem:[%s6086_s1 + $0x8] ss:$16 sps:$4 sm:$0xff]  }
  0x29   :  { %177 = vmatprep.subr.bf16.mxu0 %v3627_v2  ;;  %250 = vmatprep.subr.bf16.mxu1 %v3629_v3  ;;  %v3633_v6 = vld [vmem:[%s6085_s0] sm:$0xff]   ;;  %v4385_v10 = vld [vmem:[#allocation4 + $0xe8] ss:$16 sps:$4 sm:$0xff]   ;;  %v3659_v26 = vld [vmem:[%s6085_s0 + $0x10] sm:$0xff]   ;;  %vm3444_vm1 = vcmask 7168  }
  0x2a   :  { %178 = vmatpush1.bf16.msra.mxu0 %v3631_v4  ;;  %251 = vmatpush1.bf16.msra.mxu1 %v3632_v5  ;;  %v4378_v7 = vld [vmem:[#allocation4 + $0xe4] ss:$16 sps:$4 sm:$0xff]   ;;  %v4380_v8 = vld [vmem:[#allocation4 + $0xec] ss:$16 sps:$4 sm:$0xff]   ;;  %v4382_v9 = vld [vmem:[#allocation4 + $0xe0] ss:$16 sps:$4 sm:$0xff]  }
  0x2b   :  { %605 = vmatprep.subr.bf16.mxu0 %v4378_v7  ;;  %v4389_v11 = vld [vmem:[#allocation4 + $0xc4] ss:$16 sps:$4 sm:$0xff]   ;;  %646 = vmatprep.subr.bf16.mxu1 %v4380_v8  ;;  %v4393_v12 = vld [vmem:[#allocation4 + $0xcc] ss:$16 sps:$4 sm:$0xff]   ;;  %v4395_v13 = vld [vmem:[#allocation4 + $0xc0] ss:$16 sps:$4 sm:$0xff]  }
  0x2c   :  { %v4397_v14 = vld [vmem:[#allocation4 + $0xc8] ss:$16 sps:$4 sm:$0xff]   ;;  %v4406_v16 = vld [vmem:[#allocation4 + $0xa4] ss:$16 sps:$4 sm:$0xff]   ;;  %v4409_v17 = vld [vmem:[#allocation4 + $0xac] ss:$16 sps:$4 sm:$0xff]  }
  0x2d   :  { %3467 = vmatmul.mubr.msk.bf16.vlgmr.msra.gmra.mxu0 %vm150_vm0, %v3633_v6  ;;  %3471 = vmatmul.mubr.msk.bf16.vlgmr.msra.gmra.mxu1 %vm150_vm0, %v3633_v6  ;;  %v3646_v15 = vld [vmem:[%s6085_s0 + $0x8] sm:$0xff]   ;;  %v4412_v18 = vld [vmem:[#allocation4 + $0xa0] ss:$16 sps:$4 sm:$0xff]   ;;  %v3672_v33 = vld [vmem:[%s6085_s0 + $0x18] sm:$0xff]  }
  0x2e   :  { %606 = vmatpush1.bf16.msra.mxu0 %v4382_v9  ;;  %647 = vmatpush1.bf16.msra.mxu1 %v4385_v10  ;;  %v4414_v19 = vld [vmem:[#allocation4 + $0xa8] ss:$16 sps:$4 sm:$0xff]   ;;  %v4418_v20 = vld [vmem:[#allocation4 + $0x84] ss:$16 sps:$4 sm:$0xff]   ;;  %v4421_v21 = vld [vmem:[#allocation4 + $0x8c] ss:$16 sps:$4 sm:$0xff]  }
  0x2f   :  { %607 = vmatprep.subr.bf16.mxu0 %v4389_v11  ;;  %648 = vmatprep.subr.bf16.mxu1 %v4393_v12  ;;  %v4425_v22 = vld [vmem:[#allocation4 + $0x80] ss:$16 sps:$4 sm:$0xff]   ;;  %v4428_v23 = vld [vmem:[#allocation4 + $0x88] ss:$16 sps:$4 sm:$0xff]   ;;  %v4433_v24 = vld [vmem:[#allocation4 + $0x64] ss:$16 sps:$4 sm:$0xff]  }
  0x30   :  { %205 = vmatprep.mubr.bf16.mxu0 %v6095_v1  ;;  %278 = vmatprep.mubr.bf16.mxu1 %v6095_v1  ;;  %v4437_v25 = vld [vmem:[#allocation4 + $0x6c] ss:$16 sps:$4 sm:$0xff]   ;;  %v4443_v27 = vld [vmem:[#allocation4 + $0x60] ss:$16 sps:$4 sm:$0xff]   ;;  %v4447_v28 = vld [vmem:[#allocation4 + $0x68] ss:$16 sps:$4 sm:$0xff]  }
  0x31   :  { %v4449_v29 = vld [vmem:[#allocation4 + $0x44] ss:$16 sps:$4 sm:$0xff]   ;;  %v4452_v30 = vld [vmem:[#allocation4 + $0x4c] ss:$16 sps:$4 sm:$0xff]   ;;  %v4457_v31 = vld [vmem:[#allocation4 + $0x40] ss:$16 sps:$4 sm:$0xff]  }
  0x32   :  { %608 = vmatpush1.bf16.msra.mxu0 %v4395_v13  ;;  %649 = vmatpush1.bf16.msra.mxu1 %v4397_v14  ;;  %v4459_v32 = vld [vmem:[#allocation4 + $0x48] ss:$16 sps:$4 sm:$0xff]   ;;  %v4467_v34 = vld [vmem:[#allocation4 + $0x24] ss:$16 sps:$4 sm:$0xff]   ;;  %v4471_v35 = vld [vmem:[#allocation4 + $0x2c] ss:$16 sps:$4 sm:$0xff]  }
  0x33   :  { %609 = vmatprep.subr.bf16.mxu0 %v4406_v16  ;;  %650 = vmatprep.subr.bf16.mxu1 %v4409_v17  ;;  %v4473_v36 = vld [vmem:[#allocation4 + $0x20] ss:$16 sps:$4 sm:$0xff]   ;;  %v4475_v37 = vld [vmem:[#allocation4 + $0x28] ss:$16 sps:$4 sm:$0xff]   ;;  %v4477_v38 = vld [vmem:[#allocation4 + $0x4] ss:$16 sps:$4 sm:$0xff]  }
  0x34   :  { %v4480_v39 = vld [vmem:[#allocation4 + $0xc] ss:$16 sps:$4 sm:$0xff]   ;;  %v4485_v40 = vld [vmem:[#allocation4] ss:$16 sps:$4 sm:$0xff]   ;;  %v4489_v41 = vld [vmem:[#allocation4 + $0x8] ss:$16 sps:$4 sm:$0xff]  }
  0x35   :  { %3468 = vmatmul.mubr.msk.bf16.gmra.mxu0 %vm150_vm0, %v3646_v15  ;;  %3472 = vmatmul.mubr.msk.bf16.gmra.mxu1 %vm150_vm0, %v3646_v15  ;;  %v4503_v42 = vld [vmem:[#allocation6 + $0xe4] ss:$16 sps:$4 sm:$0xff]   ;;  %v4505_v43 = vld [vmem:[#allocation6 + $0xec] ss:$16 sps:$4 sm:$0xff]   ;;  %v4507_v44 = vld [vmem:[#allocation6 + $0xe0] ss:$16 sps:$4 sm:$0xff]  }
  0x36   :  { %610 = vmatpush1.bf16.msra.mxu0 %v4412_v18  ;;  %215 = vmatprep.mubr.bf16.mxu0 %v6095_v1  ;;  %v4509_v45 = vld [vmem:[#allocation6 + $0xe8] ss:$16 sps:$4 sm:$0xff]   ;;  %v4515_v46 = vld [vmem:[#allocation6 + $0xc4] ss:$16 sps:$4 sm:$0xff]   ;;  %v4517_v47 = vld [vmem:[#allocation6 + $0xcc] ss:$16 sps:$4 sm:$0xff]  }
  0x37   :  { %651 = vmatpush1.bf16.msra.mxu1 %v4414_v19  ;;  %611 = vmatprep.subr.bf16.mxu0 %v4418_v20  ;;  %v4519_v48 = vld [vmem:[#allocation6 + $0xc0] ss:$16 sps:$4 sm:$0xff]   ;;  %v4521_v49 = vld [vmem:[#allocation6 + $0xc8] ss:$16 sps:$4 sm:$0xff]   ;;  %v4527_v50 = vld [vmem:[#allocation6 + $0xa4] ss:$16 sps:$4 sm:$0xff]  }
  0x38   :  { %652 = vmatprep.subr.bf16.mxu1 %v4421_v21  ;;  %288 = vmatprep.mubr.bf16.mxu1 %v6095_v1  ;;  %6408 = vst [vmem:[#allocation11_spill] sm:$0xff] %v4521_v49  ;;  %6409 = vst [vmem:[#allocation12_spill] sm:$0xff] %v4527_v50  ;;  %v4529_v51 = vld [vmem:[#allocation6 + $0xac] ss:$16 sps:$4 sm:$0xff]   ;;  %v4531_v52 = vld [vmem:[#allocation6 + $0xa0] ss:$16 sps:$4 sm:$0xff]  }
  0x39   :  { %6410 = vst [vmem:[#allocation13_spill] sm:$0xff] %v4529_v51  ;;  %6411 = vst [vmem:[#allocation14_spill] sm:$0xff] %v4531_v52  ;;  %v4533_v53 = vld [vmem:[#allocation6 + $0xa8] ss:$16 sps:$4 sm:$0xff]   ;;  %v4539_v54 = vld [vmem:[#allocation6 + $0x84] ss:$16 sps:$4 sm:$0xff]  }
  0x3a   :  { %612 = vmatpush1.bf16.msra.mxu0 %v4425_v22  ;;  %6412 = vst [vmem:[#allocation15_spill] sm:$0xff] %v4533_v53  ;;  %6413 = vst [vmem:[#allocation16_spill] sm:$0xff] %v4539_v54  ;;  %v4541_v55 = vld [vmem:[#allocation6 + $0x8c] ss:$16 sps:$4 sm:$0xff]   ;;  %v4543_v56 = vld [vmem:[#allocation6 + $0x80] ss:$16 sps:$4 sm:$0xff]  }
  0x3b   :  { %653 = vmatpush1.bf16.msra.mxu1 %v4428_v23  ;;  %613 = vmatprep.subr.bf16.mxu0 %v4433_v24  ;;  %6414 = vst [vmem:[#allocation17_spill] sm:$0xff] %v4541_v55  ;;  %6415 = vst [vmem:[#allocation18_spill] sm:$0xff] %v4543_v56  ;;  %v4545_v57 = vld [vmem:[#allocation6 + $0x88] ss:$16 sps:$4 sm:$0xff]   ;;  %v4549_v58 = vld [vmem:[#allocation6 + $0x64] ss:$16 sps:$4 sm:$0xff]  }
  0x3c   :  { %654 = vmatprep.subr.bf16.mxu1 %v4437_v25  ;;  %6416 = vst [vmem:[#allocation19_spill] sm:$0xff] %v4545_v57  ;;  %6417 = vst [vmem:[#allocation20_spill] sm:$0xff] %v4549_v58  ;;  %v4551_v59 = vld [vmem:[#allocation6 + $0x6c] ss:$16 sps:$4 sm:$0xff]   ;;  %v4555_v60 = vld [vmem:[#allocation6 + $0x60] ss:$16 sps:$4 sm:$0xff]  }
  0x3d   :  { %3469 = vmatmul.mubr.msk.bf16.gmra.mxu0 %vm150_vm0, %v3659_v26  ;;  %3473 = vmatmul.mubr.msk.bf16.gmra.mxu1 %vm150_vm0, %v3659_v26  ;;  %6418 = vst [vmem:[#allocation21_spill] sm:$0xff] %v4551_v59  ;;  %6419 = vst [vmem:[#allocation22_spill] sm:$0xff] %v4555_v60  ;;  %v4557_v61 = vld [vmem:[#allocation6 + $0x68] ss:$16 sps:$4 sm:$0xff]   ;;  %v4561_v62 = vld [vmem:[#allocation6 + $0x44] ss:$16 sps:$4 sm:$0xff]  }
  0x3e   :  { %614 = vmatpush1.bf16.msra.mxu0 %v4443_v27  ;;  %225 = vmatprep.mubr.bf16.mxu0 %v6095_v1  ;;  %6420 = vst [vmem:[#allocation23_spill] sm:$0xff] %v4557_v61  ;;  %6421 = vst [vmem:[#allocation24_spill] sm:$0xff] %v4561_v62  ;;  %v4563_v63 = vld [vmem:[#allocation6 + $0x4c] ss:$16 sps:$4 sm:$0xff]   ;;  %v4567_v0 = vld [vmem:[#allocation6 + $0x40] ss:$16 sps:$4 sm:$0xff]  }
  0x3f   :  { %655 = vmatpush1.bf16.msra.mxu1 %v4447_v28  ;;  %615 = vmatprep.subr.bf16.mxu0 %v4449_v29  ;;  %6422 = vst [vmem:[#allocation25_spill] sm:$0xff] %v4563_v63  ;;  %6423 = vst [vmem:[#allocation26_spill] sm:$0xff] %v4567_v0  ;;  %v4569_v2 = vld [vmem:[#allocation6 + $0x48] ss:$16 sps:$4 sm:$0xff]   ;;  %v4573_v3 = vld [vmem:[#allocation6 + $0x24] ss:$16 sps:$4 sm:$0xff]  }
  0x40   :  { %656 = vmatprep.subr.bf16.mxu1 %v4452_v30  ;;  %298 = vmatprep.mubr.bf16.mxu1 %v6095_v1  ;;  %6424 = vst [vmem:[#allocation27_spill] sm:$0xff] %v4569_v2  ;;  %6425 = vst [vmem:[#allocation28_spill] sm:$0xff] %v4573_v3  ;;  %v4575_v4 = vld [vmem:[#allocation6 + $0x2c] ss:$16 sps:$4 sm:$0xff]   ;;  %v4579_v5 = vld [vmem:[#allocation6 + $0x20] ss:$16 sps:$4 sm:$0xff]  }
  0x41   :  { %6426 = vst [vmem:[#allocation29_spill] sm:$0xff] %v4575_v4  ;;  %6427 = vst [vmem:[#allocation30_spill] sm:$0xff] %v4579_v5  ;;  %v4581_v6 = vld [vmem:[#allocation6 + $0x28] ss:$16 sps:$4 sm:$0xff]   ;;  %v4585_v15 = vld [vmem:[#allocation6 + $0x4] ss:$16 sps:$4 sm:$0xff]  }
  0x42   :  { %616 = vmatpush1.bf16.msra.mxu0 %v4457_v31  ;;  %6428 = vst [vmem:[#allocation31_spill] sm:$0xff] %v4581_v6  ;;  %6429 = vst [vmem:[#allocation32_spill] sm:$0xff] %v4585_v15  ;;  %v4587_v26 = vld [vmem:[#allocation6 + $0xc] ss:$16 sps:$4 sm:$0xff]  }
  0x43   :  { %657 = vmatpush1.bf16.msra.mxu1 %v4459_v32  ;;  %617 = vmatprep.subr.bf16.mxu0 %v4467_v34  ;;  %6430 = vst [vmem:[#allocation33_spill] sm:$0xff] %v4587_v26 }
  0x44   :  { %658 = vmatprep.subr.bf16.mxu1 %v4471_v35 }
  0x45   :  { %3470 = vmatmul.mubr.msk.bf16.gmra.mxu0 %vm150_vm0, %v3672_v33  ;;  %3474 = vmatmul.mubr.msk.bf16.gmra.mxu1 %vm150_vm0, %v3672_v33  ;;  %v4591_v33 = vld [vmem:[#allocation6] ss:$16 sps:$4 sm:$0xff]  }
  0x46   :  { %618 = vmatpush1.bf16.msra.mxu0 %v4473_v36  ;;  %637 = vmatprep.mubr.bf16.mxu0 %v6095_v1  ;;  %6431 = vst [vmem:[#allocation34_spill] sm:$0xff] %v4591_v33 }
  0x47   :  { %659 = vmatpush1.bf16.msra.mxu1 %v4475_v37  ;;  %619 = vmatprep.subr.bf16.mxu0 %v4477_v38 }
  0x48   :  { %660 = vmatprep.subr.bf16.mxu1 %v4480_v39  ;;  %678 = vmatprep.mubr.bf16.mxu1 %v6095_v1 }
  0x4a   :  { %620 = vmatpush1.bf16.msra.mxu0 %v4485_v40 }
  0x4b   :  { %661 = vmatpush1.bf16.msra.mxu1 %v4489_v41  ;;  %897 = vmatprep.subr.bf16.mxu0 %v4503_v42 }
  0x4c   :  { %938 = vmatprep.subr.bf16.mxu1 %v4505_v43 }
  0x4d   :  { %638 = vmatmul.mubr.bf16.vlgmr.msra.gmra.mxu0 %v6095_v1 }
  0x4e   :  { %679 = vmatmul.mubr.bf16.vlgmr.msra.gmra.mxu1 %v6095_v1  ;;  %929 = vmatprep.mubr.bf16.mxu0 %v6095_v1 }
  0x4f   :  { %970 = vmatprep.mubr.bf16.mxu1 %v6095_v1  ;;  %898 = vmatpush1.bf16.msra.mxu0 %v4507_v44  ;;  %v4593_v1 = vld [vmem:[#allocation6 + $0x8] ss:$16 sps:$4 sm:$0xff]  }
  0x50   :  { %939 = vmatpush1.bf16.msra.mxu1 %v4509_v45  ;;  %899 = vmatprep.subr.bf16.mxu0 %v4515_v46  ;;  %6432 = vst [vmem:[#allocation35_spill] sm:$0xff] %v4593_v1 }
  0x51   :  { %940 = vmatprep.subr.bf16.mxu1 %v4517_v47 }
  0x53   :  { %900 = vmatpush1.bf16.msra.mxu0 %v4519_v48 }
  0x54   :  { %941 = vmatpush1.bf16.msra.mxu1 %v4521_v49  ;;  %901 = vmatprep.subr.bf16.mxu0 %v4527_v50 }
  0x55   :  { %942 = vmatprep.subr.bf16.mxu1 %v4529_v51 }
  0x57   :  { %902 = vmatpush1.bf16.msra.mxu0 %v4531_v52 }
  0x58   :  { %943 = vmatpush1.bf16.msra.mxu1 %v4533_v53  ;;  %903 = vmatprep.subr.bf16.mxu0 %v4539_v54 }
  0x59   :  { %944 = vmatprep.subr.bf16.mxu1 %v4541_v55 }
  0x5b   :  { %904 = vmatpush1.bf16.msra.mxu0 %v4543_v56 }
  0x5c   :  { %945 = vmatpush1.bf16.msra.mxu1 %v4545_v57  ;;  %905 = vmatprep.subr.bf16.mxu0 %v4549_v58 }
  0x5d   :  { %946 = vmatprep.subr.bf16.mxu1 %v4551_v59 }
  0x5f   :  { %906 = vmatpush1.bf16.msra.mxu0 %v4555_v60 }
  0x60   :  { %947 = vmatpush1.bf16.msra.mxu1 %v4557_v61  ;;  %907 = vmatprep.subr.bf16.mxu0 %v4561_v62 }
  0x61   :  { %948 = vmatprep.subr.bf16.mxu1 %v4563_v63 }
  0x63   :  { %908 = vmatpush1.bf16.msra.mxu0 %v4567_v0  ;;  %v88_v0 = vld [vmem:[%s6088_s3] sm:$0xf] }
  0x64   :  { %949 = vmatpush1.bf16.msra.mxu1 %v4569_v2  ;;  %909 = vmatprep.subr.bf16.mxu0 %v4573_v3  ;;  %v4597_v2 = vld [vmem:[#allocation8 + $0xe4] ss:$16 sps:$4 sm:$0xff]   ;;  %v4599_v3 = vld [vmem:[#allocation8 + $0xec] ss:$16 sps:$4 sm:$0xff]  }
  0x65   :  { %950 = vmatprep.subr.bf16.mxu1 %v4575_v4  ;;  %6433 = vst [vmem:[#allocation36_spill] sm:$0xff] %v4597_v2  ;;  %6434 = vst [vmem:[#allocation37_spill] sm:$0xff] %v4599_v3 }
  0x67   :  { %910 = vmatpush1.bf16.msra.mxu0 %v4579_v5 }
  0x68   :  { %951 = vmatpush1.bf16.msra.mxu1 %v4581_v6  ;;  %911 = vmatprep.subr.bf16.mxu0 %v4585_v15  ;;  %v90_v6 = vlaneseq }
  0x69   :  { %952 = vmatprep.subr.bf16.mxu1 %v4587_v26 }
  0x6a   :  { %v4605_v5 = vshrl.u32 %v90_v6, 7 }
  0x6b   :  { %912 = vmatpush1.bf16.msra.mxu0 %v4591_v33 }
  0x6c   :  { %953 = vmatpush1.bf16.msra.mxu1 %v4593_v1  ;;  %1139 = vmatprep.subr.bf16.mxu0 %v4597_v2  ;;  %6435 = vst [vmem:[#allocation38_spill] sm:$0xff] %v4605_v5  ;;  %v6133_v4 = vsub.s32 2, %v4605_v5  ;;  %v6142_v15 = vsub.s32 0, %v4605_v5  ;;  %v6149_v6 = vsub.s32 1, %v4605_v5  ;;  %v6436_v62 = vsub.s32 3, %v4605_v5 }
  0x6d   :  { %1180 = vmatprep.subr.bf16.mxu1 %v4599_v3 }
  0x6e   :  { %v4619_v3 = vrot.slane %v88_v0, %v6133_v4  ;;  %v93_v26 = vrot.slane %v88_v0, %v6142_v15  ;;  %v4630_v61 = vrot.slane %v88_v0, %v6436_v62  ;;  %v97_v58 = vrot.slane %v88_v0, %v6149_v6 }
  0xed   :  { %v4613_v33 = vpop.f32.mrf.mxu0  ;;  %v4615_v1 = vpop.f32.mrf.mxu1 }
  0xef   :  { %v4622_v2 = vpop.f32.mrf.mxu0  ;;  %v4624_v63 = vpop.f32.mrf.mxu1 }
  0xf1   :  { %v201_v60 = vpop.f32.mrf.mxu0  ;;  %v274_v59 = vpop.f32.mrf.mxu1 }
  0xf2   :  { %v4634_v4 = vadd.f32 %v201_v60, %v93_v26  ;;  %v4637_v57 = vadd.f32 %v274_v59, %v4619_v3 }
  0xf3   :  { %v203_v56 = vpop.f32.mrf.mxu0  ;;  %v276_v55 = vpop.f32.mrf.mxu1 }
  0xf4   :  { %6437 = vst [vmem:[#allocation39_spill] sm:$0xff] %v4634_v4  ;;  %6438 = vst [vmem:[#allocation40_spill] sm:$0xff] %v4637_v57  ;;  %v4639_v54 = vadd.f32 %v203_v56, %v97_v58  ;;  %v4642_v15 = vadd.f32 %v276_v55, %v4630_v61 }
  0xf5   :  { %v207_v53 = vpop.f32.mrf.mxu0  ;;  %v280_v62 = vpop.f32.mrf.mxu1 }
  0xf6   :  { %6439 = vst [vmem:[#allocation41_spill] sm:$0xff] %v4639_v54  ;;  %6440 = vst [vmem:[#allocation42_spill] sm:$0xff] %v4642_v15  ;;  %v4644_v52 = vadd.f32 %v207_v53, %v93_v26  ;;  %v4647_v51 = vadd.f32 %v280_v62, %v4619_v3 }
  0xf7   :  { %v209_v0 = vpop.f32.mrf.mxu0  ;;  %v282_v60 = vpop.f32.mrf.mxu1 }
  0xf8   :  { %6441 = vst [vmem:[#allocation43_spill] sm:$0xff] %v4644_v52  ;;  %6442 = vst [vmem:[#allocation44_spill] sm:$0xff] %v4647_v51  ;;  %v4649_v6 = vadd.f32 %v209_v0, %v97_v58  ;;  %v4652_v59 = vadd.f32 %v282_v60, %v4630_v61 }
  0xf9   :  { %v211_v57 = vpop.f32.mrf.mxu0  ;;  %v284_v56 = vpop.f32.mrf.mxu1 }
  0xfa   :  { %6443 = vst [vmem:[#allocation45_spill] sm:$0xff] %v4649_v6  ;;  %6444 = vst [vmem:[#allocation46_spill] sm:$0xff] %v4652_v59  ;;  %v4654_v54 = vadd.f32 %v211_v57, %v93_v26  ;;  %v4657_v55 = vadd.f32 %v284_v56, %v4619_v3 }
  0xfb   :  { %v213_v15 = vpop.f32.mrf.mxu0  ;;  %v286_v53 = vpop.f32.mrf.mxu1 }
  0xfc   :  { %6445 = vst [vmem:[#allocation47_spill] sm:$0xff] %v4654_v54  ;;  %6446 = vst [vmem:[#allocation48_spill] sm:$0xff] %v4657_v55  ;;  %v4659_v52 = vadd.f32 %v213_v15, %v97_v58  ;;  %v4662_v62 = vadd.f32 %v286_v53, %v4630_v61 }
  0xfd   :  { %v217_v51 = vpop.f32.mrf.mxu0  ;;  %v290_v0 = vpop.f32.mrf.mxu1 }
  0xfe   :  { %6447 = vst [vmem:[#allocation49_spill] sm:$0xff] %v4659_v52  ;;  %6448 = vst [vmem:[#allocation50_spill] sm:$0xff] %v4662_v62  ;;  %v4664_v6 = vadd.f32 %v217_v51, %v93_v26  ;;  %v4667_v60 = vadd.f32 %v290_v0, %v4619_v3 }
  0xff   :  { %v219_v59 = vpop.f32.mrf.mxu0  ;;  %v292_v57 = vpop.f32.mrf.mxu1 }
 0x100   :  { %6449 = vst [vmem:[#allocation51_spill] sm:$0xff] %v4664_v6  ;;  %6450 = vst [vmem:[#allocation52_spill] sm:$0xff] %v4667_v60  ;;  %v4669_v54 = vadd.f32 %v219_v59, %v97_v58  ;;  %v4672_v56 = vadd.f32 %v292_v57, %v4630_v61 }
 0x101   :  { %v221_v55 = vpop.f32.mrf.mxu0  ;;  %v294_v15 = vpop.f32.mrf.mxu1 }
 0x102   :  { %6451 = vst [vmem:[#allocation53_spill] sm:$0xff] %v4669_v54  ;;  %6452 = vst [vmem:[#allocation54_spill] sm:$0xff] %v4672_v56  ;;  %v4674_v52 = vadd.f32 %v221_v55, %v93_v26  ;;  %v4677_v53 = vadd.f32 %v294_v15, %v4619_v3 }
 0x103   :  { %v223_v62 = vpop.f32.mrf.mxu0  ;;  %v296_v51 = vpop.f32.mrf.mxu1 }
 0x104   :  { %6453 = vst [vmem:[#allocation55_spill] sm:$0xff] %v4674_v52  ;;  %6454 = vst [vmem:[#allocation56_spill] sm:$0xff] %v4677_v53  ;;  %v4679_v6 = vadd.f32 %v223_v62, %v97_v58  ;;  %v4682_v0 = vadd.f32 %v296_v51, %v4630_v61 }
 0x105   :  { %v227_v60 = vpop.f32.mrf.mxu0  ;;  %v300_v59 = vpop.f32.mrf.mxu1 }
 0x106   :  { %6455 = vst [vmem:[#allocation57_spill] sm:$0xff] %v4679_v6  ;;  %6456 = vst [vmem:[#allocation58_spill] sm:$0xff] %v4682_v0  ;;  %v4684_v54 = vadd.f32 %v227_v60, %v93_v26  ;;  %v4687_v57 = vadd.f32 %v300_v59, %v4619_v3 }
 0x107   :  { %v229_v56 = vpop.f32.mrf.mxu0  ;;  %v302_v55 = vpop.f32.mrf.mxu1 }
 0x108   :  { %6457 = vst [vmem:[#allocation59_spill] sm:$0xff] %v4684_v54  ;;  %6458 = vst [vmem:[#allocation60_spill] sm:$0xff] %v4687_v57  ;;  %v4689_v52 = vadd.f32 %v229_v56, %v97_v58  ;;  %v4692_v15 = vadd.f32 %v302_v55, %v4630_v61  ;;  %v198_v54 = vadd.f32 %v4613_v33, %v93_v26 }
 0x109   :  { %v231_v53 = vpop.f32.mrf.mxu0  ;;  %v304_v62 = vpop.f32.mrf.mxu1  ;;  %v200_v55 = vadd.f32 %v4622_v2, %v97_v58  ;;  %v271_v33 = vadd.f32 %v4615_v1, %v4619_v3 }
 0x10a   :  { %6459 = vst [vmem:[#allocation61_spill] sm:$0xff] %v4689_v52  ;;  %6460 = vst [vmem:[#allocation62_spill] sm:$0xff] %v4692_v15  ;;  %v4694_v6 = vadd.f32 %v231_v53, %v93_v26  ;;  %v4697_v51 = vadd.f32 %v304_v62, %v4619_v3 }
 0x10b   :  { %v233_v0 = vpop.f32.mrf.mxu0  ;;  %v306_v60 = vpop.f32.mrf.mxu1 }
 0x10c   :  { %6461 = vst [vmem:[#allocation63_spill] sm:$0xff] %v4694_v6  ;;  %6462 = vst [vmem:[#allocation64_spill] sm:$0xff] %v4697_v51  ;;  %v4700_v59 = vadd.f32 %v233_v0, %v97_v58  ;;  %v4703_v57 = vadd.f32 %v306_v60, %v4630_v61  ;;  %v273_v58 = vadd.f32 %v4624_v63, %v4630_v61 }
 0x10d   :  { %v639_v56 = vpop.f32.mrf.mxu0 }
 0x10e   :  { %6463 = vst [vmem:[#allocation65_spill] sm:$0xff] %v4700_v59  ;;  %6464 = vst [vmem:[#allocation66_spill] sm:$0xff] %v4703_v57  ;;  %v687_v15 = vadd.f32 %v639_v56, %v198_v54  ;;  %v680_v52 = vpop.f32.mrf.mxu1  ;;  %v4777_v57 = vld [vmem:[#allocation8 + $0x40] ss:$16 sps:$4 sm:$0xff]   ;;  %v4779_v59 = vld [vmem:[#allocation8 + $0x48] ss:$16 sps:$4 sm:$0xff]  }
 0x10f   :  { %v641_v4 = vpop.f32.mrf.mxu0  ;;  %v689_v0 = vadd.f32 %v680_v52, %v271_v33  ;;  %v4719_v33 = vld [vmem:[#allocation8 + $0xc4] ss:$16 sps:$4 sm:$0xff]   ;;  %6473 = vst [vmem:[#allocation74_spill] sm:$0xff] %v4777_v57 }
 0x110   :  { %v3507_v53 = vmul.f32 -1.442695, %v687_v15  ;;  %v688_v6 = vadd.f32 %v641_v4, %v200_v55  ;;  %v682_v5 = vpop.f32.mrf.mxu1 }
 0x111   :  { %v643_v62 = vpop.f32.mrf.mxu0  ;;  %v3509_v54 = vmul.f32 -1.442695, %v689_v0  ;;  %v690_v60 = vadd.f32 %v682_v5, %v273_v58  ;;  %v4721_v0 = vld [vmem:[#allocation8 + $0xcc] ss:$16 sps:$4 sm:$0xff]   ;;  %v4727_v58 = vld [vmem:[#allocation8 + $0xc0] ss:$16 sps:$4 sm:$0xff]  }
 0x112   :  { %3781 = vpow2.f32 %v3507_v53  ;;  %v3508_v51 = vmul.f32 -1.442695, %v688_v6  ;;  %v684_v50 = vpop.f32.mrf.mxu1  ;;  %v4713_v53 = vld [vmem:[#allocation8 + $0xe0] ss:$16 sps:$4 sm:$0xff]   ;;  %v4715_v62 = vld [vmem:[#allocation8 + $0xe8] ss:$16 sps:$4 sm:$0xff]  }
 0x113   :  { %v644_v49 = vpop.f32.mrf.mxu0 }
 0x114   :  { %3783 = vpow2.f32 %v3508_v51  ;;  %v685_v26 = vpop.f32.mrf.mxu1 }
 0x115   :  { %3785 = vpow2.f32 %v3509_v54  ;;  %v4729_v54 = vld [vmem:[#allocation8 + $0xc8] ss:$16 sps:$4 sm:$0xff]  }
 0x11f   :  { %v3782_v2 = vpop.eup %3781 }
 0x120   :  { %v700_v15 = vadd.f32 1.0, %v3782_v2  ;;  %v4733_v2 = vld [vmem:[#allocation8 + $0xa4] ss:$16 sps:$4 sm:$0xff]  }
 0x121   :  { %v3784_v4 = vpop.eup %3783 }
 0x122   :  { %3787 = vrcp.f32 %v700_v15  ;;  %v701_v56 = vadd.f32 1.0, %v3784_v4  ;;  %v3786_v49 = vpop.eup %3785  ;;  %v6465_v15 = vmov 0   ;;  %v4741_v4 = vld [vmem:[#allocation8 + $0xa0] ss:$16 sps:$4 sm:$0xff]  }
 0x123   :  { %3789 = vtanh.f32 %v690_v60  ;;  %v702_v55 = vadd.f32 1.0, %v3786_v49  ;;  %v4735_v60 = vld [vmem:[#allocation8 + $0xac] ss:$16 sps:$4 sm:$0xff]   ;;  %v4747_v49 = vld [vmem:[#allocation8 + $0x84] ss:$16 sps:$4 sm:$0xff]  }
 0x124   :  { %3791 = vrcp.f32 %v701_v56  ;;  %v4743_v56 = vld [vmem:[#allocation8 + $0xa8] ss:$16 sps:$4 sm:$0xff]  }
 0x125   :  { %3793 = vrcp.f32 %v702_v55  ;;  %v4759_v55 = vld [vmem:[#allocation8 + $0x64] ss:$16 sps:$4 sm:$0xff]  }
 0x126   :  { %6467 = vst [vmem:[#allocation68_spill] sm:$0xff] %v4759_v55 }
 0x12f   :  { %v3788_v50 = vpop.eup %3787 }
 0x130   :  { %v3790_v6 = vpop.eup %3789 }
 0x131   :  { %v3792_v51 = vpop.eup %3791  ;;  %v711_v52 = vmul.f32 %v3790_v6, %v3788_v50  ;;  %v4749_v50 = vld [vmem:[#allocation8 + $0x8c] ss:$16 sps:$4 sm:$0xff]   ;;  %v4753_v6 = vld [vmem:[#allocation8 + $0x80] ss:$16 sps:$4 sm:$0xff]  }
 0x132   :  { %v710_v1 = vmul.f32 0.0, %v3792_v51  ;;  %v3794_v61 = vpop.eup %3793  ;;  %v4755_v51 = vld [vmem:[#allocation8 + $0x88] ss:$16 sps:$4 sm:$0xff]  }
 0x133   :  { %6466 = vst [vmem:[#allocation67_spill] sm:$0xff] %v4755_v51 }
 0x134   :  { %v4710_v3 = vadd.f32 %v711_v52, %v710_v1  ;;  %v4761_v1 = vld [vmem:[#allocation8 + $0x6c] ss:$16 sps:$4 sm:$0xff]   ;;  %v4765_v52 = vld [vmem:[#allocation8 + $0x60] ss:$16 sps:$4 sm:$0xff]  }
 0x135   :  { %6468 = vst [vmem:[#allocation69_spill] sm:$0xff] %v4761_v1  ;;  %6469 = vst [vmem:[#allocation70_spill] sm:$0xff] %v4765_v52 }
 0x136   :  { %3795 = vtanh.f32 %v4710_v3 }
 0x143   :  { %v3796_v63 = vpop.eup %3795 }
 0x144   :  { %v714_v5 = vmul.f32 %v3796_v63, %v3794_v61  ;;  %v4767_v61 = vld [vmem:[#allocation8 + $0x68] ss:$16 sps:$4 sm:$0xff]   ;;  %v4771_v63 = vld [vmem:[#allocation8 + $0x44] ss:$16 sps:$4 sm:$0xff]  }
 0x145   :  { %6470 = vst [vmem:[#allocation71_spill] sm:$0xff] %v4767_v61  ;;  %6471 = vst [vmem:[#allocation72_spill] sm:$0xff] %v4771_v63 }
 0x146   :  { %v4717_v26 = vpack.c.bf16 %v714_v5, %v714_v5  ;;  %v4773_v5 = vld [vmem:[#allocation8 + $0x4c] ss:$16 sps:$4 sm:$0xff]  }
 0x147   :  { %6472 = vst [vmem:[#allocation73_spill] sm:$0xff] %v4773_v5 }
 0x148   :  { %930 = vmatmul.mubr.bf16.vlgmr.msra.gmra.mxu0 %v4717_v26  ;;  %971 = vmatmul.mubr.bf16.vlgmr.msra.gmra.mxu1 %v4717_v26 }
 0x149   :  { %1140 = vmatpush1.bf16.msra.mxu0 %v4713_v53  ;;  %1181 = vmatpush1.bf16.msra.mxu1 %v4715_v62 }
 0x14a   :  { %1141 = vmatprep.subr.bf16.mxu0 %v4719_v33  ;;  %1182 = vmatprep.subr.bf16.mxu1 %v4721_v0 }
 0x14b   :  { %1171 = vmatprep.mubr.bf16.mxu0 %v6465_v15  ;;  %1212 = vmatprep.mubr.bf16.mxu1 %v6465_v15 }
 0x14d   :  { %1142 = vmatpush1.bf16.msra.mxu0 %v4727_v58  ;;  %1183 = vmatpush1.bf16.msra.mxu1 %v4729_v54 }
 0x14e   :  { %1143 = vmatprep.subr.bf16.mxu0 %v4733_v2  ;;  %1184 = vmatprep.subr.bf16.mxu1 %v4735_v60 }
 0x151   :  { %1144 = vmatpush1.bf16.msra.mxu0 %v4741_v4  ;;  %1185 = vmatpush1.bf16.msra.mxu1 %v4743_v56 }
 0x152   :  { %1145 = vmatprep.subr.bf16.mxu0 %v4747_v49  ;;  %1186 = vmatprep.subr.bf16.mxu1 %v4749_v50 }
 0x155   :  { %1146 = vmatpush1.bf16.msra.mxu0 %v4753_v6  ;;  %1187 = vmatpush1.bf16.msra.mxu1 %v4755_v51  ;;  %v4783_v51 = vld [vmem:[#allocation8 + $0x24] ss:$16 sps:$4 sm:$0xff]  }
 0x156   :  { %1147 = vmatprep.subr.bf16.mxu0 %v4759_v55  ;;  %1188 = vmatprep.subr.bf16.mxu1 %v4761_v1  ;;  %v4785_v55 = vld [vmem:[#allocation8 + $0x2c] ss:$16 sps:$4 sm:$0xff]   ;;  %v4789_v1 = vld [vmem:[#allocation8 + $0x20] ss:$16 sps:$4 sm:$0xff]  }
 0x159   :  { %1148 = vmatpush1.bf16.msra.mxu0 %v4765_v52  ;;  %1189 = vmatpush1.bf16.msra.mxu1 %v4767_v61  ;;  %v4791_v52 = vld [vmem:[#allocation8 + $0x28] ss:$16 sps:$4 sm:$0xff]   ;;  %v4795_v61 = vld [vmem:[#allocation8 + $0x4] ss:$16 sps:$4 sm:$0xff]  }
 0x15a   :  { %1149 = vmatprep.subr.bf16.mxu0 %v4771_v63  ;;  %1190 = vmatprep.subr.bf16.mxu1 %v4773_v5  ;;  %v4797_v63 = vld [vmem:[#allocation8 + $0xc] ss:$16 sps:$4 sm:$0xff]   ;;  %v4801_v5 = vld [vmem:[#allocation8] ss:$16 sps:$4 sm:$0xff]  }
 0x15d   :  { %1150 = vmatpush1.bf16.msra.mxu0 %v4777_v57  ;;  %1191 = vmatpush1.bf16.msra.mxu1 %v4779_v59  ;;  %v4803_v57 = vld [vmem:[#allocation8 + $0x8] ss:$16 sps:$4 sm:$0xff]  }
 0x15e   :  { %1151 = vmatprep.subr.bf16.mxu0 %v4783_v51  ;;  %1192 = vmatprep.subr.bf16.mxu1 %v4785_v55 }
 0x161   :  { %1152 = vmatpush1.bf16.msra.mxu0 %v4789_v1  ;;  %1193 = vmatpush1.bf16.msra.mxu1 %v4791_v52 }
 0x162   :  { %1153 = vmatprep.subr.bf16.mxu0 %v4795_v61  ;;  %1194 = vmatprep.subr.bf16.mxu1 %v4797_v63 }
 0x165   :  { %1154 = vmatpush1.bf16.msra.mxu0 %v4801_v5  ;;  %1195 = vmatpush1.bf16.msra.mxu1 %v4803_v57 }
 0x166   :  { %1256 = vmatprep.subr.bf16.mxu0 %v4378_v7  ;;  %1297 = vmatprep.subr.bf16.mxu1 %v4380_v8  ;;  %v6474_v7 = vld [vmem:[#allocation11_spill] sm:$0xff]  ;;  %v6475_v8 = vld [vmem:[#allocation12_spill] sm:$0xff] }
 0x168   :  { %1172 = vmatmul.mubr.bf16.vlgmr.msra.gmra.mxu0 %v6465_v15  ;;  %1213 = vmatmul.mubr.bf16.vlgmr.msra.gmra.mxu1 %v6465_v15 }
 0x169   :  { %1257 = vmatpush1.bf16.msra.mxu0 %v4382_v9  ;;  %1298 = vmatpush1.bf16.msra.mxu1 %v4385_v10  ;;  %v6476_v9 = vld [vmem:[#allocation13_spill] sm:$0xff]  ;;  %v6477_v10 = vld [vmem:[#allocation14_spill] sm:$0xff] }
 0x16a   :  { %1258 = vmatprep.subr.bf16.mxu0 %v4389_v11  ;;  %1299 = vmatprep.subr.bf16.mxu1 %v4393_v12  ;;  %v6478_v11 = vld [vmem:[#allocation15_spill] sm:$0xff]  ;;  %v6479_v12 = vld [vmem:[#allocation16_spill] sm:$0xff] }
 0x16b   :  { %1288 = vmatprep.mubr.bf16.mxu0 %v6465_v15  ;;  %1329 = vmatprep.mubr.bf16.mxu1 %v6465_v15 }
 0x16d   :  { %1259 = vmatpush1.bf16.msra.mxu0 %v4395_v13  ;;  %1300 = vmatpush1.bf16.msra.mxu1 %v4397_v14  ;;  %v6480_v13 = vld [vmem:[#allocation17_spill] sm:$0xff]  ;;  %v6481_v14 = vld [vmem:[#allocation18_spill] sm:$0xff] }
 0x16e   :  { %1260 = vmatprep.subr.bf16.mxu0 %v4406_v16  ;;  %1301 = vmatprep.subr.bf16.mxu1 %v4409_v17  ;;  %v6482_v16 = vld [vmem:[#allocation19_spill] sm:$0xff]  ;;  %v6483_v17 = vld [vmem:[#allocation20_spill] sm:$0xff] }
 0x171   :  { %1261 = vmatpush1.bf16.msra.mxu0 %v4412_v18  ;;  %1302 = vmatpush1.bf16.msra.mxu1 %v4414_v19  ;;  %v6484_v18 = vld [vmem:[#allocation21_spill] sm:$0xff]  ;;  %v6485_v19 = vld [vmem:[#allocation22_spill] sm:$0xff] }
 0x172   :  { %1262 = vmatprep.subr.bf16.mxu0 %v4418_v20  ;;  %1303 = vmatprep.subr.bf16.mxu1 %v4421_v21  ;;  %v6486_v20 = vld [vmem:[#allocation23_spill] sm:$0xff]  ;;  %v6487_v21 = vld [vmem:[#allocation24_spill] sm:$0xff] }
 0x175   :  { %1263 = vmatpush1.bf16.msra.mxu0 %v4425_v22  ;;  %1304 = vmatpush1.bf16.msra.mxu1 %v4428_v23  ;;  %v6488_v22 = vld [vmem:[#allocation25_spill] sm:$0xff]  ;;  %v6489_v23 = vld [vmem:[#allocation26_spill] sm:$0xff] }
 0x176   :  { %1264 = vmatprep.subr.bf16.mxu0 %v4433_v24  ;;  %1305 = vmatprep.subr.bf16.mxu1 %v4437_v25  ;;  %v6490_v24 = vld [vmem:[#allocation27_spill] sm:$0xff]  ;;  %v6491_v25 = vld [vmem:[#allocation28_spill] sm:$0xff] }
 0x179   :  { %1265 = vmatpush1.bf16.msra.mxu0 %v4443_v27  ;;  %1306 = vmatpush1.bf16.msra.mxu1 %v4447_v28  ;;  %v6492_v27 = vld [vmem:[#allocation29_spill] sm:$0xff]  ;;  %v6493_v28 = vld [vmem:[#allocation30_spill] sm:$0xff] }
 0x17a   :  { %1266 = vmatprep.subr.bf16.mxu0 %v4449_v29  ;;  %1307 = vmatprep.subr.bf16.mxu1 %v4452_v30  ;;  %v6494_v29 = vld [vmem:[#allocation31_spill] sm:$0xff]  ;;  %v6495_v30 = vld [vmem:[#allocation32_spill] sm:$0xff] }
 0x17d   :  { %1267 = vmatpush1.bf16.msra.mxu0 %v4457_v31  ;;  %1308 = vmatpush1.bf16.msra.mxu1 %v4459_v32  ;;  %v6496_v31 = vld [vmem:[#allocation33_spill] sm:$0xff]  ;;  %v6497_v32 = vld [vmem:[#allocation34_spill] sm:$0xff] }
 0x17e   :  { %1268 = vmatprep.subr.bf16.mxu0 %v4467_v34  ;;  %1309 = vmatprep.subr.bf16.mxu1 %v4471_v35  ;;  %v6498_v34 = vld [vmem:[#allocation35_spill] sm:$0xff]  ;;  %v6499_v35 = vld [vmem:[#allocation36_spill] sm:$0xff] }
 0x181   :  { %1269 = vmatpush1.bf16.msra.mxu0 %v4473_v36  ;;  %1310 = vmatpush1.bf16.msra.mxu1 %v4475_v37  ;;  %v6500_v36 = vld [vmem:[#allocation37_spill] sm:$0xff] }
 0x182   :  { %1270 = vmatprep.subr.bf16.mxu0 %v4477_v38  ;;  %1311 = vmatprep.subr.bf16.mxu1 %v4480_v39 }
 0x185   :  { %1271 = vmatpush1.bf16.msra.mxu0 %v4485_v40  ;;  %1312 = vmatpush1.bf16.msra.mxu1 %v4489_v41 }
 0x186   :  { %1367 = vmatprep.subr.bf16.mxu0 %v4503_v42  ;;  %1408 = vmatprep.subr.bf16.mxu1 %v4505_v43 }
 0x188   :  { %1289 = vmatmul.mubr.bf16.vlgmr.msra.gmra.mxu0 %v4717_v26  ;;  %1330 = vmatmul.mubr.bf16.vlgmr.msra.gmra.mxu1 %v4717_v26 }
 0x189   :  { %1368 = vmatpush1.bf16.msra.mxu0 %v4507_v44  ;;  %1409 = vmatpush1.bf16.msra.mxu1 %v4509_v45 }
 0x18a   :  { %1369 = vmatprep.subr.bf16.mxu0 %v4515_v46  ;;  %1410 = vmatprep.subr.bf16.mxu1 %v4517_v47 }
 0x18b   :  { %1399 = vmatprep.mubr.bf16.mxu0 %v6465_v15  ;;  %1440 = vmatprep.mubr.bf16.mxu1 %v6465_v15 }
 0x18d   :  { %1370 = vmatpush1.bf16.msra.mxu0 %v4519_v48  ;;  %1411 = vmatpush1.bf16.msra.mxu1 %v6474_v7 }
 0x18e   :  { %1371 = vmatprep.subr.bf16.mxu0 %v6475_v8  ;;  %1412 = vmatprep.subr.bf16.mxu1 %v6476_v9 }
 0x191   :  { %1372 = vmatpush1.bf16.msra.mxu0 %v6477_v10  ;;  %1413 = vmatpush1.bf16.msra.mxu1 %v6478_v11 }
 0x192   :  { %1373 = vmatprep.subr.bf16.mxu0 %v6479_v12  ;;  %1414 = vmatprep.subr.bf16.mxu1 %v6480_v13 }
 0x195   :  { %1374 = vmatpush1.bf16.msra.mxu0 %v6481_v14  ;;  %1415 = vmatpush1.bf16.msra.mxu1 %v6482_v16 }
 0x196   :  { %1375 = vmatprep.subr.bf16.mxu0 %v6483_v17  ;;  %1416 = vmatprep.subr.bf16.mxu1 %v6484_v18 }
 0x199   :  { %1376 = vmatpush1.bf16.msra.mxu0 %v6485_v19  ;;  %1417 = vmatpush1.bf16.msra.mxu1 %v6486_v20 }
 0x19a   :  { %1377 = vmatprep.subr.bf16.mxu0 %v6487_v21  ;;  %1418 = vmatprep.subr.bf16.mxu1 %v6488_v22 }
 0x19d   :  { %1378 = vmatpush1.bf16.msra.mxu0 %v6489_v23  ;;  %1419 = vmatpush1.bf16.msra.mxu1 %v6490_v24 }
 0x19e   :  { %1379 = vmatprep.subr.bf16.mxu0 %v6491_v25  ;;  %1420 = vmatprep.subr.bf16.mxu1 %v6492_v27 }
 0x1a1   :  { %1380 = vmatpush1.bf16.msra.mxu0 %v6493_v28  ;;  %1421 = vmatpush1.bf16.msra.mxu1 %v6494_v29 }
 0x1a2   :  { %1381 = vmatprep.subr.bf16.mxu0 %v6495_v30  ;;  %1422 = vmatprep.subr.bf16.mxu1 %v6496_v31  ;;  %v437_v31 = vld [vmem:[%s6091_s6] sm:$0xf] }
 0x1a3   :  { %v6501_v30 = vld [vmem:[#allocation38_spill] sm:$0xff] }
 0x1a5   :  { %1382 = vmatpush1.bf16.msra.mxu0 %v6497_v32  ;;  %1423 = vmatpush1.bf16.msra.mxu1 %v6498_v34  ;;  %v6502_v32 = vsub.s32 0, %v6501_v30 }
 0x1a6   :  { %1450 = vmatprep.subr.bf16.mxu0 %v6499_v35  ;;  %1491 = vmatprep.subr.bf16.mxu1 %v6500_v36  ;;  %v6504_v35 = vsub.s32 2, %v6501_v30  ;;  %v6506_v36 = vsub.s32 1, %v6501_v30 }
 0x1a7   :  { %v4888_v27 = vrot.slane %v437_v31, %v6502_v32 }
 0x1a8   :  { %v4892_v34 = vrot.slane %v437_v31, %v6504_v35  ;;  %v4896_v25 = vrot.slane %v437_v31, %v6506_v36 }
 0x1a9   :  { %6503 = vst [vmem:[#allocation11_spill] sm:$0xff] %v4888_v27 }
 0x1aa   :  { %6505 = vst [vmem:[#allocation12_spill] sm:$0xff] %v4892_v34 }
 0x208   :  { %v931_v37 = vpop.f32.mrf.mxu0  ;;  %v972_v38 = vpop.f32.mrf.mxu1 }
 0x20a   :  { %v933_v39 = vpop.f32.mrf.mxu0  ;;  %v974_v40 = vpop.f32.mrf.mxu1 }
 0x20b   :  { %v934_v32 = vadd.f32 %v933_v39, %v4896_v25 }
 0x20c   :  { %v935_v41 = vpop.f32.mrf.mxu0  ;;  %v976_v26 = vpop.f32.mrf.mxu1 }
 0x20d   :  { %v6507_v41 = vsub.s32 3, %v6501_v30  ;;  %v973_v26 = vadd.f32 %v972_v38, %v4892_v34 }
 0x20e   :  { %v936_v28 = vpop.f32.mrf.mxu0  ;;  %v977_v29 = vpop.f32.mrf.mxu1 }
 0x20f   :  { %v4900_v28 = vrot.slane %v437_v31, %v6507_v41  ;;  %v932_v29 = vadd.f32 %v931_v37, %v4888_v27 }
 0x211   :  { %6508 = vst [vmem:[#allocation13_spill] sm:$0xff] %v4900_v28  ;;  %v975_v22 = vadd.f32 %v974_v40, %v4900_v28 }
 0x228   :  { %v1173_v24 = vpop.f32.mrf.mxu0  ;;  %v1214_v23 = vpop.f32.mrf.mxu1 }
 0x229   :  { %v1221_v35 = vadd.f32 %v1173_v24, %v932_v29  ;;  %v1223_v21 = vadd.f32 %v1214_v23, %v973_v26  ;;  %v6509_v29 = vld [vmem:[#allocation39_spill] sm:$0xff] }
 0x22a   :  { %v1175_v20 = vpop.f32.mrf.mxu0  ;;  %v1216_v19 = vpop.f32.mrf.mxu1 }
 0x22b   :  { %v3574_v36 = vmul.f32 -1.442695, %v1221_v35  ;;  %v1222_v18 = vadd.f32 %v1175_v20, %v934_v32  ;;  %v1224_v17 = vadd.f32 %v1216_v19, %v975_v22  ;;  %v6510_v35 = vld [vmem:[#allocation41_spill] sm:$0xff] }
 0x22c   :  { %v1177_v30 = vpop.f32.mrf.mxu0  ;;  %v1218_v31 = vpop.f32.mrf.mxu1 }
 0x22d   :  { %3797 = vpow2.f32 %v3574_v36  ;;  %v3575_v41 = vmul.f32 -1.442695, %v1222_v18 }
 0x22e   :  { %v1178_v37 = vpop.f32.mrf.mxu0  ;;  %v1219_v27 = vpop.f32.mrf.mxu1 }
 0x22f   :  { %3799 = vpow2.f32 %v3575_v41 }
 0x230   :  { %3801 = vtanh.f32 %v1224_v17 }
 0x23a   :  { %v3798_v38 = vpop.eup %3797 }
 0x23b   :  { %v1234_v34 = vadd.f32 1.0, %v3798_v38  ;;  %v6511_v38 = vld [vmem:[#allocation40_spill] sm:$0xff] }
 0x23c   :  { %v3800_v16 = vpop.eup %3799 }
 0x23d   :  { %3803 = vrcp.f32 %v1234_v34  ;;  %v1235_v39 = vadd.f32 1.0, %v3800_v16  ;;  %v3802_v40 = vpop.eup %3801 }
 0x23f   :  { %3805 = vrcp.f32 %v1235_v39 }
 0x248   :  { %v1290_v23 = vpop.f32.mrf.mxu0  ;;  %v1331_v24 = vpop.f32.mrf.mxu1 }
 0x249   :  { %v1338_v20 = vadd.f32 %v1290_v23, %v6509_v29  ;;  %v1340_v39 = vadd.f32 %v1331_v24, %v6511_v38  ;;  %v6512_v29 = vld [vmem:[#allocation42_spill] sm:$0xff]  ;;  %v6514_v38 = vld [vmem:[#allocation68_spill] sm:$0xff] }
 0x24a   :  { %v3804_v19 = vpop.eup %3803  ;;  %v1292_v22 = vpop.f32.mrf.mxu0 }
 0x24b   :  { %v1333_v26 = vpop.f32.mrf.mxu1  ;;  %v1245_v32 = vmul.f32 %v3804_v19, %v3802_v40  ;;  %v3577_v18 = vmul.f32 -1.442695, %v1338_v20  ;;  %v1339_v27 = vadd.f32 %v1292_v22, %v6510_v35  ;;  %v3579_v23 = vmul.f32 -1.442695, %v1340_v39  ;;  %v6515_v39 = vld [vmem:[#allocation69_spill] sm:$0xff] }
 0x24c   :  { %v3806_v36 = vpop.eup %3805  ;;  %v1294_v30 = vpop.f32.mrf.mxu0  ;;  %v1341_v28 = vadd.f32 %v1333_v26, %v6512_v29  ;;  %v3576_v26 = vmul.f32 -1.442695, %v1223_v21  ;;  %v6517_v29 = vld [vmem:[#allocation71_spill] sm:$0xff] }
 0x24d   :  { %v1335_v31 = vpop.f32.mrf.mxu1  ;;  %v1244_v41 = vmul.f32 0.0, %v3806_v36  ;;  %3807 = vpow2.f32 %v3577_v18  ;;  %v3578_v17 = vmul.f32 -1.442695, %v1339_v27 }
 0x24e   :  { %v1295_v16 = vpop.f32.mrf.mxu0 }
 0x24f   :  { %v1336_v34 = vpop.f32.mrf.mxu1  ;;  %v4908_v37 = vadd.f32 %v1245_v32, %v1244_v41  ;;  %3809 = vpow2.f32 %v3578_v17 }
 0x250   :  { %3811 = vpow2.f32 %v3579_v23  ;;  %v6513_v34 = vld [vmem:[#allocation67_spill] sm:$0xff]  ;;  %v6516_v23 = vld [vmem:[#allocation70_spill] sm:$0xff] }
 0x251   :  { %3813 = vtanh.f32 %v1341_v28 }
 0x25a   :  { %v3808_v40 = vpop.eup %3807 }
 0x25b   :  { %v1351_v20 = vadd.f32 1.0, %v3808_v40  ;;  %v6518_v40 = vld [vmem:[#allocation72_spill] sm:$0xff] }
 0x25c   :  { %v3810_v19 = vpop.eup %3809 }
 0x25d   :  { %3815 = vrcp.f32 %v1351_v20  ;;  %v1352_v22 = vadd.f32 1.0, %v3810_v19  ;;  %v3812_v18 = vpop.eup %3811  ;;  %v6519_v20 = vld [vmem:[#allocation73_spill] sm:$0xff]  ;;  %v6520_v19 = vld [vmem:[#allocation74_spill] sm:$0xff] }
 0x25e   :  { %v3814_v35 = vpop.eup %3813  ;;  %v1353_v30 = vadd.f32 1.0, %v3812_v18 }
 0x25f   :  { %3817 = vrcp.f32 %v1352_v22 }
 0x260   :  { %3819 = vrcp.f32 %v1353_v30  ;;  %v4959_v30 = vld [vmem:[#allocation4 + $0xe0] ss:$16 sps:$4 sm:$0xff]  }
 0x26a   :  { %v3816_v27 = vpop.eup %3815 }
 0x26b   :  { %v1362_v36 = vmul.f32 %v3816_v27, %v3814_v35 }
 0x26c   :  { %v3818_v32 = vpop.eup %3817 }
 0x26d   :  { %v1361_v31 = vmul.f32 %v3818_v32, %v4710_v3  ;;  %v3820_v41 = vpop.eup %3819  ;;  %v4956_v32 = vld [vmem:[#allocation4 + $0xec] ss:$16 sps:$4 sm:$0xff]  }
 0x26f   :  { %v4913_v24 = vadd.f32 %v1362_v36, %v1361_v31  ;;  %v4953_v36 = vld [vmem:[#allocation4 + $0xe4] ss:$16 sps:$4 sm:$0xff]   ;;  %v4962_v31 = vld [vmem:[#allocation4 + $0xe8] ss:$16 sps:$4 sm:$0xff]  }
 0x271   :  { %3821 = vtanh.f32 %v4913_v24 }
 0x272   :  { %3823 = vpow2.f32 %v3576_v26  ;;  %v4965_v26 = vld [vmem:[#allocation4 + $0xc4] ss:$16 sps:$4 sm:$0xff]  }
 0x273   :  { %3825 = vtanh.f32 %v4908_v37 }
 0x27e   :  { %v3822_v28 = vpop.eup %3821 }
 0x27f   :  { %v1365_v17 = vmul.f32 %v3822_v28, %v3820_v41  ;;  %v3824_v3 = vpop.eup %3823  ;;  %v4968_v41 = vld [vmem:[#allocation4 + $0xcc] ss:$16 sps:$4 sm:$0xff]   ;;  %v4973_v28 = vld [vmem:[#allocation4 + $0xc0] ss:$16 sps:$4 sm:$0xff]  }
 0x280   :  { %v1236_v21 = vadd.f32 1.0, %v3824_v3  ;;  %v3826_v22 = vpop.eup %3825  ;;  %6521 = vst [vmem:[#allocation14_spill] sm:$0xff] %v4973_v28  ;;  %v4979_v3 = vld [vmem:[#allocation4 + $0xa4] ss:$16 sps:$4 sm:$0xff]  }
 0x281   :  { %v4916_v16 = vpack.c.bf16 %v1365_v17, %v1365_v17  ;;  %v4976_v17 = vld [vmem:[#allocation4 + $0xc8] ss:$16 sps:$4 sm:$0xff]   ;;  %6523 = vst [vmem:[#allocation16_spill] sm:$0xff] %v4979_v3 }
 0x282   :  { %3827 = vrcp.f32 %v1236_v21  ;;  %6522 = vst [vmem:[#allocation15_spill] sm:$0xff] %v4976_v17  ;;  %v4982_v21 = vld [vmem:[#allocation4 + $0xac] ss:$16 sps:$4 sm:$0xff]  }
 0x283   :  { %1400 = vmatmul.mubr.bf16.vlgmr.msra.gmra.mxu0 %v4916_v16  ;;  %1441 = vmatmul.mubr.bf16.vlgmr.msra.gmra.mxu1 %v4916_v16  ;;  %6524 = vst [vmem:[#allocation17_spill] sm:$0xff] %v4982_v21 }
 0x284   :  { %1451 = vmatpush1.bf16.msra.mxu0 %v4713_v53  ;;  %1492 = vmatpush1.bf16.msra.mxu1 %v4715_v62 }
 0x285   :  { %1452 = vmatprep.subr.bf16.mxu0 %v4719_v33  ;;  %1493 = vmatprep.subr.bf16.mxu1 %v4721_v0 }
 0x286   :  { %1482 = vmatprep.mubr.bf16.mxu0 %v6465_v15  ;;  %1523 = vmatprep.mubr.bf16.mxu1 %v6465_v15 }
 0x288   :  { %1453 = vmatpush1.bf16.msra.mxu0 %v4727_v58  ;;  %1494 = vmatpush1.bf16.msra.mxu1 %v4729_v54 }
 0x289   :  { %1454 = vmatprep.subr.bf16.mxu0 %v4733_v2  ;;  %1495 = vmatprep.subr.bf16.mxu1 %v4735_v60 }
 0x28c   :  { %1455 = vmatpush1.bf16.msra.mxu0 %v4741_v4  ;;  %1496 = vmatpush1.bf16.msra.mxu1 %v4743_v56 }
 0x28d   :  { %1456 = vmatprep.subr.bf16.mxu0 %v4747_v49  ;;  %1497 = vmatprep.subr.bf16.mxu1 %v4749_v50 }
 0x28f   :  { %v3828_v18 = vpop.eup %3827 }
 0x290   :  { %1457 = vmatpush1.bf16.msra.mxu0 %v4753_v6  ;;  %1498 = vmatpush1.bf16.msra.mxu1 %v6513_v34  ;;  %v1248_v35 = vmul.f32 %v3828_v18, %v3826_v22  ;;  %v4985_v22 = vld [vmem:[#allocation4 + $0xa0] ss:$16 sps:$4 sm:$0xff]   ;;  %v4988_v18 = vld [vmem:[#allocation4 + $0xa8] ss:$16 sps:$4 sm:$0xff]  }
 0x291   :  { %1458 = vmatprep.subr.bf16.mxu0 %v6514_v38  ;;  %1499 = vmatprep.subr.bf16.mxu1 %v6515_v39  ;;  %6525 = vst [vmem:[#allocation18_spill] sm:$0xff] %v4985_v22  ;;  %6526 = vst [vmem:[#allocation38_spill] sm:$0xff] %v4988_v18 }
 0x292   :  { %v1449_v27 = vpack.c.bf16 %v1248_v35, %v1248_v35  ;;  %v4991_v35 = vld [vmem:[#allocation4 + $0x84] ss:$16 sps:$4 sm:$0xff]  }
 0x293   :  { %6527 = vst [vmem:[#allocation39_spill] sm:$0xff] %v4991_v35 }
 0x294   :  { %1459 = vmatpush1.bf16.msra.mxu0 %v6516_v23  ;;  %1500 = vmatpush1.bf16.msra.mxu1 %v6517_v29 }
 0x295   :  { %1460 = vmatprep.subr.bf16.mxu0 %v6518_v40  ;;  %1501 = vmatprep.subr.bf16.mxu1 %v6519_v20 }
 0x298   :  { %1461 = vmatpush1.bf16.msra.mxu0 %v6520_v19  ;;  %1502 = vmatpush1.bf16.msra.mxu1 %v4779_v59 }
 0x299   :  { %1462 = vmatprep.subr.bf16.mxu0 %v4783_v51  ;;  %1503 = vmatprep.subr.bf16.mxu1 %v4785_v55 }
 0x29c   :  { %1463 = vmatpush1.bf16.msra.mxu0 %v4789_v1  ;;  %1504 = vmatpush1.bf16.msra.mxu1 %v4791_v52 }
 0x29d   :  { %1464 = vmatprep.subr.bf16.mxu0 %v4795_v61  ;;  %1505 = vmatprep.subr.bf16.mxu1 %v4797_v63 }
 0x2a0   :  { %1465 = vmatpush1.bf16.msra.mxu0 %v4801_v5  ;;  %1506 = vmatpush1.bf16.msra.mxu1 %v4803_v57 }
 0x2a1   :  { %1567 = vmatprep.subr.bf16.mxu0 %v4953_v36  ;;  %1608 = vmatprep.subr.bf16.mxu1 %v4956_v32 }
 0x2a3   :  { %1483 = vmatmul.mubr.bf16.vlgmr.msra.gmra.mxu0 %v1449_v27  ;;  %1524 = vmatmul.mubr.bf16.vlgmr.msra.gmra.mxu1 %v1449_v27  ;;  %v4994_v27 = vld [vmem:[#allocation4 + $0x8c] ss:$16 sps:$4 sm:$0xff]  }
 0x2a4   :  { %1568 = vmatpush1.bf16.msra.mxu0 %v4959_v30  ;;  %1609 = vmatpush1.bf16.msra.mxu1 %v4962_v31  ;;  %6528 = vst [vmem:[#allocation41_spill] sm:$0xff] %v4994_v27 }
 0x2a5   :  { %1569 = vmatprep.subr.bf16.mxu0 %v4965_v26  ;;  %1610 = vmatprep.subr.bf16.mxu1 %v4968_v41 }
 0x2a6   :  { %1599 = vmatprep.mubr.bf16.mxu0 %v6465_v15  ;;  %1640 = vmatprep.mubr.bf16.mxu1 %v6465_v15 }
 0x2a8   :  { %1570 = vmatpush1.bf16.msra.mxu0 %v4973_v28  ;;  %1611 = vmatpush1.bf16.msra.mxu1 %v4976_v17 }
 0x2a9   :  { %1571 = vmatprep.subr.bf16.mxu0 %v4979_v3  ;;  %1612 = vmatprep.subr.bf16.mxu1 %v4982_v21  ;;  %v4997_v3 = vld [vmem:[#allocation4 + $0x80] ss:$16 sps:$4 sm:$0xff]   ;;  %v5000_v21 = vld [vmem:[#allocation4 + $0x88] ss:$16 sps:$4 sm:$0xff]  }
 0x2aa   :  { %6529 = vst [vmem:[#allocation40_spill] sm:$0xff] %v4997_v3  ;;  %6530 = vst [vmem:[#allocation42_spill] sm:$0xff] %v5000_v21 }
 0x2ac   :  { %1572 = vmatpush1.bf16.msra.mxu0 %v4985_v22  ;;  %1613 = vmatpush1.bf16.msra.mxu1 %v4988_v18  ;;  %v5003_v22 = vld [vmem:[#allocation4 + $0x64] ss:$16 sps:$4 sm:$0xff]   ;;  %v5006_v18 = vld [vmem:[#allocation4 + $0x6c] ss:$16 sps:$4 sm:$0xff]  }
 0x2ad   :  { %1573 = vmatprep.subr.bf16.mxu0 %v4991_v35  ;;  %1614 = vmatprep.subr.bf16.mxu1 %v4994_v27  ;;  %6531 = vst [vmem:[#allocation67_spill] sm:$0xff] %v5003_v22  ;;  %6532 = vst [vmem:[#allocation68_spill] sm:$0xff] %v5006_v18  ;;  %v5009_v35 = vld [vmem:[#allocation4 + $0x60] ss:$16 sps:$4 sm:$0xff]   ;;  %v5012_v27 = vld [vmem:[#allocation4 + $0x68] ss:$16 sps:$4 sm:$0xff]  }
 0x2ae   :  { %6533 = vst [vmem:[#allocation69_spill] sm:$0xff] %v5009_v35  ;;  %6534 = vst [vmem:[#allocation70_spill] sm:$0xff] %v5012_v27 }
 0x2b0   :  { %1574 = vmatpush1.bf16.msra.mxu0 %v4997_v3  ;;  %1615 = vmatpush1.bf16.msra.mxu1 %v5000_v21  ;;  %v5015_v3 = vld [vmem:[#allocation4 + $0x44] ss:$16 sps:$4 sm:$0xff]   ;;  %v5018_v21 = vld [vmem:[#allocation4 + $0x4c] ss:$16 sps:$4 sm:$0xff]  }
 0x2b1   :  { %1575 = vmatprep.subr.bf16.mxu0 %v5003_v22  ;;  %1616 = vmatprep.subr.bf16.mxu1 %v5006_v18  ;;  %6535 = vst [vmem:[#allocation71_spill] sm:$0xff] %v5015_v3  ;;  %6536 = vst [vmem:[#allocation72_spill] sm:$0xff] %v5018_v21  ;;  %v5021_v22 = vld [vmem:[#allocation4 + $0x40] ss:$16 sps:$4 sm:$0xff]   ;;  %v5024_v18 = vld [vmem:[#allocation4 + $0x48] ss:$16 sps:$4 sm:$0xff]  }
 0x2b2   :  { %6537 = vst [vmem:[#allocation73_spill] sm:$0xff] %v5021_v22  ;;  %6538 = vst [vmem:[#allocation74_spill] sm:$0xff] %v5024_v18 }
 0x2b4   :  { %1576 = vmatpush1.bf16.msra.mxu0 %v5009_v35  ;;  %1617 = vmatpush1.bf16.msra.mxu1 %v5012_v27  ;;  %v5027_v35 = vld [vmem:[#allocation4 + $0x24] ss:$16 sps:$4 sm:$0xff]   ;;  %v5030_v27 = vld [vmem:[#allocation4 + $0x2c] ss:$16 sps:$4 sm:$0xff]  }
 0x2b5   :  { %1577 = vmatprep.subr.bf16.mxu0 %v5015_v3  ;;  %1618 = vmatprep.subr.bf16.mxu1 %v5018_v21  ;;  %6539 = vst [vmem:[#allocation75_spill] sm:$0xff] %v5027_v35  ;;  %6540 = vst [vmem:[#allocation76_spill] sm:$0xff] %v5030_v27  ;;  %v5033_v3 = vld [vmem:[#allocation4 + $0x20] ss:$16 sps:$4 sm:$0xff]   ;;  %v5036_v21 = vld [vmem:[#allocation4 + $0x28] ss:$16 sps:$4 sm:$0xff]  }
 0x2b6   :  { %6541 = vst [vmem:[#allocation77_spill] sm:$0xff] %v5033_v3  ;;  %6542 = vst [vmem:[#allocation78_spill] sm:$0xff] %v5036_v21 }
 0x2b8   :  { %1578 = vmatpush1.bf16.msra.mxu0 %v5021_v22  ;;  %1619 = vmatpush1.bf16.msra.mxu1 %v5024_v18  ;;  %v5039_v22 = vld [vmem:[#allocation4 + $0x4] ss:$16 sps:$4 sm:$0xff]   ;;  %v5042_v18 = vld [vmem:[#allocation4 + $0xc] ss:$16 sps:$4 sm:$0xff]  }
 0x2b9   :  { %1579 = vmatprep.subr.bf16.mxu0 %v5027_v35  ;;  %1620 = vmatprep.subr.bf16.mxu1 %v5030_v27  ;;  %6543 = vst [vmem:[#allocation79_spill] sm:$0xff] %v5039_v22  ;;  %6544 = vst [vmem:[#allocation80_spill] sm:$0xff] %v5042_v18  ;;  %v5045_v35 = vld [vmem:[#allocation4] ss:$16 sps:$4 sm:$0xff]   ;;  %v5048_v27 = vld [vmem:[#allocation4 + $0x8] ss:$16 sps:$4 sm:$0xff]  }
 0x2ba   :  { %6545 = vst [vmem:[#allocation81_spill] sm:$0xff] %v5045_v35  ;;  %6546 = vst [vmem:[#allocation82_spill] sm:$0xff] %v5048_v27 }
 0x2bc   :  { %1580 = vmatpush1.bf16.msra.mxu0 %v5033_v3  ;;  %1621 = vmatpush1.bf16.msra.mxu1 %v5036_v21 }
 0x2bd   :  { %1581 = vmatprep.subr.bf16.mxu0 %v5039_v22  ;;  %1622 = vmatprep.subr.bf16.mxu1 %v5042_v18 }
 0x2c0   :  { %1582 = vmatpush1.bf16.msra.mxu0 %v5045_v35  ;;  %1623 = vmatpush1.bf16.msra.mxu1 %v5048_v27  ;;  %v6568_v35 = vld [vmem:[#allocation13_spill] sm:$0xff] }
 0x2c1   :  { %1678 = vmatprep.subr.bf16.mxu0 %v4503_v42  ;;  %1719 = vmatprep.subr.bf16.mxu1 %v4505_v43  ;;  %v6547_v42 = vld [vmem:[#allocation19_spill] sm:$0xff]  ;;  %v6548_v43 = vld [vmem:[#allocation20_spill] sm:$0xff] }
 0x2c3   :  { %1600 = vmatmul.mubr.bf16.vlgmr.msra.gmra.mxu0 %v4916_v16  ;;  %1641 = vmatmul.mubr.bf16.vlgmr.msra.gmra.mxu1 %v4916_v16  ;;  %v6562_v16 = vld [vmem:[#allocation34_spill] sm:$0xff] }
 0x2c4   :  { %1679 = vmatpush1.bf16.msra.mxu0 %v4507_v44  ;;  %1720 = vmatpush1.bf16.msra.mxu1 %v4509_v45  ;;  %v6549_v44 = vld [vmem:[#allocation21_spill] sm:$0xff]  ;;  %v6550_v45 = vld [vmem:[#allocation22_spill] sm:$0xff] }
 0x2c5   :  { %1680 = vmatprep.subr.bf16.mxu0 %v4515_v46  ;;  %1721 = vmatprep.subr.bf16.mxu1 %v4517_v47  ;;  %v6551_v46 = vld [vmem:[#allocation23_spill] sm:$0xff]  ;;  %v6552_v47 = vld [vmem:[#allocation24_spill] sm:$0xff] }
 0x2c6   :  { %1710 = vmatprep.mubr.bf16.mxu0 %v6465_v15  ;;  %1751 = vmatprep.mubr.bf16.mxu1 %v6465_v15 }
 0x2c8   :  { %1681 = vmatpush1.bf16.msra.mxu0 %v4519_v48  ;;  %1722 = vmatpush1.bf16.msra.mxu1 %v6474_v7  ;;  %v6553_v48 = vld [vmem:[#allocation25_spill] sm:$0xff]  ;;  %v6554_v7 = vld [vmem:[#allocation26_spill] sm:$0xff] }
 0x2c9   :  { %1682 = vmatprep.subr.bf16.mxu0 %v6475_v8  ;;  %1723 = vmatprep.subr.bf16.mxu1 %v6476_v9  ;;  %v6555_v8 = vld [vmem:[#allocation27_spill] sm:$0xff]  ;;  %v6556_v9 = vld [vmem:[#allocation28_spill] sm:$0xff] }
 0x2cc   :  { %1683 = vmatpush1.bf16.msra.mxu0 %v6477_v10  ;;  %1724 = vmatpush1.bf16.msra.mxu1 %v6478_v11  ;;  %v6557_v10 = vld [vmem:[#allocation29_spill] sm:$0xff]  ;;  %v6558_v11 = vld [vmem:[#allocation30_spill] sm:$0xff] }
 0x2cd   :  { %1684 = vmatprep.subr.bf16.mxu0 %v6479_v12  ;;  %1725 = vmatprep.subr.bf16.mxu1 %v6480_v13  ;;  %v6559_v12 = vld [vmem:[#allocation31_spill] sm:$0xff]  ;;  %v6560_v13 = vld [vmem:[#allocation32_spill] sm:$0xff] }
 0x2d0   :  { %1685 = vmatpush1.bf16.msra.mxu0 %v6481_v14  ;;  %1726 = vmatpush1.bf16.msra.mxu1 %v6547_v42  ;;  %v6561_v14 = vld [vmem:[#allocation33_spill] sm:$0xff]  ;;  %v6563_v42 = vld [vmem:[#allocation35_spill] sm:$0xff] }
 0x2d1   :  { %1686 = vmatprep.subr.bf16.mxu0 %v6548_v43  ;;  %1727 = vmatprep.subr.bf16.mxu1 %v6549_v44  ;;  %v6564_v43 = vld [vmem:[#allocation36_spill] sm:$0xff]  ;;  %v6565_v44 = vld [vmem:[#allocation37_spill] sm:$0xff] }
 0x2d4   :  { %1687 = vmatpush1.bf16.msra.mxu0 %v6550_v45  ;;  %1728 = vmatpush1.bf16.msra.mxu1 %v6551_v46 }
 0x2d5   :  { %1688 = vmatprep.subr.bf16.mxu0 %v6552_v47  ;;  %1729 = vmatprep.subr.bf16.mxu1 %v6553_v48 }
 0x2d8   :  { %1689 = vmatpush1.bf16.msra.mxu0 %v6554_v7  ;;  %1730 = vmatpush1.bf16.msra.mxu1 %v6555_v8 }
 0x2d9   :  { %1690 = vmatprep.subr.bf16.mxu0 %v6556_v9  ;;  %1731 = vmatprep.subr.bf16.mxu1 %v6557_v10 }
 0x2dc   :  { %1691 = vmatpush1.bf16.msra.mxu0 %v6558_v11  ;;  %1732 = vmatpush1.bf16.msra.mxu1 %v6559_v12  ;;  %v6566_v11 = vld [vmem:[#allocation11_spill] sm:$0xff] }
 0x2dd   :  { %1692 = vmatprep.subr.bf16.mxu0 %v6560_v13  ;;  %1733 = vmatprep.subr.bf16.mxu1 %v6561_v14  ;;  %v6567_v13 = vld [vmem:[#allocation12_spill] sm:$0xff] }
 0x2e0   :  { %1693 = vmatpush1.bf16.msra.mxu0 %v6562_v16  ;;  %1734 = vmatpush1.bf16.msra.mxu1 %v6563_v42 }
 0x2e1   :  { %1761 = vmatprep.subr.bf16.mxu0 %v6564_v43  ;;  %1802 = vmatprep.subr.bf16.mxu1 %v6565_v44 }
 0x343   :  { %v1401_v45 = vpop.f32.mrf.mxu0  ;;  %v1442_v46 = vpop.f32.mrf.mxu1 }
 0x344   :  { %v1402_v12 = vadd.f32 %v1401_v45, %v6566_v11  ;;  %v1443_v14 = vadd.f32 %v1442_v46, %v6567_v13 }
 0x345   :  { %v1403_v47 = vpop.f32.mrf.mxu0  ;;  %v1444_v48 = vpop.f32.mrf.mxu1 }
 0x346   :  { %v1404_v42 = vadd.f32 %v1403_v47, %v4896_v25  ;;  %v1445_v43 = vadd.f32 %v1444_v48, %v6568_v35 }
 0x347   :  { %v1405_v7 = vpop.f32.mrf.mxu0  ;;  %v1446_v8 = vpop.f32.mrf.mxu1 }
 0x349   :  { %v1406_v9 = vpop.f32.mrf.mxu0  ;;  %v1447_v10 = vpop.f32.mrf.mxu1 }
 0x363   :  { %v1484_v27 = vpop.f32.mrf.mxu0  ;;  %v1525_v16 = vpop.f32.mrf.mxu1 }
 0x364   :  { %v1532_v18 = vadd.f32 %v1484_v27, %v1402_v12  ;;  %v1534_v44 = vadd.f32 %v1525_v16, %v1443_v14 }
 0x365   :  { %v1486_v22 = vpop.f32.mrf.mxu0  ;;  %v1527_v21 = vpop.f32.mrf.mxu1 }
 0x366   :  { %v3580_v3 = vmul.f32 -1.442695, %v1532_v18  ;;  %v1533_v17 = vadd.f32 %v1486_v22, %v1404_v42  ;;  %v1535_v7 = vadd.f32 %v1527_v21, %v1445_v43  ;;  %v6569_v18 = vld [vmem:[#allocation43_spill] sm:$0xff]  ;;  %v6570_v42 = vld [vmem:[#allocation45_spill] sm:$0xff] }
 0x367   :  { %v1488_v8 = vpop.f32.mrf.mxu0  ;;  %v1529_v9 = vpop.f32.mrf.mxu1 }
 0x368   :  { %3829 = vpow2.f32 %v3580_v3  ;;  %v3581_v10 = vmul.f32 -1.442695, %v1533_v17 }
 0x369   :  { %v1489_v45 = vpop.f32.mrf.mxu0  ;;  %v1530_v11 = vpop.f32.mrf.mxu1 }
 0x36a   :  { %3831 = vpow2.f32 %v3581_v10 }
 0x36b   :  { %3833 = vtanh.f32 %v1535_v7 }
 0x375   :  { %v3830_v46 = vpop.eup %3829 }
 0x376   :  { %v1545_v13 = vadd.f32 1.0, %v3830_v46  ;;  %v6571_v46 = vld [vmem:[#allocation44_spill] sm:$0xff] }
 0x377   :  { %v3832_v28 = vpop.eup %3831 }
 0x378   :  { %3835 = vrcp.f32 %v1545_v13  ;;  %v1546_v47 = vadd.f32 1.0, %v3832_v28  ;;  %v3834_v12 = vpop.eup %3833 }
 0x37a   :  { %3837 = vrcp.f32 %v1546_v47 }
 0x383   :  { %v1601_v27 = vpop.f32.mrf.mxu0  ;;  %v1642_v48 = vpop.f32.mrf.mxu1 }
 0x384   :  { %v1649_v22 = vadd.f32 %v1601_v27, %v6569_v18  ;;  %v1651_v47 = vadd.f32 %v1642_v48, %v6571_v46  ;;  %v6572_v18 = vld [vmem:[#allocation46_spill] sm:$0xff]  ;;  %v5175_v46 = vld [vmem:[#allocation6 + $0xe4] ss:$16 sps:$4 sm:$0xff]  }
 0x385   :  { %v3836_v21 = vpop.eup %3835  ;;  %v1603_v14 = vpop.f32.mrf.mxu0 }
 0x386   :  { %v1644_v16 = vpop.f32.mrf.mxu1  ;;  %v1556_v3 = vmul.f32 %v3836_v21, %v3834_v12  ;;  %v3583_v17 = vmul.f32 -1.442695, %v1649_v22  ;;  %v1650_v11 = vadd.f32 %v1603_v14, %v6570_v42  ;;  %v3585_v27 = vmul.f32 -1.442695, %v1651_v47  ;;  %v5178_v47 = vld [vmem:[#allocation6 + $0xec] ss:$16 sps:$4 sm:$0xff]  }
 0x387   :  { %v3838_v43 = vpop.eup %3837  ;;  %v1605_v8 = vpop.f32.mrf.mxu0  ;;  %v1652_v12 = vadd.f32 %v1644_v16, %v6572_v18  ;;  %v3582_v16 = vmul.f32 -1.442695, %v1534_v44  ;;  %v6598_v44 = vld [vmem:[#allocation82_spill] sm:$0xff] }
 0x388   :  { %v1646_v9 = vpop.f32.mrf.mxu1  ;;  %v1555_v7 = vmul.f32 %v3838_v43, %v4908_v37  ;;  %3839 = vpow2.f32 %v3583_v17  ;;  %v3584_v28 = vmul.f32 -1.442695, %v1650_v11  ;;  %v5186_v18 = vld [vmem:[#allocation6 + $0xe8] ss:$16 sps:$4 sm:$0xff]  }
 0x389   :  { %v1606_v13 = vpop.f32.mrf.mxu0 }
 0x38a   :  { %v1647_v10 = vpop.f32.mrf.mxu1  ;;  %v5096_v45 = vadd.f32 %v1556_v3, %v1555_v7  ;;  %3841 = vpow2.f32 %v3584_v28 }
 0x38b   :  { %3843 = vpow2.f32 %v3585_v27  ;;  %v5183_v27 = vld [vmem:[#allocation6 + $0xe0] ss:$16 sps:$4 sm:$0xff]  }
 0x38c   :  { %3845 = vtanh.f32 %v1652_v12  ;;  %v5189_v12 = vld [vmem:[#allocation6 + $0xc4] ss:$16 sps:$4 sm:$0xff]  }
 0x38d   :  { %6599 = vst [vmem:[#allocation19_spill] sm:$0xff] %v5189_v12 }
 0x395   :  { %v3840_v22 = vpop.eup %3839 }
 0x396   :  { %v1662_v21 = vadd.f32 1.0, %v3840_v22  ;;  %v5192_v22 = vld [vmem:[#allocation6 + $0xcc] ss:$16 sps:$4 sm:$0xff]  }
 0x397   :  { %v3842_v14 = vpop.eup %3841  ;;  %6600 = vst [vmem:[#allocation20_spill] sm:$0xff] %v5192_v22 }
 0x398   :  { %3847 = vrcp.f32 %v1662_v21  ;;  %v1663_v42 = vadd.f32 1.0, %v3842_v14  ;;  %v3844_v37 = vpop.eup %3843  ;;  %v5197_v21 = vld [vmem:[#allocation6 + $0xc0] ss:$16 sps:$4 sm:$0xff]   ;;  %v5200_v14 = vld [vmem:[#allocation6 + $0xc8] ss:$16 sps:$4 sm:$0xff]  }
 0x399   :  { %v3846_v17 = vpop.eup %3845  ;;  %v1664_v8 = vadd.f32 1.0, %v3844_v37  ;;  %6601 = vst [vmem:[#allocation21_spill] sm:$0xff] %v5197_v21  ;;  %6602 = vst [vmem:[#allocation22_spill] sm:$0xff] %v5200_v14  ;;  %v5206_v37 = vld [vmem:[#allocation6 + $0xac] ss:$16 sps:$4 sm:$0xff]  }
 0x39a   :  { %3849 = vrcp.f32 %v1663_v42  ;;  %v5203_v42 = vld [vmem:[#allocation6 + $0xa4] ss:$16 sps:$4 sm:$0xff]   ;;  %6604 = vst [vmem:[#allocation24_spill] sm:$0xff] %v5206_v37 }
 0x39b   :  { %3851 = vrcp.f32 %v1664_v8  ;;  %6603 = vst [vmem:[#allocation23_spill] sm:$0xff] %v5203_v42  ;;  %v5221_v8 = vld [vmem:[#allocation6 + $0x80] ss:$16 sps:$4 sm:$0xff]  }
 0x39c   :  { %6609 = vst [vmem:[#allocation29_spill] sm:$0xff] %v5221_v8 }
 0x3a5   :  { %v3848_v11 = vpop.eup %3847 }
 0x3a6   :  { %v1673_v43 = vmul.f32 %v3848_v11, %v3846_v17  ;;  %v5209_v17 = vld [vmem:[#allocation6 + $0xa0] ss:$16 sps:$4 sm:$0xff]   ;;  %v5212_v11 = vld [vmem:[#allocation6 + $0xa8] ss:$16 sps:$4 sm:$0xff]  }
 0x3a7   :  { %v3850_v3 = vpop.eup %3849  ;;  %6605 = vst [vmem:[#allocation25_spill] sm:$0xff] %v5209_v17  ;;  %6606 = vst [vmem:[#allocation26_spill] sm:$0xff] %v5212_v11 }
 0x3a8   :  { %v1672_v9 = vmul.f32 %v3850_v3, %v4913_v24  ;;  %v3852_v7 = vpop.eup %3851  ;;  %v5218_v3 = vld [vmem:[#allocation6 + $0x8c] ss:$16 sps:$4 sm:$0xff]  }
 0x3a9   :  { %6608 = vst [vmem:[#allocation28_spill] sm:$0xff] %v5218_v3 }
 0x3aa   :  { %v5101_v48 = vadd.f32 %v1673_v43, %v1672_v9  ;;  %v5215_v43 = vld [vmem:[#allocation6 + $0x84] ss:$16 sps:$4 sm:$0xff]   ;;  %v5224_v9 = vld [vmem:[#allocation6 + $0x88] ss:$16 sps:$4 sm:$0xff]  }
 0x3ab   :  { %6607 = vst [vmem:[#allocation27_spill] sm:$0xff] %v5215_v43  ;;  %6610 = vst [vmem:[#allocation30_spill] sm:$0xff] %v5224_v9 }
 0x3ac   :  { %3853 = vtanh.f32 %v5101_v48 }
 0x3ad   :  { %3855 = vpow2.f32 %v3582_v16  ;;  %v5227_v16 = vld [vmem:[#allocation6 + $0x64] ss:$16 sps:$4 sm:$0xff]  }
 0x3ae   :  { %3857 = vtanh.f32 %v5096_v45  ;;  %6611 = vst [vmem:[#allocation31_spill] sm:$0xff] %v5227_v16 }
 0x3b9   :  { %v3854_v28 = vpop.eup %3853 }
 0x3ba   :  { %v1676_v13 = vmul.f32 %v3854_v28, %v3852_v7  ;;  %v3856_v24 = vpop.eup %3855  ;;  %v5230_v7 = vld [vmem:[#allocation6 + $0x6c] ss:$16 sps:$4 sm:$0xff]   ;;  %v5233_v28 = vld [vmem:[#allocation6 + $0x60] ss:$16 sps:$4 sm:$0xff]  }
 0x3bb   :  { %6612 = vst [vmem:[#allocation32_spill] sm:$0xff] %v5230_v7  ;;  %6613 = vst [vmem:[#allocation33_spill] sm:$0xff] %v5233_v28 }
 0x3bc   :  { %v5104_v10 = vpack.c.bf16 %v1676_v13, %v1676_v13  ;;  %v5236_v13 = vld [vmem:[#allocation6 + $0x68] ss:$16 sps:$4 sm:$0xff]  }
 0x3bd   :  { %6614 = vst [vmem:[#allocation34_spill] sm:$0xff] %v5236_v13 }
 0x3be   :  { %1711 = vmatmul.mubr.bf16.vlgmr.msra.gmra.mxu0 %v5104_v10  ;;  %1752 = vmatmul.mubr.bf16.vlgmr.msra.gmra.mxu1 %v5104_v10 }
 0x3bf   :  { %1762 = vmatpush1.bf16.msra.mxu0 %v4713_v53  ;;  %1803 = vmatpush1.bf16.msra.mxu1 %v4715_v62  ;;  %v1547_v53 = vadd.f32 1.0, %v3856_v24  ;;  %v3858_v62 = vpop.eup %3857  ;;  %v5242_v24 = vld [vmem:[#allocation6 + $0x4c] ss:$16 sps:$4 sm:$0xff]  }
 0x3c0   :  { %1763 = vmatprep.subr.bf16.mxu0 %v4719_v33  ;;  %1804 = vmatprep.subr.bf16.mxu1 %v4721_v0  ;;  %6616 = vst [vmem:[#allocation36_spill] sm:$0xff] %v5242_v24 }
 0x3c1   :  { %1793 = vmatprep.mubr.bf16.mxu0 %v6465_v15  ;;  %1834 = vmatprep.mubr.bf16.mxu1 %v6465_v15  ;;  %3859 = vrcp.f32 %v1547_v53  ;;  %v5245_v53 = vld [vmem:[#allocation6 + $0x40] ss:$16 sps:$4 sm:$0xff]  }
 0x3c2   :  { %6617 = vst [vmem:[#allocation37_spill] sm:$0xff] %v5245_v53 }
 0x3c3   :  { %1764 = vmatpush1.bf16.msra.mxu0 %v4727_v58  ;;  %1805 = vmatpush1.bf16.msra.mxu1 %v4729_v54  ;;  %v6574_v58 = vld [vmem:[#allocation15_spill] sm:$0xff]  ;;  %v6575_v54 = vld [vmem:[#allocation16_spill] sm:$0xff] }
 0x3c4   :  { %1765 = vmatprep.subr.bf16.mxu0 %v4733_v2  ;;  %1806 = vmatprep.subr.bf16.mxu1 %v4735_v60  ;;  %v6576_v2 = vld [vmem:[#allocation17_spill] sm:$0xff]  ;;  %v6577_v60 = vld [vmem:[#allocation18_spill] sm:$0xff] }
 0x3c7   :  { %1766 = vmatpush1.bf16.msra.mxu0 %v4741_v4  ;;  %1807 = vmatpush1.bf16.msra.mxu1 %v4743_v56  ;;  %v6578_v4 = vld [vmem:[#allocation38_spill] sm:$0xff]  ;;  %v6579_v56 = vld [vmem:[#allocation39_spill] sm:$0xff] }
 0x3c8   :  { %1767 = vmatprep.subr.bf16.mxu0 %v4747_v49  ;;  %1808 = vmatprep.subr.bf16.mxu1 %v4749_v50  ;;  %v6580_v49 = vld [vmem:[#allocation41_spill] sm:$0xff]  ;;  %v6581_v50 = vld [vmem:[#allocation40_spill] sm:$0xff] }
 0x3cb   :  { %1768 = vmatpush1.bf16.msra.mxu0 %v4753_v6  ;;  %1809 = vmatpush1.bf16.msra.mxu1 %v6513_v34  ;;  %v6582_v6 = vld [vmem:[#allocation42_spill] sm:$0xff] }
 0x3cc   :  { %1769 = vmatprep.subr.bf16.mxu0 %v6514_v38  ;;  %1810 = vmatprep.subr.bf16.mxu1 %v6515_v39  ;;  %v6590_v34 = vld [vmem:[#allocation74_spill] sm:$0xff]  ;;  %v6591_v38 = vld [vmem:[#allocation75_spill] sm:$0xff]  ;;  %v6592_v39 = vld [vmem:[#allocation76_spill] sm:$0xff] }
 0x3ce   :  { %v3860_v33 = vpop.eup %3859 }
 0x3cf   :  { %1770 = vmatpush1.bf16.msra.mxu0 %v6516_v23  ;;  %1811 = vmatpush1.bf16.msra.mxu1 %v6517_v29  ;;  %v1559_v0 = vmul.f32 %v3860_v33, %v3858_v62  ;;  %v6593_v23 = vld [vmem:[#allocation77_spill] sm:$0xff]  ;;  %v6594_v29 = vld [vmem:[#allocation78_spill] sm:$0xff] }
 0x3d0   :  { %1771 = vmatprep.subr.bf16.mxu0 %v6518_v40  ;;  %1812 = vmatprep.subr.bf16.mxu1 %v6519_v20  ;;  %v6595_v40 = vld [vmem:[#allocation79_spill] sm:$0xff]  ;;  %v6596_v20 = vld [vmem:[#allocation80_spill] sm:$0xff] }
 0x3d1   :  { %v5248_v62 = vld [vmem:[#allocation6 + $0x48] ss:$16 sps:$4 sm:$0xff]   ;;  %v5251_v33 = vld [vmem:[#allocation6 + $0x24] ss:$16 sps:$4 sm:$0xff]  }
 0x3d2   :  { %6618 = vst [vmem:[#allocation13_spill] sm:$0xff] %v5248_v62  ;;  %6619 = vst [vmem:[#allocation43_spill] sm:$0xff] %v5251_v33 }
 0x3d3   :  { %1772 = vmatpush1.bf16.msra.mxu0 %v6520_v19  ;;  %1813 = vmatpush1.bf16.msra.mxu1 %v4779_v59  ;;  %v1760_v59 = vpack.c.bf16 %v1559_v0, %v1559_v0  ;;  %v6597_v19 = vld [vmem:[#allocation81_spill] sm:$0xff]  ;;  %v5254_v0 = vld [vmem:[#allocation6 + $0x2c] ss:$16 sps:$4 sm:$0xff]  }
 0x3d4   :  { %1773 = vmatprep.subr.bf16.mxu0 %v4783_v51  ;;  %1814 = vmatprep.subr.bf16.mxu1 %v4785_v55  ;;  %v6583_v51 = vld [vmem:[#allocation67_spill] sm:$0xff]  ;;  %v6584_v55 = vld [vmem:[#allocation68_spill] sm:$0xff]  ;;  %6620 = vst [vmem:[#allocation45_spill] sm:$0xff] %v5254_v0 }
 0x3d7   :  { %1774 = vmatpush1.bf16.msra.mxu0 %v4789_v1  ;;  %1815 = vmatpush1.bf16.msra.mxu1 %v4791_v52  ;;  %v6585_v1 = vld [vmem:[#allocation69_spill] sm:$0xff]  ;;  %v6586_v52 = vld [vmem:[#allocation70_spill] sm:$0xff] }
 0x3d8   :  { %1775 = vmatprep.subr.bf16.mxu0 %v4795_v61  ;;  %1816 = vmatprep.subr.bf16.mxu1 %v4797_v63  ;;  %v6587_v61 = vld [vmem:[#allocation71_spill] sm:$0xff]  ;;  %v6588_v63 = vld [vmem:[#allocation72_spill] sm:$0xff] }
 0x3db   :  { %1776 = vmatpush1.bf16.msra.mxu0 %v4801_v5  ;;  %1817 = vmatpush1.bf16.msra.mxu1 %v4803_v57  ;;  %v6573_v57 = vld [vmem:[#allocation14_spill] sm:$0xff]  ;;  %v6589_v5 = vld [vmem:[#allocation73_spill] sm:$0xff] }
 0x3dc   :  { %1878 = vmatprep.subr.bf16.mxu0 %v4953_v36  ;;  %1919 = vmatprep.subr.bf16.mxu1 %v4956_v32 }
 0x3de   :  { %1794 = vmatmul.mubr.bf16.vlgmr.msra.gmra.mxu0 %v1760_v59  ;;  %1835 = vmatmul.mubr.bf16.vlgmr.msra.gmra.mxu1 %v1760_v59  ;;  %v5257_v59 = vld [vmem:[#allocation6 + $0x20] ss:$16 sps:$4 sm:$0xff]  }
 0x3df   :  { %1879 = vmatpush1.bf16.msra.mxu0 %v4959_v30  ;;  %1920 = vmatpush1.bf16.msra.mxu1 %v4962_v31  ;;  %6621 = vst [vmem:[#allocation44_spill] sm:$0xff] %v5257_v59 }
 0x3e0   :  { %1880 = vmatprep.subr.bf16.mxu0 %v4965_v26  ;;  %1921 = vmatprep.subr.bf16.mxu1 %v4968_v41 }
 0x3e1   :  { %1910 = vmatprep.mubr.bf16.mxu0 %v6465_v15  ;;  %1951 = vmatprep.mubr.bf16.mxu1 %v6465_v15 }
 0x3e3   :  { %1881 = vmatpush1.bf16.msra.mxu0 %v6573_v57  ;;  %1922 = vmatpush1.bf16.msra.mxu1 %v6574_v58 }
 0x3e4   :  { %1882 = vmatprep.subr.bf16.mxu0 %v6575_v54  ;;  %1923 = vmatprep.subr.bf16.mxu1 %v6576_v2 }
 0x3e7   :  { %1883 = vmatpush1.bf16.msra.mxu0 %v6577_v60  ;;  %1924 = vmatpush1.bf16.msra.mxu1 %v6578_v4 }
 0x3e8   :  { %1884 = vmatprep.subr.bf16.mxu0 %v6579_v56  ;;  %1925 = vmatprep.subr.bf16.mxu1 %v6580_v49 }
 0x3eb   :  { %1885 = vmatpush1.bf16.msra.mxu0 %v6581_v50  ;;  %1926 = vmatpush1.bf16.msra.mxu1 %v6582_v6 }
 0x3ec   :  { %1886 = vmatprep.subr.bf16.mxu0 %v6583_v51  ;;  %1927 = vmatprep.subr.bf16.mxu1 %v6584_v55 }
 0x3ef   :  { %1887 = vmatpush1.bf16.msra.mxu0 %v6585_v1  ;;  %1928 = vmatpush1.bf16.msra.mxu1 %v6586_v52 }
 0x3f0   :  { %1888 = vmatprep.subr.bf16.mxu0 %v6587_v61  ;;  %1929 = vmatprep.subr.bf16.mxu1 %v6588_v63 }
 0x3f3   :  { %1889 = vmatpush1.bf16.msra.mxu0 %v6589_v5  ;;  %1930 = vmatpush1.bf16.msra.mxu1 %v6590_v34 }
 0x3f4   :  { %1890 = vmatprep.subr.bf16.mxu0 %v6591_v38  ;;  %1931 = vmatprep.subr.bf16.mxu1 %v6592_v39 }
 0x3f7   :  { %1891 = vmatpush1.bf16.msra.mxu0 %v6593_v23  ;;  %1932 = vmatpush1.bf16.msra.mxu1 %v6594_v29 }
 0x3f8   :  { %1892 = vmatprep.subr.bf16.mxu0 %v6595_v40  ;;  %1933 = vmatprep.subr.bf16.mxu1 %v6596_v20 }
 0x3fb   :  { %1893 = vmatpush1.bf16.msra.mxu0 %v6597_v19  ;;  %1934 = vmatpush1.bf16.msra.mxu1 %v6598_v44 }
 0x3fc   :  { %1989 = vmatprep.subr.bf16.mxu0 %v5175_v46  ;;  %2030 = vmatprep.subr.bf16.mxu1 %v5178_v47 }
 0x3fe   :  { %1911 = vmatmul.mubr.bf16.vlgmr.msra.gmra.mxu0 %v5104_v10  ;;  %1952 = vmatmul.mubr.bf16.vlgmr.msra.gmra.mxu1 %v5104_v10  ;;  %v5239_v10 = vld [vmem:[#allocation6 + $0x44] ss:$16 sps:$4 sm:$0xff]  }
 0x3ff   :  { %1990 = vmatpush1.bf16.msra.mxu0 %v5183_v27  ;;  %2031 = vmatpush1.bf16.msra.mxu1 %v5186_v18  ;;  %6615 = vst [vmem:[#allocation35_spill] sm:$0xff] %v5239_v10 }
 0x400   :  { %1991 = vmatprep.subr.bf16.mxu0 %v5189_v12  ;;  %2032 = vmatprep.subr.bf16.mxu1 %v5192_v22 }
 0x401   :  { %2021 = vmatprep.mubr.bf16.mxu0 %v6465_v15  ;;  %2062 = vmatprep.mubr.bf16.mxu1 %v6465_v15 }
 0x403   :  { %1992 = vmatpush1.bf16.msra.mxu0 %v5197_v21  ;;  %2033 = vmatpush1.bf16.msra.mxu1 %v5200_v14 }
 0x404   :  { %1993 = vmatprep.subr.bf16.mxu0 %v5203_v42  ;;  %2034 = vmatprep.subr.bf16.mxu1 %v5206_v37 }
 0x407   :  { %1994 = vmatpush1.bf16.msra.mxu0 %v5209_v17  ;;  %2035 = vmatpush1.bf16.msra.mxu1 %v5212_v11 }
 0x408   :  { %1995 = vmatprep.subr.bf16.mxu0 %v5215_v43  ;;  %2036 = vmatprep.subr.bf16.mxu1 %v5218_v3  ;;  %v6630_v3 = vld [vmem:[#allocation12_spill] sm:$0xff] }
 0x40b   :  { %1996 = vmatpush1.bf16.msra.mxu0 %v5221_v8  ;;  %2037 = vmatpush1.bf16.msra.mxu1 %v5224_v9  ;;  %v6629_v9 = vld [vmem:[#allocation11_spill] sm:$0xff] }
 0x40c   :  { %1997 = vmatprep.subr.bf16.mxu0 %v5227_v16  ;;  %2038 = vmatprep.subr.bf16.mxu1 %v5230_v7 }
 0x40f   :  { %1998 = vmatpush1.bf16.msra.mxu0 %v5233_v28  ;;  %2039 = vmatpush1.bf16.msra.mxu1 %v5236_v13 }
 0x410   :  { %1999 = vmatprep.subr.bf16.mxu0 %v5239_v10  ;;  %2040 = vmatprep.subr.bf16.mxu1 %v5242_v24  ;;  %v5260_v24 = vld [vmem:[#allocation6 + $0x28] ss:$16 sps:$4 sm:$0xff]  }
 0x411   :  { %6622 = vst [vmem:[#allocation46_spill] sm:$0xff] %v5260_v24 }
 0x413   :  { %2000 = vmatpush1.bf16.msra.mxu0 %v5245_v53  ;;  %2041 = vmatpush1.bf16.msra.mxu1 %v5248_v62  ;;  %v5263_v53 = vld [vmem:[#allocation6 + $0x4] ss:$16 sps:$4 sm:$0xff]   ;;  %v5266_v62 = vld [vmem:[#allocation6 + $0xc] ss:$16 sps:$4 sm:$0xff]  }
 0x414   :  { %2001 = vmatprep.subr.bf16.mxu0 %v5251_v33  ;;  %2042 = vmatprep.subr.bf16.mxu1 %v5254_v0  ;;  %6623 = vst [vmem:[#allocation14_spill] sm:$0xff] %v5263_v53  ;;  %6624 = vst [vmem:[#allocation15_spill] sm:$0xff] %v5266_v62  ;;  %v5269_v33 = vld [vmem:[#allocation6] ss:$16 sps:$4 sm:$0xff]   ;;  %v5272_v0 = vld [vmem:[#allocation6 + $0x8] ss:$16 sps:$4 sm:$0xff]  }
 0x415   :  { %6625 = vst [vmem:[#allocation16_spill] sm:$0xff] %v5269_v33  ;;  %6626 = vst [vmem:[#allocation17_spill] sm:$0xff] %v5272_v0 }
 0x417   :  { %2002 = vmatpush1.bf16.msra.mxu0 %v5257_v59  ;;  %2043 = vmatpush1.bf16.msra.mxu1 %v5260_v24  ;;  %v5275_v59 = vld [vmem:[#allocation8 + $0xe4] ss:$16 sps:$4 sm:$0xff]   ;;  %v5278_v24 = vld [vmem:[#allocation8 + $0xec] ss:$16 sps:$4 sm:$0xff]  }
 0x418   :  { %2003 = vmatprep.subr.bf16.mxu0 %v5263_v53  ;;  %2044 = vmatprep.subr.bf16.mxu1 %v5266_v62  ;;  %6627 = vst [vmem:[#allocation18_spill] sm:$0xff] %v5275_v59  ;;  %6628 = vst [vmem:[#allocation38_spill] sm:$0xff] %v5278_v24 }
 0x41b   :  { %2004 = vmatpush1.bf16.msra.mxu0 %v5269_v33  ;;  %2045 = vmatpush1.bf16.msra.mxu1 %v5272_v0 }
 0x41c   :  { %2072 = vmatprep.subr.bf16.mxu0 %v5275_v59  ;;  %2113 = vmatprep.subr.bf16.mxu1 %v5278_v24 }
 0x47e   :  { %v1712_v53 = vpop.f32.mrf.mxu0  ;;  %v1753_v10 = vpop.f32.mrf.mxu1 }
 0x47f   :  { %v1713_v8 = vadd.f32 %v1712_v53, %v6629_v9  ;;  %v1754_v0 = vadd.f32 %v1753_v10, %v6630_v3 }
 0x480   :  { %v1714_v13 = vpop.f32.mrf.mxu0  ;;  %v1755_v62 = vpop.f32.mrf.mxu1 }
 0x481   :  { %v1715_v59 = vadd.f32 %v1714_v13, %v4896_v25  ;;  %v1756_v17 = vadd.f32 %v1755_v62, %v6568_v35 }
 0x482   :  { %v1716_v28 = vpop.f32.mrf.mxu0  ;;  %v1757_v7 = vpop.f32.mrf.mxu1 }
 0x484   :  { %v1717_v16 = vpop.f32.mrf.mxu0  ;;  %v1758_v33 = vpop.f32.mrf.mxu1 }
 0x49e   :  { %v1795_v43 = vpop.f32.mrf.mxu0  ;;  %v1836_v11 = vpop.f32.mrf.mxu1 }
 0x49f   :  { %v1843_v37 = vadd.f32 %v1795_v43, %v1713_v8  ;;  %v1845_v24 = vadd.f32 %v1836_v11, %v1754_v0  ;;  %v6632_v0 = vld [vmem:[#allocation49_spill] sm:$0xff] }
 0x4a0   :  { %v1797_v42 = vpop.f32.mrf.mxu0  ;;  %v1838_v14 = vpop.f32.mrf.mxu1 }
 0x4a1   :  { %v3586_v21 = vmul.f32 -1.442695, %v1843_v37  ;;  %v1844_v22 = vadd.f32 %v1797_v42, %v1715_v59  ;;  %v1846_v28 = vadd.f32 %v1838_v14, %v1756_v17  ;;  %v6631_v37 = vld [vmem:[#allocation47_spill] sm:$0xff] }
 0x4a2   :  { %v1799_v7 = vpop.f32.mrf.mxu0  ;;  %v1840_v16 = vpop.f32.mrf.mxu1 }
 0x4a3   :  { %3861 = vpow2.f32 %v3586_v21  ;;  %v3587_v33 = vmul.f32 -1.442695, %v1844_v22 }
 0x4a4   :  { %v1800_v53 = vpop.f32.mrf.mxu0  ;;  %v1841_v9 = vpop.f32.mrf.mxu1 }
 0x4a5   :  { %3863 = vpow2.f32 %v3587_v33 }
 0x4a6   :  { %3865 = vtanh.f32 %v1846_v28 }
 0x4b0   :  { %v3862_v10 = vpop.eup %3861 }
 0x4b1   :  { %v1856_v3 = vadd.f32 1.0, %v3862_v10  ;;  %v6633_v10 = vld [vmem:[#allocation48_spill] sm:$0xff] }
 0x4b2   :  { %v3864_v12 = vpop.eup %3863 }
 0x4b3   :  { %3867 = vrcp.f32 %v1856_v3  ;;  %v1857_v13 = vadd.f32 1.0, %v3864_v12  ;;  %v3866_v8 = vpop.eup %3865 }
 0x4b5   :  { %3869 = vrcp.f32 %v1857_v13 }
 0x4be   :  { %v1912_v11 = vpop.f32.mrf.mxu0  ;;  %v1953_v43 = vpop.f32.mrf.mxu1 }
 0x4bf   :  { %v1960_v42 = vadd.f32 %v1912_v11, %v6631_v37  ;;  %v1962_v13 = vadd.f32 %v1953_v43, %v6633_v10  ;;  %v6634_v37 = vld [vmem:[#allocation50_spill] sm:$0xff]  ;;  %v5300_v10 = vld [vmem:[#allocation8 + $0xe0] ss:$16 sps:$4 sm:$0xff]  }
 0x4c0   :  { %v3868_v14 = vpop.eup %3867  ;;  %v1914_v17 = vpop.f32.mrf.mxu0 }
 0x4c1   :  { %v1955_v62 = vpop.f32.mrf.mxu1  ;;  %v1867_v21 = vmul.f32 %v3868_v14, %v3866_v8  ;;  %v3589_v22 = vmul.f32 -1.442695, %v1960_v42  ;;  %v1961_v9 = vadd.f32 %v1914_v17, %v6632_v0  ;;  %v3591_v11 = vmul.f32 -1.442695, %v1962_v13  ;;  %v5306_v13 = vld [vmem:[#allocation8 + $0xc4] ss:$16 sps:$4 sm:$0xff]  }
 0x4c2   :  { %v3870_v59 = vpop.eup %3869  ;;  %v1916_v7 = vpop.f32.mrf.mxu0  ;;  %v1963_v8 = vadd.f32 %v1955_v62, %v6634_v37  ;;  %v3588_v62 = vmul.f32 -1.442695, %v1845_v24  ;;  %v5309_v24 = vld [vmem:[#allocation8 + $0xcc] ss:$16 sps:$4 sm:$0xff]   ;;  %v5314_v37 = vld [vmem:[#allocation8 + $0xc0] ss:$16 sps:$4 sm:$0xff]  }
 0x4c3   :  { %v1957_v16 = vpop.f32.mrf.mxu1  ;;  %v1866_v28 = vmul.f32 %v3870_v59, %v5096_v45  ;;  %3871 = vpow2.f32 %v3589_v22  ;;  %v3590_v12 = vmul.f32 -1.442695, %v1961_v9 }
 0x4c4   :  { %v1917_v3 = vpop.f32.mrf.mxu0 }
 0x4c5   :  { %v1958_v33 = vpop.f32.mrf.mxu1  ;;  %v5288_v53 = vadd.f32 %v1867_v21, %v1866_v28  ;;  %3873 = vpow2.f32 %v3590_v12 }
 0x4c6   :  { %3875 = vpow2.f32 %v3591_v11 }
 0x4c7   :  { %3877 = vtanh.f32 %v1963_v8  ;;  %v5317_v8 = vld [vmem:[#allocation8 + $0xc8] ss:$16 sps:$4 sm:$0xff]  }
 0x4d0   :  { %v3872_v42 = vpop.eup %3871 }
 0x4d1   :  { %v1973_v14 = vadd.f32 1.0, %v3872_v42  ;;  %v5320_v42 = vld [vmem:[#allocation8 + $0xa4] ss:$16 sps:$4 sm:$0xff]  }
 0x4d2   :  { %v3874_v17 = vpop.eup %3873 }
 0x4d3   :  { %3879 = vrcp.f32 %v1973_v14  ;;  %v1974_v0 = vadd.f32 1.0, %v3874_v17  ;;  %v3876_v45 = vpop.eup %3875  ;;  %v5323_v14 = vld [vmem:[#allocation8 + $0xac] ss:$16 sps:$4 sm:$0xff]  }
 0x4d4   :  { %v3878_v22 = vpop.eup %3877  ;;  %v1975_v7 = vadd.f32 1.0, %v3876_v45  ;;  %v5329_v45 = vld [vmem:[#allocation8 + $0xa8] ss:$16 sps:$4 sm:$0xff]  }
 0x4d5   :  { %3881 = vrcp.f32 %v1974_v0  ;;  %v5326_v0 = vld [vmem:[#allocation8 + $0xa0] ss:$16 sps:$4 sm:$0xff]  }
 0x4d6   :  { %3883 = vrcp.f32 %v1975_v7  ;;  %v5345_v7 = vld [vmem:[#allocation8 + $0x64] ss:$16 sps:$4 sm:$0xff]  }
 0x4d7   :  { %6636 = vst [vmem:[#allocation41_spill] sm:$0xff] %v5345_v7 }
 0x4e0   :  { %v3880_v9 = vpop.eup %3879 }
 0x4e1   :  { %v1984_v59 = vmul.f32 %v3880_v9, %v3878_v22  ;;  %v5333_v22 = vld [vmem:[#allocation8 + $0x84] ss:$16 sps:$4 sm:$0xff]   ;;  %v5336_v9 = vld [vmem:[#allocation8 + $0x8c] ss:$16 sps:$4 sm:$0xff]  }
 0x4e2   :  { %v3882_v21 = vpop.eup %3881 }
 0x4e3   :  { %v1983_v16 = vmul.f32 %v3882_v21, %v5101_v48  ;;  %v3884_v28 = vpop.eup %3883  ;;  %v5303_v48 = vld [vmem:[#allocation8 + $0xe8] ss:$16 sps:$4 sm:$0xff]  }
 0x4e4   :  { %v5342_v21 = vld [vmem:[#allocation8 + $0x88] ss:$16 sps:$4 sm:$0xff]  }
 0x4e5   :  { %v5293_v43 = vadd.f32 %v1984_v59, %v1983_v16  ;;  %v5339_v59 = vld [vmem:[#allocation8 + $0x80] ss:$16 sps:$4 sm:$0xff]   ;;  %6635 = vst [vmem:[#allocation39_spill] sm:$0xff] %v5342_v21  ;;  %v5348_v16 = vld [vmem:[#allocation8 + $0x6c] ss:$16 sps:$4 sm:$0xff]  }
 0x4e6   :  { %6637 = vst [vmem:[#allocation40_spill] sm:$0xff] %v5348_v16 }
 0x4e7   :  { %3885 = vtanh.f32 %v5293_v43 }
 0x4e8   :  { %3887 = vpow2.f32 %v3588_v62  ;;  %v5351_v62 = vld [vmem:[#allocation8 + $0x60] ss:$16 sps:$4 sm:$0xff]  }
 0x4e9   :  { %3889 = vtanh.f32 %v5288_v53  ;;  %6638 = vst [vmem:[#allocation42_spill] sm:$0xff] %v5351_v62 }
 0x4f4   :  { %v3886_v12 = vpop.eup %3885 }
 0x4f5   :  { %v1987_v3 = vmul.f32 %v3886_v12, %v3884_v28  ;;  %v3888_v11 = vpop.eup %3887  ;;  %v5354_v28 = vld [vmem:[#allocation8 + $0x68] ss:$16 sps:$4 sm:$0xff]   ;;  %v5357_v12 = vld [vmem:[#allocation8 + $0x44] ss:$16 sps:$4 sm:$0xff]  }
 0x4f6   :  { %v1858_v17 = vadd.f32 1.0, %v3888_v11  ;;  %6639 = vst [vmem:[#allocation67_spill] sm:$0xff] %v5354_v28  ;;  %6640 = vst [vmem:[#allocation68_spill] sm:$0xff] %v5357_v12  ;;  %v5363_v11 = vld [vmem:[#allocation8 + $0x40] ss:$16 sps:$4 sm:$0xff]  }
 0x4f7   :  { %v5296_v33 = vpack.c.bf16 %v1987_v3, %v1987_v3  ;;  %v5360_v3 = vld [vmem:[#allocation8 + $0x4c] ss:$16 sps:$4 sm:$0xff]   ;;  %6642 = vst [vmem:[#allocation70_spill] sm:$0xff] %v5363_v11 }
 0x4f8   :  { %3891 = vrcp.f32 %v1858_v17  ;;  %6641 = vst [vmem:[#allocation69_spill] sm:$0xff] %v5360_v3  ;;  %v5366_v17 = vld [vmem:[#allocation8 + $0x48] ss:$16 sps:$4 sm:$0xff]  }
 0x4f9   :  { %2022 = vmatmul.mubr.bf16.vlgmr.msra.gmra.mxu0 %v5296_v33  ;;  %2063 = vmatmul.mubr.bf16.vlgmr.msra.gmra.mxu1 %v5296_v33  ;;  %6643 = vst [vmem:[#allocation71_spill] sm:$0xff] %v5366_v17 }
 0x4fa   :  { %2073 = vmatpush1.bf16.msra.mxu0 %v5300_v10  ;;  %2114 = vmatpush1.bf16.msra.mxu1 %v5303_v48 }
 0x4fb   :  { %2074 = vmatprep.subr.bf16.mxu0 %v5306_v13  ;;  %2115 = vmatprep.subr.bf16.mxu1 %v5309_v24 }
 0x4fc   :  { %2104 = vmatprep.mubr.bf16.mxu0 %v6465_v15  ;;  %2145 = vmatprep.mubr.bf16.mxu1 %v6465_v15 }
 0x4fe   :  { %2075 = vmatpush1.bf16.msra.mxu0 %v5314_v37  ;;  %2116 = vmatpush1.bf16.msra.mxu1 %v5317_v8 }
 0x4ff   :  { %2076 = vmatprep.subr.bf16.mxu0 %v5320_v42  ;;  %2117 = vmatprep.subr.bf16.mxu1 %v5323_v14 }
 0x502   :  { %2077 = vmatpush1.bf16.msra.mxu0 %v5326_v0  ;;  %2118 = vmatpush1.bf16.msra.mxu1 %v5329_v45 }
 0x503   :  { %2078 = vmatprep.subr.bf16.mxu0 %v5333_v22  ;;  %2119 = vmatprep.subr.bf16.mxu1 %v5336_v9 }
 0x506   :  { %2079 = vmatpush1.bf16.msra.mxu0 %v5339_v59  ;;  %2120 = vmatpush1.bf16.msra.mxu1 %v5342_v21  ;;  %v5390_v21 = vld [vmem:[#allocation8 + $0x8] ss:$16 sps:$4 sm:$0xff]  }
 0x507   :  { %2080 = vmatprep.subr.bf16.mxu0 %v5345_v7  ;;  %2121 = vmatprep.subr.bf16.mxu1 %v5348_v16  ;;  %v5375_v7 = vld [vmem:[#allocation8 + $0x20] ss:$16 sps:$4 sm:$0xff]  }
 0x508   :  { %6646 = vst [vmem:[#allocation74_spill] sm:$0xff] %v5375_v7 }
 0x50a   :  { %2081 = vmatpush1.bf16.msra.mxu0 %v5351_v62  ;;  %2122 = vmatpush1.bf16.msra.mxu1 %v5354_v28  ;;  %v5369_v62 = vld [vmem:[#allocation8 + $0x24] ss:$16 sps:$4 sm:$0xff]   ;;  %v5372_v28 = vld [vmem:[#allocation8 + $0x2c] ss:$16 sps:$4 sm:$0xff]  }
 0x50b   :  { %2082 = vmatprep.subr.bf16.mxu0 %v5357_v12  ;;  %2123 = vmatprep.subr.bf16.mxu1 %v5360_v3  ;;  %6644 = vst [vmem:[#allocation72_spill] sm:$0xff] %v5369_v62  ;;  %6645 = vst [vmem:[#allocation73_spill] sm:$0xff] %v5372_v28  ;;  %v3890_v12 = vpop.eup %3889  ;;  %v5378_v3 = vld [vmem:[#allocation8 + $0x28] ss:$16 sps:$4 sm:$0xff]  }
 0x50c   :  { %v3892_v16 = vpop.eup %3891 }
 0x50e   :  { %2083 = vmatpush1.bf16.msra.mxu0 %v5363_v11  ;;  %2124 = vmatpush1.bf16.msra.mxu1 %v5366_v17  ;;  %v5381_v11 = vld [vmem:[#allocation8 + $0x4] ss:$16 sps:$4 sm:$0xff]   ;;  %v5384_v17 = vld [vmem:[#allocation8 + $0xc] ss:$16 sps:$4 sm:$0xff]  }
 0x50f   :  { %2084 = vmatprep.subr.bf16.mxu0 %v5369_v62  ;;  %2125 = vmatprep.subr.bf16.mxu1 %v5372_v28  ;;  %v1870_v62 = vmul.f32 %v3892_v16, %v3890_v12  ;;  %v5387_v28 = vld [vmem:[#allocation8] ss:$16 sps:$4 sm:$0xff]  }
 0x512   :  { %2085 = vmatpush1.bf16.msra.mxu0 %v5375_v7  ;;  %2126 = vmatpush1.bf16.msra.mxu1 %v5378_v3  ;;  %v2071_v7 = vpack.c.bf16 %v1870_v62, %v1870_v62 }
 0x513   :  { %2086 = vmatprep.subr.bf16.mxu0 %v5381_v11  ;;  %2127 = vmatprep.subr.bf16.mxu1 %v5384_v17 }
 0x516   :  { %2087 = vmatpush1.bf16.msra.mxu0 %v5387_v28  ;;  %2128 = vmatpush1.bf16.msra.mxu1 %v5390_v21 }
 0x517   :  { %2189 = vmatprep.subr.bf16.mxu0 %v4953_v36  ;;  %2230 = vmatprep.subr.bf16.mxu1 %v4956_v32  ;;  %v6647_v36 = vld [vmem:[#allocation19_spill] sm:$0xff]  ;;  %v6648_v32 = vld [vmem:[#allocation20_spill] sm:$0xff] }
 0x519   :  { %2105 = vmatmul.mubr.bf16.vlgmr.msra.gmra.mxu0 %v2071_v7  ;;  %2146 = vmatmul.mubr.bf16.vlgmr.msra.gmra.mxu1 %v2071_v7 }
 0x51a   :  { %2190 = vmatpush1.bf16.msra.mxu0 %v4959_v30  ;;  %2231 = vmatpush1.bf16.msra.mxu1 %v4962_v31  ;;  %v6649_v30 = vld [vmem:[#allocation21_spill] sm:$0xff]  ;;  %v6650_v31 = vld [vmem:[#allocation22_spill] sm:$0xff] }
 0x51b   :  { %2191 = vmatprep.subr.bf16.mxu0 %v4965_v26  ;;  %2232 = vmatprep.subr.bf16.mxu1 %v4968_v41  ;;  %v6651_v26 = vld [vmem:[#allocation23_spill] sm:$0xff]  ;;  %v6652_v41 = vld [vmem:[#allocation24_spill] sm:$0xff] }
 0x51c   :  { %2221 = vmatprep.mubr.bf16.mxu0 %v6465_v15  ;;  %2262 = vmatprep.mubr.bf16.mxu1 %v6465_v15 }
 0x51e   :  { %2192 = vmatpush1.bf16.msra.mxu0 %v6573_v57  ;;  %2233 = vmatpush1.bf16.msra.mxu1 %v6574_v58  ;;  %v6653_v57 = vld [vmem:[#allocation25_spill] sm:$0xff]  ;;  %v6654_v58 = vld [vmem:[#allocation26_spill] sm:$0xff] }
 0x51f   :  { %2193 = vmatprep.subr.bf16.mxu0 %v6575_v54  ;;  %2234 = vmatprep.subr.bf16.mxu1 %v6576_v2  ;;  %v6655_v54 = vld [vmem:[#allocation27_spill] sm:$0xff]  ;;  %v6656_v2 = vld [vmem:[#allocation28_spill] sm:$0xff] }
 0x522   :  { %2194 = vmatpush1.bf16.msra.mxu0 %v6577_v60  ;;  %2235 = vmatpush1.bf16.msra.mxu1 %v6578_v4  ;;  %v6657_v60 = vld [vmem:[#allocation29_spill] sm:$0xff]  ;;  %v6658_v4 = vld [vmem:[#allocation30_spill] sm:$0xff] }
 0x523   :  { %2195 = vmatprep.subr.bf16.mxu0 %v6579_v56  ;;  %2236 = vmatprep.subr.bf16.mxu1 %v6580_v49  ;;  %v6659_v56 = vld [vmem:[#allocation31_spill] sm:$0xff]  ;;  %v6660_v49 = vld [vmem:[#allocation32_spill] sm:$0xff] }
 0x526   :  { %2196 = vmatpush1.bf16.msra.mxu0 %v6581_v50  ;;  %2237 = vmatpush1.bf16.msra.mxu1 %v6582_v6  ;;  %v6661_v50 = vld [vmem:[#allocation33_spill] sm:$0xff]  ;;  %v6662_v6 = vld [vmem:[#allocation34_spill] sm:$0xff] }
 0x527   :  { %2197 = vmatprep.subr.bf16.mxu0 %v6583_v51  ;;  %2238 = vmatprep.subr.bf16.mxu1 %v6584_v55  ;;  %v6663_v51 = vld [vmem:[#allocation35_spill] sm:$0xff]  ;;  %v6664_v55 = vld [vmem:[#allocation36_spill] sm:$0xff] }
 0x52a   :  { %2198 = vmatpush1.bf16.msra.mxu0 %v6585_v1  ;;  %2239 = vmatpush1.bf16.msra.mxu1 %v6586_v52  ;;  %v6665_v1 = vld [vmem:[#allocation37_spill] sm:$0xff] }
 0x52b   :  { %2199 = vmatprep.subr.bf16.mxu0 %v6587_v61  ;;  %2240 = vmatprep.subr.bf16.mxu1 %v6588_v63  ;;  %v6666_v52 = vld [vmem:[#allocation13_spill] sm:$0xff]  ;;  %v6667_v61 = vld [vmem:[#allocation43_spill] sm:$0xff] }
 0x52c   :  { %v6668_v63 = vld [vmem:[#allocation45_spill] sm:$0xff] }
 0x52e   :  { %2200 = vmatpush1.bf16.msra.mxu0 %v6589_v5  ;;  %2241 = vmatpush1.bf16.msra.mxu1 %v6590_v34  ;;  %v6669_v5 = vld [vmem:[#allocation44_spill] sm:$0xff]  ;;  %v6670_v34 = vld [vmem:[#allocation46_spill] sm:$0xff] }
 0x52f   :  { %2201 = vmatprep.subr.bf16.mxu0 %v6591_v38  ;;  %2242 = vmatprep.subr.bf16.mxu1 %v6592_v39  ;;  %v6671_v38 = vld [vmem:[#allocation14_spill] sm:$0xff]  ;;  %v6672_v39 = vld [vmem:[#allocation15_spill] sm:$0xff] }
 0x532   :  { %2202 = vmatpush1.bf16.msra.mxu0 %v6593_v23  ;;  %2243 = vmatpush1.bf16.msra.mxu1 %v6594_v29  ;;  %v6673_v23 = vld [vmem:[#allocation16_spill] sm:$0xff]  ;;  %v6674_v29 = vld [vmem:[#allocation17_spill] sm:$0xff] }
 0x533   :  { %2203 = vmatprep.subr.bf16.mxu0 %v6595_v40  ;;  %2244 = vmatprep.subr.bf16.mxu1 %v6596_v20  ;;  %v6675_v40 = vld [vmem:[#allocation18_spill] sm:$0xff] }
 0x534   :  { %v6676_v20 = vld [vmem:[#allocation38_spill] sm:$0xff] }
 0x536   :  { %2204 = vmatpush1.bf16.msra.mxu0 %v6597_v19  ;;  %2245 = vmatpush1.bf16.msra.mxu1 %v6598_v44 }
 0x537   :  { %2300 = vmatprep.subr.bf16.mxu0 %v5175_v46  ;;  %2341 = vmatprep.subr.bf16.mxu1 %v5178_v47 }
 0x539   :  { %2222 = vmatmul.mubr.bf16.vlgmr.msra.gmra.mxu0 %v5296_v33  ;;  %2263 = vmatmul.mubr.bf16.vlgmr.msra.gmra.mxu1 %v5296_v33 }
 0x53a   :  { %2301 = vmatpush1.bf16.msra.mxu0 %v5183_v27  ;;  %2342 = vmatpush1.bf16.msra.mxu1 %v5186_v18 }
 0x53b   :  { %2302 = vmatprep.subr.bf16.mxu0 %v6647_v36  ;;  %2343 = vmatprep.subr.bf16.mxu1 %v6648_v32 }
 0x53c   :  { %2332 = vmatprep.mubr.bf16.mxu0 %v6465_v15  ;;  %2373 = vmatprep.mubr.bf16.mxu1 %v6465_v15 }
 0x53e   :  { %2303 = vmatpush1.bf16.msra.mxu0 %v6649_v30  ;;  %2344 = vmatpush1.bf16.msra.mxu1 %v6650_v31 }
 0x53f   :  { %2304 = vmatprep.subr.bf16.mxu0 %v6651_v26  ;;  %2345 = vmatprep.subr.bf16.mxu1 %v6652_v41 }
 0x542   :  { %2305 = vmatpush1.bf16.msra.mxu0 %v6653_v57  ;;  %2346 = vmatpush1.bf16.msra.mxu1 %v6654_v58 }
 0x543   :  { %2306 = vmatprep.subr.bf16.mxu0 %v6655_v54  ;;  %2347 = vmatprep.subr.bf16.mxu1 %v6656_v2 }
 0x546   :  { %2307 = vmatpush1.bf16.msra.mxu0 %v6657_v60  ;;  %2348 = vmatpush1.bf16.msra.mxu1 %v6658_v4 }
 0x547   :  { %2308 = vmatprep.subr.bf16.mxu0 %v6659_v56  ;;  %2349 = vmatprep.subr.bf16.mxu1 %v6660_v49 }
 0x54a   :  { %2309 = vmatpush1.bf16.msra.mxu0 %v6661_v50  ;;  %2350 = vmatpush1.bf16.msra.mxu1 %v6662_v6 }
 0x54b   :  { %2310 = vmatprep.subr.bf16.mxu0 %v6663_v51  ;;  %2351 = vmatprep.subr.bf16.mxu1 %v6664_v55 }
 0x54e   :  { %2311 = vmatpush1.bf16.msra.mxu0 %v6665_v1  ;;  %2352 = vmatpush1.bf16.msra.mxu1 %v6666_v52 }
 0x54f   :  { %2312 = vmatprep.subr.bf16.mxu0 %v6667_v61  ;;  %2353 = vmatprep.subr.bf16.mxu1 %v6668_v63  ;;  %v6678_v63 = vld [vmem:[#allocation12_spill] sm:$0xff] }
 0x552   :  { %2313 = vmatpush1.bf16.msra.mxu0 %v6669_v5  ;;  %2354 = vmatpush1.bf16.msra.mxu1 %v6670_v34  ;;  %v6677_v5 = vld [vmem:[#allocation11_spill] sm:$0xff] }
 0x553   :  { %2314 = vmatprep.subr.bf16.mxu0 %v6671_v38  ;;  %2355 = vmatprep.subr.bf16.mxu1 %v6672_v39 }
 0x556   :  { %2315 = vmatpush1.bf16.msra.mxu0 %v6673_v23  ;;  %2356 = vmatpush1.bf16.msra.mxu1 %v6674_v29 }
 0x557   :  { %2383 = vmatprep.subr.bf16.mxu0 %v6675_v40  ;;  %2424 = vmatprep.subr.bf16.mxu1 %v6676_v20 }
 0x5b9   :  { %v2023_v19 = vpop.f32.mrf.mxu0  ;;  %v2064_v44 = vpop.f32.mrf.mxu1 }
 0x5ba   :  { %v2024_v38 = vadd.f32 %v2023_v19, %v6677_v5  ;;  %v2065_v39 = vadd.f32 %v2064_v44, %v6678_v63 }
 0x5bb   :  { %v2025_v33 = vpop.f32.mrf.mxu0  ;;  %v2066_v7 = vpop.f32.mrf.mxu1 }
 0x5bc   :  { %v2026_v29 = vadd.f32 %v2025_v33, %v4896_v25  ;;  %v2067_v40 = vadd.f32 %v2066_v7, %v6568_v35 }
 0x5bd   :  { %v2027_v16 = vpop.f32.mrf.mxu0  ;;  %v2068_v62 = vpop.f32.mrf.mxu1 }
 0x5bf   :  { %v2028_v12 = vpop.f32.mrf.mxu0  ;;  %v2069_v34 = vpop.f32.mrf.mxu1 }
 0x5d9   :  { %v2106_v61 = vpop.f32.mrf.mxu0  ;;  %v2147_v23 = vpop.f32.mrf.mxu1 }
 0x5da   :  { %v2154_v52 = vadd.f32 %v2106_v61, %v2024_v38  ;;  %v2156_v20 = vadd.f32 %v2147_v23, %v2065_v39 }
 0x5db   :  { %v2108_v1 = vpop.f32.mrf.mxu0  ;;  %v2149_v55 = vpop.f32.mrf.mxu1 }
 0x5dc   :  { %v3592_v51 = vmul.f32 -1.442695, %v2154_v52  ;;  %v2155_v6 = vadd.f32 %v2108_v1, %v2026_v29  ;;  %v2157_v16 = vadd.f32 %v2149_v55, %v2067_v40  ;;  %v6679_v52 = vld [vmem:[#allocation51_spill] sm:$0xff]  ;;  %v6680_v40 = vld [vmem:[#allocation53_spill] sm:$0xff] }
 0x5dd   :  { %v2110_v62 = vpop.f32.mrf.mxu0  ;;  %v2151_v12 = vpop.f32.mrf.mxu1 }
 0x5de   :  { %3893 = vpow2.f32 %v3592_v51  ;;  %v3593_v34 = vmul.f32 -1.442695, %v2155_v6 }
 0x5df   :  { %v2111_v19 = vpop.f32.mrf.mxu0  ;;  %v2152_v5 = vpop.f32.mrf.mxu1 }
 0x5e0   :  { %3895 = vpow2.f32 %v3593_v34 }
 0x5e1   :  { %3897 = vtanh.f32 %v2157_v16 }
 0x5eb   :  { %v3894_v44 = vpop.eup %3893 }
 0x5ec   :  { %v2167_v63 = vadd.f32 1.0, %v3894_v44  ;;  %v6681_v44 = vld [vmem:[#allocation52_spill] sm:$0xff] }
 0x5ed   :  { %v3896_v50 = vpop.eup %3895 }
 0x5ee   :  { %3899 = vrcp.f32 %v2167_v63  ;;  %v2168_v33 = vadd.f32 1.0, %v3896_v50  ;;  %v3898_v39 = vpop.eup %3897 }
 0x5f0   :  { %3901 = vrcp.f32 %v2168_v33 }
 0x5f9   :  { %v2223_v61 = vpop.f32.mrf.mxu0  ;;  %v2264_v38 = vpop.f32.mrf.mxu1 }
 0x5fa   :  { %v2271_v1 = vadd.f32 %v2223_v61, %v6679_v52  ;;  %v2273_v33 = vadd.f32 %v2264_v38, %v6681_v44  ;;  %v6682_v52 = vld [vmem:[#allocation54_spill] sm:$0xff]  ;;  %v6683_v44 = vld [vmem:[#allocation39_spill] sm:$0xff] }
 0x5fb   :  { %v3900_v55 = vpop.eup %3899  ;;  %v2225_v23 = vpop.f32.mrf.mxu0 }
 0x5fc   :  { %v2266_v29 = vpop.f32.mrf.mxu1  ;;  %v2178_v51 = vmul.f32 %v3900_v55, %v3898_v39  ;;  %v3595_v6 = vmul.f32 -1.442695, %v2271_v1  ;;  %v2272_v5 = vadd.f32 %v2225_v23, %v6680_v40  ;;  %v3597_v61 = vmul.f32 -1.442695, %v2273_v33  ;;  %v6684_v33 = vld [vmem:[#allocation41_spill] sm:$0xff] }
 0x5fd   :  { %v3902_v7 = vpop.eup %3901  ;;  %v2227_v62 = vpop.f32.mrf.mxu0  ;;  %v2274_v39 = vadd.f32 %v2266_v29, %v6682_v52  ;;  %v3594_v29 = vmul.f32 -1.442695, %v2156_v20  ;;  %v6686_v52 = vld [vmem:[#allocation42_spill] sm:$0xff] }
 0x5fe   :  { %v2268_v12 = vpop.f32.mrf.mxu1  ;;  %v2177_v16 = vmul.f32 %v3902_v7, %v5288_v53  ;;  %3903 = vpow2.f32 %v3595_v6  ;;  %v3596_v50 = vmul.f32 -1.442695, %v2272_v5 }
 0x5ff   :  { %v2228_v63 = vpop.f32.mrf.mxu0 }
 0x600   :  { %v2269_v34 = vpop.f32.mrf.mxu1  ;;  %v5472_v19 = vadd.f32 %v2178_v51, %v2177_v16  ;;  %3905 = vpow2.f32 %v3596_v50 }
 0x601   :  { %3907 = vpow2.f32 %v3597_v61  ;;  %v6685_v61 = vld [vmem:[#allocation40_spill] sm:$0xff] }
 0x602   :  { %3909 = vtanh.f32 %v2274_v39  ;;  %v6687_v39 = vld [vmem:[#allocation67_spill] sm:$0xff] }
 0x60b   :  { %v3904_v1 = vpop.eup %3903 }
 0x60c   :  { %v2284_v55 = vadd.f32 1.0, %v3904_v1  ;;  %v6688_v1 = vld [vmem:[#allocation68_spill] sm:$0xff] }
 0x60d   :  { %v3906_v23 = vpop.eup %3905 }
 0x60e   :  { %3911 = vrcp.f32 %v2284_v55  ;;  %v2285_v40 = vadd.f32 1.0, %v3906_v23  ;;  %v3908_v53 = vpop.eup %3907  ;;  %v6689_v55 = vld [vmem:[#allocation69_spill] sm:$0xff]  ;;  %v6690_v23 = vld [vmem:[#allocation70_spill] sm:$0xff] }
 0x60f   :  { %v3910_v6 = vpop.eup %3909  ;;  %v2286_v62 = vadd.f32 1.0, %v3908_v53  ;;  %v6692_v53 = vld [vmem:[#allocation72_spill] sm:$0xff] }
 0x610   :  { %3913 = vrcp.f32 %v2285_v40  ;;  %v6691_v40 = vld [vmem:[#allocation71_spill] sm:$0xff] }
 0x611   :  { %3915 = vrcp.f32 %v2286_v62 }
 0x61b   :  { %v3912_v5 = vpop.eup %3911 }
 0x61c   :  { %v2295_v7 = vmul.f32 %v3912_v5, %v3910_v6  ;;  %v6693_v6 = vld [vmem:[#allocation73_spill] sm:$0xff] }
 0x61d   :  { %v3914_v51 = vpop.eup %3913 }
 0x61e   :  { %v2294_v12 = vmul.f32 %v3914_v51, %v5293_v43  ;;  %v3916_v16 = vpop.eup %3915  ;;  %v6694_v51 = vld [vmem:[#allocation74_spill] sm:$0xff] }
 0x620   :  { %v5477_v38 = vadd.f32 %v2295_v7, %v2294_v12 }
 0x622   :  { %3917 = vtanh.f32 %v5477_v38 }
 0x623   :  { %3919 = vpow2.f32 %v3594_v29  ;;  %v5517_v29 = vld [vmem:[#allocation4 + $0xe4] ss:$16 sps:$4 sm:$0xff]  }
 0x624   :  { %3921 = vtanh.f32 %v5472_v19 }
 0x62f   :  { %v3918_v50 = vpop.eup %3917 }
 0x630   :  { %v2298_v63 = vmul.f32 %v3918_v50, %v3916_v16  ;;  %v3920_v43 = vpop.eup %3919  ;;  %v5520_v16 = vld [vmem:[#allocation4 + $0xec] ss:$16 sps:$4 sm:$0xff]   ;;  %v5523_v50 = vld [vmem:[#allocation4 + $0xe0] ss:$16 sps:$4 sm:$0xff]  }
 0x631   :  { %v2169_v20 = vadd.f32 1.0, %v3920_v43  ;;  %v3922_v5 = vpop.eup %3921  ;;  %v5529_v43 = vld [vmem:[#allocation4 + $0xc4] ss:$16 sps:$4 sm:$0xff]  }
 0x632   :  { %v5480_v34 = vpack.c.bf16 %v2298_v63, %v2298_v63  ;;  %v5526_v63 = vld [vmem:[#allocation4 + $0xe8] ss:$16 sps:$4 sm:$0xff]   ;;  %6695 = vst [vmem:[#allocation75_spill] sm:$0xff] %v5529_v43 }
 0x633   :  { %3923 = vrcp.f32 %v2169_v20  ;;  %v5532_v20 = vld [vmem:[#allocation4 + $0xcc] ss:$16 sps:$4 sm:$0xff]  }
 0x634   :  { %2333 = vmatmul.mubr.bf16.vlgmr.msra.gmra.mxu0 %v5480_v34  ;;  %2374 = vmatmul.mubr.bf16.vlgmr.msra.gmra.mxu1 %v5480_v34  ;;  %6696 = vst [vmem:[#allocation76_spill] sm:$0xff] %v5532_v20 }
 0x635   :  { %2384 = vmatpush1.bf16.msra.mxu0 %v5300_v10  ;;  %2425 = vmatpush1.bf16.msra.mxu1 %v5303_v48 }
 0x636   :  { %2385 = vmatprep.subr.bf16.mxu0 %v5306_v13  ;;  %2426 = vmatprep.subr.bf16.mxu1 %v5309_v24 }
 0x637   :  { %2415 = vmatprep.mubr.bf16.mxu0 %v6465_v15  ;;  %2456 = vmatprep.mubr.bf16.mxu1 %v6465_v15 }
 0x639   :  { %2386 = vmatpush1.bf16.msra.mxu0 %v5314_v37  ;;  %2427 = vmatpush1.bf16.msra.mxu1 %v5317_v8 }
 0x63a   :  { %2387 = vmatprep.subr.bf16.mxu0 %v5320_v42  ;;  %2428 = vmatprep.subr.bf16.mxu1 %v5323_v14 }
 0x63d   :  { %2388 = vmatpush1.bf16.msra.mxu0 %v5326_v0  ;;  %2429 = vmatpush1.bf16.msra.mxu1 %v5329_v45 }
 0x63e   :  { %2389 = vmatprep.subr.bf16.mxu0 %v5333_v22  ;;  %2430 = vmatprep.subr.bf16.mxu1 %v5336_v9 }
 0x640   :  { %v3924_v7 = vpop.eup %3923 }
 0x641   :  { %2390 = vmatpush1.bf16.msra.mxu0 %v5339_v59  ;;  %2431 = vmatpush1.bf16.msra.mxu1 %v6683_v44  ;;  %v2181_v62 = vmul.f32 %v3924_v7, %v3922_v5  ;;  %v5537_v5 = vld [vmem:[#allocation4 + $0xc0] ss:$16 sps:$4 sm:$0xff]   ;;  %v5540_v7 = vld [vmem:[#allocation4 + $0xc8] ss:$16 sps:$4 sm:$0xff]  }
 0x642   :  { %2391 = vmatprep.subr.bf16.mxu0 %v6684_v33  ;;  %2432 = vmatprep.subr.bf16.mxu1 %v6685_v61  ;;  %6697 = vst [vmem:[#allocation77_spill] sm:$0xff] %v5537_v5  ;;  %6698 = vst [vmem:[#allocation78_spill] sm:$0xff] %v5540_v7 }
 0x643   :  { %v2382_v12 = vpack.c.bf16 %v2181_v62, %v2181_v62  ;;  %v5543_v62 = vld [vmem:[#allocation4 + $0xa4] ss:$16 sps:$4 sm:$0xff]  }
 0x644   :  { %6699 = vst [vmem:[#allocation79_spill] sm:$0xff] %v5543_v62 }
 0x645   :  { %2392 = vmatpush1.bf16.msra.mxu0 %v6686_v52  ;;  %2433 = vmatpush1.bf16.msra.mxu1 %v6687_v39 }
 0x646   :  { %2393 = vmatprep.subr.bf16.mxu0 %v6688_v1  ;;  %2434 = vmatprep.subr.bf16.mxu1 %v6689_v55 }
 0x649   :  { %2394 = vmatpush1.bf16.msra.mxu0 %v6690_v23  ;;  %2435 = vmatpush1.bf16.msra.mxu1 %v6691_v40 }
 0x64a   :  { %2395 = vmatprep.subr.bf16.mxu0 %v6692_v53  ;;  %2436 = vmatprep.subr.bf16.mxu1 %v6693_v6 }
 0x64d   :  { %2396 = vmatpush1.bf16.msra.mxu0 %v6694_v51  ;;  %2437 = vmatpush1.bf16.msra.mxu1 %v5378_v3 }
 0x64e   :  { %2397 = vmatprep.subr.bf16.mxu0 %v5381_v11  ;;  %2438 = vmatprep.subr.bf16.mxu1 %v5384_v17 }
 0x651   :  { %2398 = vmatpush1.bf16.msra.mxu0 %v5387_v28  ;;  %2439 = vmatpush1.bf16.msra.mxu1 %v5390_v21 }
 0x652   :  { %2500 = vmatprep.subr.bf16.mxu0 %v5517_v29  ;;  %2541 = vmatprep.subr.bf16.mxu1 %v5520_v16 }
 0x654   :  { %2416 = vmatmul.mubr.bf16.vlgmr.msra.gmra.mxu0 %v2382_v12  ;;  %2457 = vmatmul.mubr.bf16.vlgmr.msra.gmra.mxu1 %v2382_v12  ;;  %v5546_v12 = vld [vmem:[#allocation4 + $0xac] ss:$16 sps:$4 sm:$0xff]  }
 0x655   :  { %2501 = vmatpush1.bf16.msra.mxu0 %v5523_v50  ;;  %2542 = vmatpush1.bf16.msra.mxu1 %v5526_v63  ;;  %6700 = vst [vmem:[#allocation80_spill] sm:$0xff] %v5546_v12 }
 0x656   :  { %2502 = vmatprep.subr.bf16.mxu0 %v5529_v43  ;;  %2543 = vmatprep.subr.bf16.mxu1 %v5532_v20  ;;  %v5549_v20 = vld [vmem:[#allocation4 + $0xa0] ss:$16 sps:$4 sm:$0xff]   ;;  %v5552_v43 = vld [vmem:[#allocation4 + $0xa8] ss:$16 sps:$4 sm:$0xff]  }
 0x657   :  { %2532 = vmatprep.mubr.bf16.mxu0 %v6465_v15  ;;  %2573 = vmatprep.mubr.bf16.mxu1 %v6465_v15  ;;  %6701 = vst [vmem:[#allocation81_spill] sm:$0xff] %v5549_v20  ;;  %6702 = vst [vmem:[#allocation82_spill] sm:$0xff] %v5552_v43 }
 0x659   :  { %2503 = vmatpush1.bf16.msra.mxu0 %v5537_v5  ;;  %2544 = vmatpush1.bf16.msra.mxu1 %v5540_v7  ;;  %v5555_v5 = vld [vmem:[#allocation4 + $0x84] ss:$16 sps:$4 sm:$0xff]   ;;  %v5558_v7 = vld [vmem:[#allocation4 + $0x8c] ss:$16 sps:$4 sm:$0xff]  }
 0x65a   :  { %2504 = vmatprep.subr.bf16.mxu0 %v5543_v62  ;;  %2545 = vmatprep.subr.bf16.mxu1 %v5546_v12  ;;  %6703 = vst [vmem:[#allocation47_spill] sm:$0xff] %v5555_v5  ;;  %6704 = vst [vmem:[#allocation49_spill] sm:$0xff] %v5558_v7  ;;  %v5561_v62 = vld [vmem:[#allocation4 + $0x80] ss:$16 sps:$4 sm:$0xff]   ;;  %v5564_v12 = vld [vmem:[#allocation4 + $0x88] ss:$16 sps:$4 sm:$0xff]  }
 0x65b   :  { %6705 = vst [vmem:[#allocation48_spill] sm:$0xff] %v5561_v62  ;;  %6706 = vst [vmem:[#allocation50_spill] sm:$0xff] %v5564_v12 }
 0x65d   :  { %2505 = vmatpush1.bf16.msra.mxu0 %v5549_v20  ;;  %2546 = vmatpush1.bf16.msra.mxu1 %v5552_v43  ;;  %v5567_v20 = vld [vmem:[#allocation4 + $0x64] ss:$16 sps:$4 sm:$0xff]   ;;  %v5570_v43 = vld [vmem:[#allocation4 + $0x6c] ss:$16 sps:$4 sm:$0xff]  }
 0x65e   :  { %2506 = vmatprep.subr.bf16.mxu0 %v5555_v5  ;;  %2547 = vmatprep.subr.bf16.mxu1 %v5558_v7  ;;  %6707 = vst [vmem:[#allocation19_spill] sm:$0xff] %v5567_v20  ;;  %6708 = vst [vmem:[#allocation20_spill] sm:$0xff] %v5570_v43  ;;  %v5573_v5 = vld [vmem:[#allocation4 + $0x60] ss:$16 sps:$4 sm:$0xff]   ;;  %v5576_v7 = vld [vmem:[#allocation4 + $0x68] ss:$16 sps:$4 sm:$0xff]  }
 0x65f   :  { %6709 = vst [vmem:[#allocation21_spill] sm:$0xff] %v5573_v5  ;;  %6710 = vst [vmem:[#allocation22_spill] sm:$0xff] %v5576_v7 }
 0x661   :  { %2507 = vmatpush1.bf16.msra.mxu0 %v5561_v62  ;;  %2548 = vmatpush1.bf16.msra.mxu1 %v5564_v12  ;;  %v5579_v62 = vld [vmem:[#allocation4 + $0x44] ss:$16 sps:$4 sm:$0xff]   ;;  %v5582_v12 = vld [vmem:[#allocation4 + $0x4c] ss:$16 sps:$4 sm:$0xff]  }
 0x662   :  { %2508 = vmatprep.subr.bf16.mxu0 %v5567_v20  ;;  %2549 = vmatprep.subr.bf16.mxu1 %v5570_v43  ;;  %6711 = vst [vmem:[#allocation23_spill] sm:$0xff] %v5579_v62  ;;  %6712 = vst [vmem:[#allocation24_spill] sm:$0xff] %v5582_v12  ;;  %v5585_v20 = vld [vmem:[#allocation4 + $0x40] ss:$16 sps:$4 sm:$0xff]   ;;  %v5588_v43 = vld [vmem:[#allocation4 + $0x48] ss:$16 sps:$4 sm:$0xff]  }
 0x663   :  { %6713 = vst [vmem:[#allocation25_spill] sm:$0xff] %v5585_v20  ;;  %6714 = vst [vmem:[#allocation26_spill] sm:$0xff] %v5588_v43 }
 0x665   :  { %2509 = vmatpush1.bf16.msra.mxu0 %v5573_v5  ;;  %2550 = vmatpush1.bf16.msra.mxu1 %v5576_v7  ;;  %v5591_v5 = vld [vmem:[#allocation4 + $0x24] ss:$16 sps:$4 sm:$0xff]   ;;  %v5594_v7 = vld [vmem:[#allocation4 + $0x2c] ss:$16 sps:$4 sm:$0xff]  }
 0x666   :  { %2510 = vmatprep.subr.bf16.mxu0 %v5579_v62  ;;  %2551 = vmatprep.subr.bf16.mxu1 %v5582_v12  ;;  %6715 = vst [vmem:[#allocation27_spill] sm:$0xff] %v5591_v5  ;;  %6716 = vst [vmem:[#allocation28_spill] sm:$0xff] %v5594_v7  ;;  %v5597_v62 = vld [vmem:[#allocation4 + $0x20] ss:$16 sps:$4 sm:$0xff]   ;;  %v5600_v12 = vld [vmem:[#allocation4 + $0x28] ss:$16 sps:$4 sm:$0xff]  }
 0x669   :  { %2511 = vmatpush1.bf16.msra.mxu0 %v5585_v20  ;;  %2552 = vmatpush1.bf16.msra.mxu1 %v5588_v43  ;;  %v5603_v20 = vld [vmem:[#allocation4 + $0x4] ss:$16 sps:$4 sm:$0xff]   ;;  %v5606_v43 = vld [vmem:[#allocation4 + $0xc] ss:$16 sps:$4 sm:$0xff]  }
 0x66a   :  { %2512 = vmatprep.subr.bf16.mxu0 %v5591_v5  ;;  %2553 = vmatprep.subr.bf16.mxu1 %v5594_v7  ;;  %6717 = vst [vmem:[#allocation29_spill] sm:$0xff] %v5603_v20  ;;  %6718 = vst [vmem:[#allocation30_spill] sm:$0xff] %v5606_v43  ;;  %v5609_v5 = vld [vmem:[#allocation4] ss:$16 sps:$4 sm:$0xff]   ;;  %v5612_v7 = vld [vmem:[#allocation4 + $0x8] ss:$16 sps:$4 sm:$0xff]  }
 0x66b   :  { %6719 = vst [vmem:[#allocation31_spill] sm:$0xff] %v5609_v5  ;;  %6720 = vst [vmem:[#allocation32_spill] sm:$0xff] %v5612_v7 }
 0x66d   :  { %2513 = vmatpush1.bf16.msra.mxu0 %v5597_v62  ;;  %2554 = vmatpush1.bf16.msra.mxu1 %v5600_v12 }
 0x66e   :  { %2514 = vmatprep.subr.bf16.mxu0 %v5603_v20  ;;  %2555 = vmatprep.subr.bf16.mxu1 %v5606_v43 }
 0x671   :  { %2515 = vmatpush1.bf16.msra.mxu0 %v5609_v5  ;;  %2556 = vmatpush1.bf16.msra.mxu1 %v5612_v7 }
 0x672   :  { %2611 = vmatprep.subr.bf16.mxu0 %v5175_v46  ;;  %2652 = vmatprep.subr.bf16.mxu1 %v5178_v47  ;;  %v6721_v46 = vld [vmem:[#allocation33_spill] sm:$0xff]  ;;  %v6722_v47 = vld [vmem:[#allocation34_spill] sm:$0xff] }
 0x674   :  { %2533 = vmatmul.mubr.bf16.vlgmr.msra.gmra.mxu0 %v5480_v34  ;;  %2574 = vmatmul.mubr.bf16.vlgmr.msra.gmra.mxu1 %v5480_v34 }
 0x675   :  { %2612 = vmatpush1.bf16.msra.mxu0 %v5183_v27  ;;  %2653 = vmatpush1.bf16.msra.mxu1 %v5186_v18  ;;  %v6723_v27 = vld [vmem:[#allocation35_spill] sm:$0xff]  ;;  %v6724_v18 = vld [vmem:[#allocation36_spill] sm:$0xff] }
 0x676   :  { %2613 = vmatprep.subr.bf16.mxu0 %v6647_v36  ;;  %2654 = vmatprep.subr.bf16.mxu1 %v6648_v32  ;;  %v6725_v36 = vld [vmem:[#allocation37_spill] sm:$0xff] }
 0x677   :  { %2643 = vmatprep.mubr.bf16.mxu0 %v6465_v15  ;;  %2684 = vmatprep.mubr.bf16.mxu1 %v6465_v15  ;;  %v6726_v32 = vld [vmem:[#allocation13_spill] sm:$0xff] }
 0x679   :  { %2614 = vmatpush1.bf16.msra.mxu0 %v6649_v30  ;;  %2655 = vmatpush1.bf16.msra.mxu1 %v6650_v31  ;;  %v6727_v30 = vld [vmem:[#allocation43_spill] sm:$0xff]  ;;  %v6728_v31 = vld [vmem:[#allocation45_spill] sm:$0xff] }
 0x67a   :  { %2615 = vmatprep.subr.bf16.mxu0 %v6651_v26  ;;  %2656 = vmatprep.subr.bf16.mxu1 %v6652_v41  ;;  %v6729_v26 = vld [vmem:[#allocation44_spill] sm:$0xff]  ;;  %v6730_v41 = vld [vmem:[#allocation46_spill] sm:$0xff] }
 0x67d   :  { %2616 = vmatpush1.bf16.msra.mxu0 %v6653_v57  ;;  %2657 = vmatpush1.bf16.msra.mxu1 %v6654_v58  ;;  %v6731_v57 = vld [vmem:[#allocation14_spill] sm:$0xff]  ;;  %v6732_v58 = vld [vmem:[#allocation15_spill] sm:$0xff] }
 0x67e   :  { %2617 = vmatprep.subr.bf16.mxu0 %v6655_v54  ;;  %2658 = vmatprep.subr.bf16.mxu1 %v6656_v2  ;;  %v6733_v54 = vld [vmem:[#allocation16_spill] sm:$0xff]  ;;  %v6734_v2 = vld [vmem:[#allocation17_spill] sm:$0xff] }
 0x681   :  { %2618 = vmatpush1.bf16.msra.mxu0 %v6657_v60  ;;  %2659 = vmatpush1.bf16.msra.mxu1 %v6658_v4  ;;  %v6735_v60 = vld [vmem:[#allocation18_spill] sm:$0xff] }
 0x682   :  { %2619 = vmatprep.subr.bf16.mxu0 %v6659_v56  ;;  %2660 = vmatprep.subr.bf16.mxu1 %v6660_v49  ;;  %v6736_v4 = vld [vmem:[#allocation38_spill] sm:$0xff] }
 0x685   :  { %2620 = vmatpush1.bf16.msra.mxu0 %v6721_v46  ;;  %2661 = vmatpush1.bf16.msra.mxu1 %v6722_v47 }
 0x686   :  { %2621 = vmatprep.subr.bf16.mxu0 %v6723_v27  ;;  %2662 = vmatprep.subr.bf16.mxu1 %v6724_v18 }
 0x689   :  { %2622 = vmatpush1.bf16.msra.mxu0 %v6725_v36  ;;  %2663 = vmatpush1.bf16.msra.mxu1 %v6726_v32  ;;  %v6737_v32 = vld [vmem:[#allocation11_spill] sm:$0xff] }
 0x68a   :  { %2623 = vmatprep.subr.bf16.mxu0 %v6727_v30  ;;  %2664 = vmatprep.subr.bf16.mxu1 %v6728_v31  ;;  %v6738_v31 = vld [vmem:[#allocation12_spill] sm:$0xff] }
 0x68d   :  { %2624 = vmatpush1.bf16.msra.mxu0 %v6729_v26  ;;  %2665 = vmatpush1.bf16.msra.mxu1 %v6730_v41 }
 0x68e   :  { %2625 = vmatprep.subr.bf16.mxu0 %v6731_v57  ;;  %2666 = vmatprep.subr.bf16.mxu1 %v6732_v58 }
 0x691   :  { %2626 = vmatpush1.bf16.msra.mxu0 %v6733_v54  ;;  %2667 = vmatpush1.bf16.msra.mxu1 %v6734_v2 }
 0x692   :  { %2694 = vmatprep.subr.bf16.mxu0 %v6735_v60  ;;  %2735 = vmatprep.subr.bf16.mxu1 %v6736_v4 }
 0x6f4   :  { %v2334_v56 = vpop.f32.mrf.mxu0  ;;  %v2375_v49 = vpop.f32.mrf.mxu1 }
 0x6f5   :  { %v2335_v30 = vadd.f32 %v2334_v56, %v6737_v32  ;;  %v2376_v26 = vadd.f32 %v2375_v49, %v6738_v31 }
 0x6f6   :  { %v2336_v34 = vpop.f32.mrf.mxu0  ;;  %v2377_v46 = vpop.f32.mrf.mxu1 }
 0x6f7   :  { %v2337_v58 = vadd.f32 %v2336_v34, %v4896_v25  ;;  %v2378_v54 = vadd.f32 %v2377_v46, %v6568_v35 }
 0x6f8   :  { %v2338_v47 = vpop.f32.mrf.mxu0  ;;  %v2379_v27 = vpop.f32.mrf.mxu1 }
 0x6fa   :  { %v2339_v18 = vpop.f32.mrf.mxu0  ;;  %v2380_v36 = vpop.f32.mrf.mxu1 }
 0x714   :  { %v2417_v41 = vpop.f32.mrf.mxu0  ;;  %v2458_v57 = vpop.f32.mrf.mxu1 }
 0x715   :  { %v2465_v2 = vadd.f32 %v2417_v41, %v2335_v30  ;;  %v2467_v60 = vadd.f32 %v2458_v57, %v2376_v26  ;;  %v6739_v41 = vld [vmem:[#allocation55_spill] sm:$0xff] }
 0x716   :  { %v2419_v4 = vpop.f32.mrf.mxu0  ;;  %v2460_v7 = vpop.f32.mrf.mxu1 }
 0x717   :  { %v3598_v5 = vmul.f32 -1.442695, %v2465_v2  ;;  %v2466_v43 = vadd.f32 %v2419_v4, %v2337_v58  ;;  %v2468_v47 = vadd.f32 %v2460_v7, %v2378_v54  ;;  %v6740_v2 = vld [vmem:[#allocation57_spill] sm:$0xff] }
 0x718   :  { %v2421_v27 = vpop.f32.mrf.mxu0  ;;  %v2462_v18 = vpop.f32.mrf.mxu1 }
 0x719   :  { %3925 = vpow2.f32 %v3598_v5  ;;  %v3599_v36 = vmul.f32 -1.442695, %v2466_v43 }
 0x71a   :  { %v2422_v56 = vpop.f32.mrf.mxu0  ;;  %v2463_v32 = vpop.f32.mrf.mxu1 }
 0x71b   :  { %3927 = vpow2.f32 %v3599_v36 }
 0x71c   :  { %3929 = vtanh.f32 %v2468_v47 }
 0x726   :  { %v3926_v49 = vpop.eup %3925 }
 0x727   :  { %v2478_v31 = vadd.f32 1.0, %v3926_v49  ;;  %v6741_v49 = vld [vmem:[#allocation56_spill] sm:$0xff] }
 0x728   :  { %v3928_v20 = vpop.eup %3927 }
 0x729   :  { %3931 = vrcp.f32 %v2478_v31  ;;  %v2479_v34 = vadd.f32 1.0, %v3928_v20  ;;  %v3930_v26 = vpop.eup %3929 }
 0x72b   :  { %3933 = vrcp.f32 %v2479_v34 }
 0x734   :  { %v2534_v46 = vpop.f32.mrf.mxu0  ;;  %v2575_v30 = vpop.f32.mrf.mxu1 }
 0x735   :  { %v2582_v57 = vadd.f32 %v2534_v46, %v6739_v41  ;;  %v2584_v34 = vadd.f32 %v2575_v30, %v6741_v49  ;;  %v6742_v41 = vld [vmem:[#allocation58_spill] sm:$0xff]  ;;  %v5739_v49 = vld [vmem:[#allocation6 + $0xe4] ss:$16 sps:$4 sm:$0xff]  }
 0x736   :  { %v3932_v7 = vpop.eup %3931  ;;  %v2536_v58 = vpop.f32.mrf.mxu0 }
 0x737   :  { %v2577_v54 = vpop.f32.mrf.mxu1  ;;  %v2489_v5 = vmul.f32 %v3932_v7, %v3930_v26  ;;  %v3601_v43 = vmul.f32 -1.442695, %v2582_v57  ;;  %v2583_v32 = vadd.f32 %v2536_v58, %v6740_v2  ;;  %v3603_v46 = vmul.f32 -1.442695, %v2584_v34  ;;  %v5742_v34 = vld [vmem:[#allocation6 + $0xec] ss:$16 sps:$4 sm:$0xff]  }
 0x738   :  { %v3934_v4 = vpop.eup %3933  ;;  %v2538_v27 = vpop.f32.mrf.mxu0  ;;  %v2585_v26 = vadd.f32 %v2577_v54, %v6742_v41  ;;  %v3600_v54 = vmul.f32 -1.442695, %v2467_v60  ;;  %v6768_v60 = vld [vmem:[#allocation32_spill] sm:$0xff] }
 0x739   :  { %v2579_v18 = vpop.f32.mrf.mxu1  ;;  %v2488_v47 = vmul.f32 %v3934_v4, %v5472_v19  ;;  %3935 = vpow2.f32 %v3601_v43  ;;  %v3602_v20 = vmul.f32 -1.442695, %v2583_v32  ;;  %v5750_v41 = vld [vmem:[#allocation6 + $0xe8] ss:$16 sps:$4 sm:$0xff]  }
 0x73a   :  { %v2539_v31 = vpop.f32.mrf.mxu0 }
 0x73b   :  { %v2580_v36 = vpop.f32.mrf.mxu1  ;;  %v5660_v56 = vadd.f32 %v2489_v5, %v2488_v47  ;;  %3937 = vpow2.f32 %v3602_v20 }
 0x73c   :  { %3939 = vpow2.f32 %v3603_v46  ;;  %v5747_v46 = vld [vmem:[#allocation6 + $0xe0] ss:$16 sps:$4 sm:$0xff]  }
 0x73d   :  { %3941 = vtanh.f32 %v2585_v26  ;;  %v5753_v26 = vld [vmem:[#allocation6 + $0xc4] ss:$16 sps:$4 sm:$0xff]  }
 0x73e   :  { %6769 = vst [vmem:[#allocation51_spill] sm:$0xff] %v5753_v26 }
 0x746   :  { %v3936_v57 = vpop.eup %3935 }
 0x747   :  { %v2595_v7 = vadd.f32 1.0, %v3936_v57  ;;  %v5756_v57 = vld [vmem:[#allocation6 + $0xcc] ss:$16 sps:$4 sm:$0xff]  }
 0x748   :  { %v3938_v58 = vpop.eup %3937  ;;  %6770 = vst [vmem:[#allocation53_spill] sm:$0xff] %v5756_v57 }
 0x749   :  { %3943 = vrcp.f32 %v2595_v7  ;;  %v2596_v2 = vadd.f32 1.0, %v3938_v58  ;;  %v3940_v19 = vpop.eup %3939  ;;  %v5761_v7 = vld [vmem:[#allocation6 + $0xc0] ss:$16 sps:$4 sm:$0xff]   ;;  %v5764_v58 = vld [vmem:[#allocation6 + $0xc8] ss:$16 sps:$4 sm:$0xff]  }
 0x74a   :  { %v3942_v43 = vpop.eup %3941  ;;  %v2597_v27 = vadd.f32 1.0, %v3940_v19  ;;  %6771 = vst [vmem:[#allocation52_spill] sm:$0xff] %v5761_v7  ;;  %6772 = vst [vmem:[#allocation54_spill] sm:$0xff] %v5764_v58  ;;  %v5770_v19 = vld [vmem:[#allocation6 + $0xac] ss:$16 sps:$4 sm:$0xff]  }
 0x74b   :  { %3945 = vrcp.f32 %v2596_v2  ;;  %v5767_v2 = vld [vmem:[#allocation6 + $0xa4] ss:$16 sps:$4 sm:$0xff]   ;;  %6774 = vst [vmem:[#allocation41_spill] sm:$0xff] %v5770_v19 }
 0x74c   :  { %3947 = vrcp.f32 %v2597_v27  ;;  %6773 = vst [vmem:[#allocation39_spill] sm:$0xff] %v5767_v2  ;;  %v5785_v27 = vld [vmem:[#allocation6 + $0x80] ss:$16 sps:$4 sm:$0xff]  }
 0x74d   :  { %6779 = vst [vmem:[#allocation69_spill] sm:$0xff] %v5785_v27 }
 0x756   :  { %v3944_v32 = vpop.eup %3943 }
 0x757   :  { %v2606_v4 = vmul.f32 %v3944_v32, %v3942_v43  ;;  %v5773_v43 = vld [vmem:[#allocation6 + $0xa0] ss:$16 sps:$4 sm:$0xff]   ;;  %v5776_v32 = vld [vmem:[#allocation6 + $0xa8] ss:$16 sps:$4 sm:$0xff]  }
 0x758   :  { %v3946_v5 = vpop.eup %3945  ;;  %6775 = vst [vmem:[#allocation40_spill] sm:$0xff] %v5773_v43  ;;  %6776 = vst [vmem:[#allocation42_spill] sm:$0xff] %v5776_v32 }
 0x759   :  { %v2605_v18 = vmul.f32 %v3946_v5, %v5477_v38  ;;  %v3948_v47 = vpop.eup %3947  ;;  %v5782_v5 = vld [vmem:[#allocation6 + $0x8c] ss:$16 sps:$4 sm:$0xff]  }
 0x75a   :  { %6778 = vst [vmem:[#allocation68_spill] sm:$0xff] %v5782_v5 }
 0x75b   :  { %v5665_v30 = vadd.f32 %v2606_v4, %v2605_v18  ;;  %v5779_v4 = vld [vmem:[#allocation6 + $0x84] ss:$16 sps:$4 sm:$0xff]   ;;  %v5788_v18 = vld [vmem:[#allocation6 + $0x88] ss:$16 sps:$4 sm:$0xff]  }
 0x75c   :  { %6777 = vst [vmem:[#allocation67_spill] sm:$0xff] %v5779_v4  ;;  %6780 = vst [vmem:[#allocation70_spill] sm:$0xff] %v5788_v18 }
 0x75d   :  { %3949 = vtanh.f32 %v5665_v30 }
 0x75e   :  { %3951 = vpow2.f32 %v3600_v54  ;;  %v5791_v54 = vld [vmem:[#allocation6 + $0x64] ss:$16 sps:$4 sm:$0xff]  }
 0x75f   :  { %3953 = vtanh.f32 %v5660_v56  ;;  %6781 = vst [vmem:[#allocation71_spill] sm:$0xff] %v5791_v54 }
 0x76a   :  { %v3950_v20 = vpop.eup %3949 }
 0x76b   :  { %v2609_v31 = vmul.f32 %v3950_v20, %v3948_v47  ;;  %v3952_v38 = vpop.eup %3951  ;;  %v5794_v47 = vld [vmem:[#allocation6 + $0x6c] ss:$16 sps:$4 sm:$0xff]   ;;  %v5797_v20 = vld [vmem:[#allocation6 + $0x60] ss:$16 sps:$4 sm:$0xff]  }
 0x76c   :  { %6782 = vst [vmem:[#allocation72_spill] sm:$0xff] %v5794_v47  ;;  %6783 = vst [vmem:[#allocation73_spill] sm:$0xff] %v5797_v20 }
 0x76d   :  { %v5668_v36 = vpack.c.bf16 %v2609_v31, %v2609_v31  ;;  %v5800_v31 = vld [vmem:[#allocation6 + $0x68] ss:$16 sps:$4 sm:$0xff]  }
 0x76e   :  { %6784 = vst [vmem:[#allocation74_spill] sm:$0xff] %v5800_v31 }
 0x76f   :  { %2644 = vmatmul.mubr.bf16.vlgmr.msra.gmra.mxu0 %v5668_v36  ;;  %2685 = vmatmul.mubr.bf16.vlgmr.msra.gmra.mxu1 %v5668_v36 }
 0x770   :  { %2695 = vmatpush1.bf16.msra.mxu0 %v5300_v10  ;;  %2736 = vmatpush1.bf16.msra.mxu1 %v5303_v48  ;;  %v2480_v10 = vadd.f32 1.0, %v3952_v38  ;;  %v3954_v48 = vpop.eup %3953  ;;  %v5806_v38 = vld [vmem:[#allocation6 + $0x4c] ss:$16 sps:$4 sm:$0xff]  }
 0x771   :  { %2696 = vmatprep.subr.bf16.mxu0 %v5306_v13  ;;  %2737 = vmatprep.subr.bf16.mxu1 %v5309_v24  ;;  %6786 = vst [vmem:[#allocation34_spill] sm:$0xff] %v5806_v38 }
 0x772   :  { %2726 = vmatprep.mubr.bf16.mxu0 %v6465_v15  ;;  %2767 = vmatprep.mubr.bf16.mxu1 %v6465_v15  ;;  %3955 = vrcp.f32 %v2480_v10  ;;  %v5809_v10 = vld [vmem:[#allocation6 + $0x40] ss:$16 sps:$4 sm:$0xff]  }
 0x773   :  { %6787 = vst [vmem:[#allocation35_spill] sm:$0xff] %v5809_v10 }
 0x774   :  { %2697 = vmatpush1.bf16.msra.mxu0 %v5314_v37  ;;  %2738 = vmatpush1.bf16.msra.mxu1 %v5317_v8  ;;  %v6743_v8 = vld [vmem:[#allocation75_spill] sm:$0xff] }
 0x775   :  { %2698 = vmatprep.subr.bf16.mxu0 %v5320_v42  ;;  %2739 = vmatprep.subr.bf16.mxu1 %v5323_v14  ;;  %v6744_v42 = vld [vmem:[#allocation76_spill] sm:$0xff]  ;;  %v6745_v14 = vld [vmem:[#allocation77_spill] sm:$0xff] }
 0x778   :  { %2699 = vmatpush1.bf16.msra.mxu0 %v5326_v0  ;;  %2740 = vmatpush1.bf16.msra.mxu1 %v5329_v45  ;;  %v6746_v0 = vld [vmem:[#allocation78_spill] sm:$0xff]  ;;  %v6747_v45 = vld [vmem:[#allocation79_spill] sm:$0xff] }
 0x779   :  { %2700 = vmatprep.subr.bf16.mxu0 %v5333_v22  ;;  %2741 = vmatprep.subr.bf16.mxu1 %v5336_v9  ;;  %v6748_v22 = vld [vmem:[#allocation80_spill] sm:$0xff]  ;;  %v6749_v9 = vld [vmem:[#allocation81_spill] sm:$0xff] }
 0x77c   :  { %2701 = vmatpush1.bf16.msra.mxu0 %v5339_v59  ;;  %2742 = vmatpush1.bf16.msra.mxu1 %v6683_v44  ;;  %v6750_v59 = vld [vmem:[#allocation82_spill] sm:$0xff]  ;;  %v6756_v44 = vld [vmem:[#allocation20_spill] sm:$0xff] }
 0x77d   :  { %2702 = vmatprep.subr.bf16.mxu0 %v6684_v33  ;;  %2743 = vmatprep.subr.bf16.mxu1 %v6685_v61  ;;  %v6757_v33 = vld [vmem:[#allocation21_spill] sm:$0xff]  ;;  %v6758_v61 = vld [vmem:[#allocation22_spill] sm:$0xff] }
 0x77f   :  { %v3956_v13 = vpop.eup %3955 }
 0x780   :  { %2703 = vmatpush1.bf16.msra.mxu0 %v6686_v52  ;;  %2744 = vmatpush1.bf16.msra.mxu1 %v6687_v39  ;;  %v2492_v24 = vmul.f32 %v3956_v13, %v3954_v48  ;;  %v6759_v52 = vld [vmem:[#allocation23_spill] sm:$0xff]  ;;  %v6760_v39 = vld [vmem:[#allocation24_spill] sm:$0xff] }
 0x781   :  { %2704 = vmatprep.subr.bf16.mxu0 %v6688_v1  ;;  %2745 = vmatprep.subr.bf16.mxu1 %v6689_v55  ;;  %v6761_v1 = vld [vmem:[#allocation25_spill] sm:$0xff]  ;;  %v6762_v55 = vld [vmem:[#allocation26_spill] sm:$0xff] }
 0x782   :  { %v2693_v37 = vpack.c.bf16 %v2492_v24, %v2492_v24  ;;  %v5812_v48 = vld [vmem:[#allocation6 + $0x48] ss:$16 sps:$4 sm:$0xff]   ;;  %v5815_v13 = vld [vmem:[#allocation6 + $0x24] ss:$16 sps:$4 sm:$0xff]   ;;  %v5818_v24 = vld [vmem:[#allocation6 + $0x2c] ss:$16 sps:$4 sm:$0xff]  }
 0x783   :  { %6788 = vst [vmem:[#allocation36_spill] sm:$0xff] %v5812_v48  ;;  %6789 = vst [vmem:[#allocation37_spill] sm:$0xff] %v5815_v13 }
 0x784   :  { %2705 = vmatpush1.bf16.msra.mxu0 %v6690_v23  ;;  %2746 = vmatpush1.bf16.msra.mxu1 %v6691_v40  ;;  %v6763_v23 = vld [vmem:[#allocation27_spill] sm:$0xff]  ;;  %v6764_v40 = vld [vmem:[#allocation28_spill] sm:$0xff]  ;;  %6790 = vst [vmem:[#allocation13_spill] sm:$0xff] %v5818_v24 }
 0x785   :  { %2706 = vmatprep.subr.bf16.mxu0 %v6692_v53  ;;  %2747 = vmatprep.subr.bf16.mxu1 %v6693_v6  ;;  %v6765_v53 = vld [vmem:[#allocation29_spill] sm:$0xff]  ;;  %v6766_v6 = vld [vmem:[#allocation30_spill] sm:$0xff] }
 0x788   :  { %2707 = vmatpush1.bf16.msra.mxu0 %v6694_v51  ;;  %2748 = vmatpush1.bf16.msra.mxu1 %v5378_v3  ;;  %v6753_v3 = vld [vmem:[#allocation48_spill] sm:$0xff]  ;;  %v6767_v51 = vld [vmem:[#allocation31_spill] sm:$0xff] }
 0x789   :  { %2708 = vmatprep.subr.bf16.mxu0 %v5381_v11  ;;  %2749 = vmatprep.subr.bf16.mxu1 %v5384_v17  ;;  %v6754_v11 = vld [vmem:[#allocation50_spill] sm:$0xff]  ;;  %v6755_v17 = vld [vmem:[#allocation19_spill] sm:$0xff] }
 0x78c   :  { %2709 = vmatpush1.bf16.msra.mxu0 %v5387_v28  ;;  %2750 = vmatpush1.bf16.msra.mxu1 %v5390_v21  ;;  %v6751_v21 = vld [vmem:[#allocation47_spill] sm:$0xff]  ;;  %v6752_v28 = vld [vmem:[#allocation49_spill] sm:$0xff] }
 0x78d   :  { %2811 = vmatprep.subr.bf16.mxu0 %v5517_v29  ;;  %2852 = vmatprep.subr.bf16.mxu1 %v5520_v16 }
 0x78f   :  { %2727 = vmatmul.mubr.bf16.vlgmr.msra.gmra.mxu0 %v2693_v37  ;;  %2768 = vmatmul.mubr.bf16.vlgmr.msra.gmra.mxu1 %v2693_v37  ;;  %v5821_v37 = vld [vmem:[#allocation6 + $0x20] ss:$16 sps:$4 sm:$0xff]  }
 0x790   :  { %2812 = vmatpush1.bf16.msra.mxu0 %v5523_v50  ;;  %2853 = vmatpush1.bf16.msra.mxu1 %v5526_v63  ;;  %6791 = vst [vmem:[#allocation43_spill] sm:$0xff] %v5821_v37 }
 0x791   :  { %2813 = vmatprep.subr.bf16.mxu0 %v6743_v8  ;;  %2854 = vmatprep.subr.bf16.mxu1 %v6744_v42 }
 0x792   :  { %2843 = vmatprep.mubr.bf16.mxu0 %v6465_v15  ;;  %2884 = vmatprep.mubr.bf16.mxu1 %v6465_v15 }
 0x794   :  { %2814 = vmatpush1.bf16.msra.mxu0 %v6745_v14  ;;  %2855 = vmatpush1.bf16.msra.mxu1 %v6746_v0 }
 0x795   :  { %2815 = vmatprep.subr.bf16.mxu0 %v6747_v45  ;;  %2856 = vmatprep.subr.bf16.mxu1 %v6748_v22 }
 0x798   :  { %2816 = vmatpush1.bf16.msra.mxu0 %v6749_v9  ;;  %2857 = vmatpush1.bf16.msra.mxu1 %v6750_v59 }
 0x799   :  { %2817 = vmatprep.subr.bf16.mxu0 %v6751_v21  ;;  %2858 = vmatprep.subr.bf16.mxu1 %v6752_v28 }
 0x79c   :  { %2818 = vmatpush1.bf16.msra.mxu0 %v6753_v3  ;;  %2859 = vmatpush1.bf16.msra.mxu1 %v6754_v11 }
 0x79d   :  { %2819 = vmatprep.subr.bf16.mxu0 %v6755_v17  ;;  %2860 = vmatprep.subr.bf16.mxu1 %v6756_v44 }
 0x7a0   :  { %2820 = vmatpush1.bf16.msra.mxu0 %v6757_v33  ;;  %2861 = vmatpush1.bf16.msra.mxu1 %v6758_v61 }
 0x7a1   :  { %2821 = vmatprep.subr.bf16.mxu0 %v6759_v52  ;;  %2862 = vmatprep.subr.bf16.mxu1 %v6760_v39 }
 0x7a4   :  { %2822 = vmatpush1.bf16.msra.mxu0 %v6761_v1  ;;  %2863 = vmatpush1.bf16.msra.mxu1 %v6762_v55 }
 0x7a5   :  { %2823 = vmatprep.subr.bf16.mxu0 %v6763_v23  ;;  %2864 = vmatprep.subr.bf16.mxu1 %v6764_v40 }
 0x7a8   :  { %2824 = vmatpush1.bf16.msra.mxu0 %v5597_v62  ;;  %2865 = vmatpush1.bf16.msra.mxu1 %v5600_v12 }
 0x7a9   :  { %2825 = vmatprep.subr.bf16.mxu0 %v6765_v53  ;;  %2866 = vmatprep.subr.bf16.mxu1 %v6766_v6 }
 0x7ac   :  { %2826 = vmatpush1.bf16.msra.mxu0 %v6767_v51  ;;  %2867 = vmatpush1.bf16.msra.mxu1 %v6768_v60 }
 0x7ad   :  { %2922 = vmatprep.subr.bf16.mxu0 %v5739_v49  ;;  %2963 = vmatprep.subr.bf16.mxu1 %v5742_v34 }
 0x7af   :  { %2844 = vmatmul.mubr.bf16.vlgmr.msra.gmra.mxu0 %v5668_v36  ;;  %2885 = vmatmul.mubr.bf16.vlgmr.msra.gmra.mxu1 %v5668_v36  ;;  %v5803_v36 = vld [vmem:[#allocation6 + $0x44] ss:$16 sps:$4 sm:$0xff]  }
 0x7b0   :  { %2923 = vmatpush1.bf16.msra.mxu0 %v5747_v46  ;;  %2964 = vmatpush1.bf16.msra.mxu1 %v5750_v41  ;;  %6785 = vst [vmem:[#allocation33_spill] sm:$0xff] %v5803_v36 }
 0x7b1   :  { %2924 = vmatprep.subr.bf16.mxu0 %v5753_v26  ;;  %2965 = vmatprep.subr.bf16.mxu1 %v5756_v57 }
 0x7b2   :  { %2954 = vmatprep.mubr.bf16.mxu0 %v6465_v15  ;;  %2995 = vmatprep.mubr.bf16.mxu1 %v6465_v15 }
 0x7b4   :  { %2925 = vmatpush1.bf16.msra.mxu0 %v5761_v7  ;;  %2966 = vmatpush1.bf16.msra.mxu1 %v5764_v58 }
 0x7b5   :  { %2926 = vmatprep.subr.bf16.mxu0 %v5767_v2  ;;  %2967 = vmatprep.subr.bf16.mxu1 %v5770_v19 }
 0x7b8   :  { %2927 = vmatpush1.bf16.msra.mxu0 %v5773_v43  ;;  %2968 = vmatpush1.bf16.msra.mxu1 %v5776_v32 }
 0x7b9   :  { %2928 = vmatprep.subr.bf16.mxu0 %v5779_v4  ;;  %2969 = vmatprep.subr.bf16.mxu1 %v5782_v5  ;;  %v6800_v5 = vld [vmem:[#allocation12_spill] sm:$0xff] }
 0x7bc   :  { %2929 = vmatpush1.bf16.msra.mxu0 %v5785_v27  ;;  %2970 = vmatpush1.bf16.msra.mxu1 %v5788_v18  ;;  %v6799_v18 = vld [vmem:[#allocation11_spill] sm:$0xff] }
 0x7bd   :  { %2930 = vmatprep.subr.bf16.mxu0 %v5791_v54  ;;  %2971 = vmatprep.subr.bf16.mxu1 %v5794_v47 }
 0x7c0   :  { %2931 = vmatpush1.bf16.msra.mxu0 %v5797_v20  ;;  %2972 = vmatpush1.bf16.msra.mxu1 %v5800_v31 }
 0x7c1   :  { %2932 = vmatprep.subr.bf16.mxu0 %v5803_v36  ;;  %2973 = vmatprep.subr.bf16.mxu1 %v5806_v38  ;;  %v5824_v38 = vld [vmem:[#allocation6 + $0x28] ss:$16 sps:$4 sm:$0xff]  }
 0x7c2   :  { %6792 = vst [vmem:[#allocation45_spill] sm:$0xff] %v5824_v38 }
 0x7c4   :  { %2933 = vmatpush1.bf16.msra.mxu0 %v5809_v10  ;;  %2974 = vmatpush1.bf16.msra.mxu1 %v5812_v48  ;;  %v5827_v10 = vld [vmem:[#allocation6 + $0x4] ss:$16 sps:$4 sm:$0xff]   ;;  %v5830_v48 = vld [vmem:[#allocation6 + $0xc] ss:$16 sps:$4 sm:$0xff]  }
 0x7c5   :  { %2934 = vmatprep.subr.bf16.mxu0 %v5815_v13  ;;  %2975 = vmatprep.subr.bf16.mxu1 %v5818_v24  ;;  %6793 = vst [vmem:[#allocation44_spill] sm:$0xff] %v5827_v10  ;;  %6794 = vst [vmem:[#allocation46_spill] sm:$0xff] %v5830_v48  ;;  %v5833_v13 = vld [vmem:[#allocation6] ss:$16 sps:$4 sm:$0xff]   ;;  %v5836_v24 = vld [vmem:[#allocation6 + $0x8] ss:$16 sps:$4 sm:$0xff]  }
 0x7c6   :  { %6795 = vst [vmem:[#allocation14_spill] sm:$0xff] %v5833_v13  ;;  %6796 = vst [vmem:[#allocation15_spill] sm:$0xff] %v5836_v24 }
 0x7c8   :  { %2935 = vmatpush1.bf16.msra.mxu0 %v5821_v37  ;;  %2976 = vmatpush1.bf16.msra.mxu1 %v5824_v38  ;;  %v5839_v37 = vld [vmem:[#allocation8 + $0xe4] ss:$16 sps:$4 sm:$0xff]   ;;  %v5842_v38 = vld [vmem:[#allocation8 + $0xec] ss:$16 sps:$4 sm:$0xff]  }
 0x7c9   :  { %2936 = vmatprep.subr.bf16.mxu0 %v5827_v10  ;;  %2977 = vmatprep.subr.bf16.mxu1 %v5830_v48  ;;  %6797 = vst [vmem:[#allocation16_spill] sm:$0xff] %v5839_v37  ;;  %6798 = vst [vmem:[#allocation17_spill] sm:$0xff] %v5842_v38 }
 0x7cc   :  { %2937 = vmatpush1.bf16.msra.mxu0 %v5833_v13  ;;  %2978 = vmatpush1.bf16.msra.mxu1 %v5836_v24 }
 0x7cd   :  { %3005 = vmatprep.subr.bf16.mxu0 %v5839_v37  ;;  %3046 = vmatprep.subr.bf16.mxu1 %v5842_v38 }
 0x82f   :  { %v2645_v10 = vpop.f32.mrf.mxu0  ;;  %v2686_v36 = vpop.f32.mrf.mxu1 }
 0x830   :  { %v2646_v27 = vadd.f32 %v2645_v10, %v6799_v18  ;;  %v2687_v24 = vadd.f32 %v2686_v36, %v6800_v5 }
 0x831   :  { %v2647_v31 = vpop.f32.mrf.mxu0  ;;  %v2688_v48 = vpop.f32.mrf.mxu1 }
 0x832   :  { %v2648_v37 = vadd.f32 %v2647_v31, %v4896_v25  ;;  %v2689_v43 = vadd.f32 %v2688_v48, %v6568_v35 }
 0x833   :  { %v2649_v20 = vpop.f32.mrf.mxu0  ;;  %v2690_v47 = vpop.f32.mrf.mxu1 }
 0x835   :  { %v2650_v54 = vpop.f32.mrf.mxu0  ;;  %v2691_v13 = vpop.f32.mrf.mxu1 }
 0x84f   :  { %v2728_v4 = vpop.f32.mrf.mxu0  ;;  %v2769_v32 = vpop.f32.mrf.mxu1 }
 0x850   :  { %v2776_v19 = vadd.f32 %v2728_v4, %v2646_v27  ;;  %v2778_v38 = vadd.f32 %v2769_v32, %v2687_v24  ;;  %v6802_v24 = vld [vmem:[#allocation61_spill] sm:$0xff] }
 0x851   :  { %v2730_v2 = vpop.f32.mrf.mxu0  ;;  %v2771_v58 = vpop.f32.mrf.mxu1 }
 0x852   :  { %v3604_v7 = vmul.f32 -1.442695, %v2776_v19  ;;  %v2777_v57 = vadd.f32 %v2730_v2, %v2648_v37  ;;  %v2779_v20 = vadd.f32 %v2771_v58, %v2689_v43  ;;  %v6801_v19 = vld [vmem:[#allocation59_spill] sm:$0xff] }
 0x853   :  { %v2732_v47 = vpop.f32.mrf.mxu0  ;;  %v2773_v54 = vpop.f32.mrf.mxu1 }
 0x854   :  { %3957 = vpow2.f32 %v3604_v7  ;;  %v3605_v13 = vmul.f32 -1.442695, %v2777_v57 }
 0x855   :  { %v2733_v10 = vpop.f32.mrf.mxu0  ;;  %v2774_v18 = vpop.f32.mrf.mxu1 }
 0x856   :  { %3959 = vpow2.f32 %v3605_v13 }
 0x857   :  { %3961 = vtanh.f32 %v2779_v20 }
 0x861   :  { %v3958_v36 = vpop.eup %3957 }
 0x862   :  { %v2789_v5 = vadd.f32 1.0, %v3958_v36  ;;  %v6803_v36 = vld [vmem:[#allocation60_spill] sm:$0xff] }
 0x863   :  { %v3960_v26 = vpop.eup %3959 }
 0x864   :  { %3963 = vrcp.f32 %v2789_v5  ;;  %v2790_v31 = vadd.f32 1.0, %v3960_v26  ;;  %v3962_v27 = vpop.eup %3961 }
 0x866   :  { %3965 = vrcp.f32 %v2790_v31 }
 0x86f   :  { %v2845_v32 = vpop.f32.mrf.mxu0  ;;  %v2886_v4 = vpop.f32.mrf.mxu1 }
 0x870   :  { %v2893_v2 = vadd.f32 %v2845_v32, %v6801_v19  ;;  %v2895_v31 = vadd.f32 %v2886_v4, %v6803_v36  ;;  %v6804_v19 = vld [vmem:[#allocation62_spill] sm:$0xff]  ;;  %v5864_v36 = vld [vmem:[#allocation8 + $0xe0] ss:$16 sps:$4 sm:$0xff]  }
 0x871   :  { %v3964_v58 = vpop.eup %3963  ;;  %v2847_v43 = vpop.f32.mrf.mxu0 }
 0x872   :  { %v2888_v48 = vpop.f32.mrf.mxu1  ;;  %v2800_v7 = vmul.f32 %v3964_v58, %v3962_v27  ;;  %v3607_v57 = vmul.f32 -1.442695, %v2893_v2  ;;  %v2894_v18 = vadd.f32 %v2847_v43, %v6802_v24  ;;  %v3609_v32 = vmul.f32 -1.442695, %v2895_v31  ;;  %v5870_v31 = vld [vmem:[#allocation8 + $0xc4] ss:$16 sps:$4 sm:$0xff]  }
 0x873   :  { %v3966_v37 = vpop.eup %3965  ;;  %v2849_v47 = vpop.f32.mrf.mxu0  ;;  %v2896_v27 = vadd.f32 %v2888_v48, %v6804_v19  ;;  %v3606_v48 = vmul.f32 -1.442695, %v2778_v38  ;;  %v5873_v38 = vld [vmem:[#allocation8 + $0xcc] ss:$16 sps:$4 sm:$0xff]   ;;  %v5878_v19 = vld [vmem:[#allocation8 + $0xc0] ss:$16 sps:$4 sm:$0xff]  }
 0x874   :  { %v2890_v54 = vpop.f32.mrf.mxu1  ;;  %v2799_v20 = vmul.f32 %v3966_v37, %v5660_v56  ;;  %3967 = vpow2.f32 %v3607_v57  ;;  %v3608_v26 = vmul.f32 -1.442695, %v2894_v18 }
 0x875   :  { %v2850_v5 = vpop.f32.mrf.mxu0 }
 0x876   :  { %v2891_v13 = vpop.f32.mrf.mxu1  ;;  %v5852_v10 = vadd.f32 %v2800_v7, %v2799_v20  ;;  %3969 = vpow2.f32 %v3608_v26 }
 0x877   :  { %3971 = vpow2.f32 %v3609_v32 }
 0x878   :  { %3973 = vtanh.f32 %v2896_v27  ;;  %v5881_v27 = vld [vmem:[#allocation8 + $0xc8] ss:$16 sps:$4 sm:$0xff]  }
 0x881   :  { %v3968_v2 = vpop.eup %3967 }
 0x882   :  { %v2906_v58 = vadd.f32 1.0, %v3968_v2  ;;  %v5884_v2 = vld [vmem:[#allocation8 + $0xa4] ss:$16 sps:$4 sm:$0xff]  }
 0x883   :  { %v3970_v43 = vpop.eup %3969 }
 0x884   :  { %3975 = vrcp.f32 %v2906_v58  ;;  %v2907_v24 = vadd.f32 1.0, %v3970_v43  ;;  %v3972_v56 = vpop.eup %3971  ;;  %v5887_v58 = vld [vmem:[#allocation8 + $0xac] ss:$16 sps:$4 sm:$0xff]  }
 0x885   :  { %v3974_v57 = vpop.eup %3973  ;;  %v2908_v47 = vadd.f32 1.0, %v3972_v56  ;;  %v5893_v56 = vld [vmem:[#allocation8 + $0xa8] ss:$16 sps:$4 sm:$0xff]  }
 0x886   :  { %3977 = vrcp.f32 %v2907_v24  ;;  %v5890_v24 = vld [vmem:[#allocation8 + $0xa0] ss:$16 sps:$4 sm:$0xff]  }
 0x887   :  { %3979 = vrcp.f32 %v2908_v47  ;;  %v5909_v47 = vld [vmem:[#allocation8 + $0x64] ss:$16 sps:$4 sm:$0xff]  }
 0x888   :  { %6806 = vst [vmem:[#allocation38_spill] sm:$0xff] %v5909_v47 }
 0x891   :  { %v3976_v18 = vpop.eup %3975 }
 0x892   :  { %v2917_v37 = vmul.f32 %v3976_v18, %v3974_v57  ;;  %v5897_v57 = vld [vmem:[#allocation8 + $0x84] ss:$16 sps:$4 sm:$0xff]   ;;  %v5900_v18 = vld [vmem:[#allocation8 + $0x8c] ss:$16 sps:$4 sm:$0xff]  }
 0x893   :  { %v3978_v7 = vpop.eup %3977 }
 0x894   :  { %v2916_v54 = vmul.f32 %v3978_v7, %v5665_v30  ;;  %v3980_v20 = vpop.eup %3979  ;;  %v5867_v30 = vld [vmem:[#allocation8 + $0xe8] ss:$16 sps:$4 sm:$0xff]  }
 0x895   :  { %v5906_v7 = vld [vmem:[#allocation8 + $0x88] ss:$16 sps:$4 sm:$0xff]  }
 0x896   :  { %v5857_v4 = vadd.f32 %v2917_v37, %v2916_v54  ;;  %v5903_v37 = vld [vmem:[#allocation8 + $0x80] ss:$16 sps:$4 sm:$0xff]   ;;  %6805 = vst [vmem:[#allocation18_spill] sm:$0xff] %v5906_v7  ;;  %v5912_v54 = vld [vmem:[#allocation8 + $0x6c] ss:$16 sps:$4 sm:$0xff]  }
 0x897   :  { %6807 = vst [vmem:[#allocation55_spill] sm:$0xff] %v5912_v54 }
 0x898   :  { %3981 = vtanh.f32 %v5857_v4 }
 0x899   :  { %3983 = vpow2.f32 %v3606_v48  ;;  %v5915_v48 = vld [vmem:[#allocation8 + $0x60] ss:$16 sps:$4 sm:$0xff]  }
 0x89a   :  { %3985 = vtanh.f32 %v5852_v10  ;;  %6808 = vst [vmem:[#allocation57_spill] sm:$0xff] %v5915_v48 }
 0x8a5   :  { %v3982_v26 = vpop.eup %3981 }
 0x8a6   :  { %v2920_v5 = vmul.f32 %v3982_v26, %v3980_v20  ;;  %v3984_v32 = vpop.eup %3983  ;;  %v5918_v20 = vld [vmem:[#allocation8 + $0x68] ss:$16 sps:$4 sm:$0xff]   ;;  %v5921_v26 = vld [vmem:[#allocation8 + $0x44] ss:$16 sps:$4 sm:$0xff]  }
 0x8a7   :  { %v2791_v43 = vadd.f32 1.0, %v3984_v32  ;;  %6809 = vst [vmem:[#allocation56_spill] sm:$0xff] %v5918_v20  ;;  %6810 = vst [vmem:[#allocation58_spill] sm:$0xff] %v5921_v26  ;;  %v5927_v32 = vld [vmem:[#allocation8 + $0x40] ss:$16 sps:$4 sm:$0xff]  }
 0x8a8   :  { %v5860_v13 = vpack.c.bf16 %v2920_v5, %v2920_v5  ;;  %v5924_v5 = vld [vmem:[#allocation8 + $0x4c] ss:$16 sps:$4 sm:$0xff]   ;;  %6812 = vst [vmem:[#allocation76_spill] sm:$0xff] %v5927_v32 }
 0x8a9   :  { %3987 = vrcp.f32 %v2791_v43  ;;  %6811 = vst [vmem:[#allocation75_spill] sm:$0xff] %v5924_v5  ;;  %v5930_v43 = vld [vmem:[#allocation8 + $0x48] ss:$16 sps:$4 sm:$0xff]  }
 0x8aa   :  { %2955 = vmatmul.mubr.bf16.vlgmr.msra.gmra.mxu0 %v5860_v13  ;;  %2996 = vmatmul.mubr.bf16.vlgmr.msra.gmra.mxu1 %v5860_v13  ;;  %6813 = vst [vmem:[#allocation77_spill] sm:$0xff] %v5930_v43 }
 0x8ab   :  { %3006 = vmatpush1.bf16.msra.mxu0 %v5864_v36  ;;  %3047 = vmatpush1.bf16.msra.mxu1 %v5867_v30 }
 0x8ac   :  { %3007 = vmatprep.subr.bf16.mxu0 %v5870_v31  ;;  %3048 = vmatprep.subr.bf16.mxu1 %v5873_v38 }
 0x8ad   :  { %3037 = vmatprep.mubr.bf16.mxu0 %v6465_v15  ;;  %3078 = vmatprep.mubr.bf16.mxu1 %v6465_v15 }
 0x8af   :  { %3008 = vmatpush1.bf16.msra.mxu0 %v5878_v19  ;;  %3049 = vmatpush1.bf16.msra.mxu1 %v5881_v27 }
 0x8b0   :  { %3009 = vmatprep.subr.bf16.mxu0 %v5884_v2  ;;  %3050 = vmatprep.subr.bf16.mxu1 %v5887_v58 }
 0x8b3   :  { %3010 = vmatpush1.bf16.msra.mxu0 %v5890_v24  ;;  %3051 = vmatpush1.bf16.msra.mxu1 %v5893_v56 }
 0x8b4   :  { %3011 = vmatprep.subr.bf16.mxu0 %v5897_v57  ;;  %3052 = vmatprep.subr.bf16.mxu1 %v5900_v18 }
 0x8b7   :  { %3012 = vmatpush1.bf16.msra.mxu0 %v5903_v37  ;;  %3053 = vmatpush1.bf16.msra.mxu1 %v5906_v7  ;;  %v5954_v7 = vld [vmem:[#allocation8 + $0x8] ss:$16 sps:$4 sm:$0xff]  }
 0x8b8   :  { %3013 = vmatprep.subr.bf16.mxu0 %v5909_v47  ;;  %3054 = vmatprep.subr.bf16.mxu1 %v5912_v54  ;;  %v5939_v47 = vld [vmem:[#allocation8 + $0x20] ss:$16 sps:$4 sm:$0xff]  }
 0x8b9   :  { %6816 = vst [vmem:[#allocation80_spill] sm:$0xff] %v5939_v47 }
 0x8bb   :  { %3014 = vmatpush1.bf16.msra.mxu0 %v5915_v48  ;;  %3055 = vmatpush1.bf16.msra.mxu1 %v5918_v20  ;;  %v5933_v48 = vld [vmem:[#allocation8 + $0x24] ss:$16 sps:$4 sm:$0xff]   ;;  %v5936_v20 = vld [vmem:[#allocation8 + $0x2c] ss:$16 sps:$4 sm:$0xff]  }
 0x8bc   :  { %3015 = vmatprep.subr.bf16.mxu0 %v5921_v26  ;;  %3056 = vmatprep.subr.bf16.mxu1 %v5924_v5  ;;  %6814 = vst [vmem:[#allocation78_spill] sm:$0xff] %v5933_v48  ;;  %6815 = vst [vmem:[#allocation79_spill] sm:$0xff] %v5936_v20  ;;  %v3986_v26 = vpop.eup %3985  ;;  %v5942_v5 = vld [vmem:[#allocation8 + $0x28] ss:$16 sps:$4 sm:$0xff]  }
 0x8bd   :  { %v3988_v54 = vpop.eup %3987 }
 0x8bf   :  { %3016 = vmatpush1.bf16.msra.mxu0 %v5927_v32  ;;  %3057 = vmatpush1.bf16.msra.mxu1 %v5930_v43  ;;  %v5945_v32 = vld [vmem:[#allocation8 + $0x4] ss:$16 sps:$4 sm:$0xff]   ;;  %v5948_v43 = vld [vmem:[#allocation8 + $0xc] ss:$16 sps:$4 sm:$0xff]  }
 0x8c0   :  { %3017 = vmatprep.subr.bf16.mxu0 %v5933_v48  ;;  %3058 = vmatprep.subr.bf16.mxu1 %v5936_v20  ;;  %v2803_v48 = vmul.f32 %v3988_v54, %v3986_v26  ;;  %v5951_v20 = vld [vmem:[#allocation8] ss:$16 sps:$4 sm:$0xff]   ;;  %v6848_v26 = vld [vmem:[#allocation12_spill] sm:$0xff] }
 0x8c1   :  { %v6847_v54 = vld [vmem:[#allocation11_spill] sm:$0xff] }
 0x8c3   :  { %3018 = vmatpush1.bf16.msra.mxu0 %v5939_v47  ;;  %3059 = vmatpush1.bf16.msra.mxu1 %v5942_v5  ;;  %v3004_v47 = vpack.c.bf16 %v2803_v48, %v2803_v48 }
 0x8c4   :  { %3019 = vmatprep.subr.bf16.mxu0 %v5945_v32  ;;  %3060 = vmatprep.subr.bf16.mxu1 %v5948_v43 }
 0x8c7   :  { %3020 = vmatpush1.bf16.msra.mxu0 %v5951_v20  ;;  %3061 = vmatpush1.bf16.msra.mxu1 %v5954_v7 }
 0x8c8   :  { %3122 = vmatprep.subr.bf16.mxu0 %v5517_v29  ;;  %3163 = vmatprep.subr.bf16.mxu1 %v5520_v16  ;;  %v6817_v29 = vld [vmem:[#allocation51_spill] sm:$0xff]  ;;  %v6818_v16 = vld [vmem:[#allocation53_spill] sm:$0xff] }
 0x8ca   :  { %3038 = vmatmul.mubr.bf16.vlgmr.msra.gmra.mxu0 %v3004_v47  ;;  %3079 = vmatmul.mubr.bf16.vlgmr.msra.gmra.mxu1 %v3004_v47 }
 0x8cb   :  { %3123 = vmatpush1.bf16.msra.mxu0 %v5523_v50  ;;  %3164 = vmatpush1.bf16.msra.mxu1 %v5526_v63  ;;  %v6819_v50 = vld [vmem:[#allocation52_spill] sm:$0xff]  ;;  %v6820_v63 = vld [vmem:[#allocation54_spill] sm:$0xff] }
 0x8cc   :  { %3124 = vmatprep.subr.bf16.mxu0 %v6743_v8  ;;  %3165 = vmatprep.subr.bf16.mxu1 %v6744_v42  ;;  %v6823_v8 = vld [vmem:[#allocation40_spill] sm:$0xff]  ;;  %v6824_v42 = vld [vmem:[#allocation42_spill] sm:$0xff] }
 0x8cd   :  { %3154 = vmatprep.mubr.bf16.mxu0 %v6465_v15  ;;  %3195 = vmatprep.mubr.bf16.mxu1 %v6465_v15 }
 0x8cf   :  { %3125 = vmatpush1.bf16.msra.mxu0 %v6745_v14  ;;  %3166 = vmatpush1.bf16.msra.mxu1 %v6746_v0  ;;  %v6825_v14 = vld [vmem:[#allocation67_spill] sm:$0xff]  ;;  %v6826_v0 = vld [vmem:[#allocation68_spill] sm:$0xff] }
 0x8d0   :  { %3126 = vmatprep.subr.bf16.mxu0 %v6747_v45  ;;  %3167 = vmatprep.subr.bf16.mxu1 %v6748_v22  ;;  %v6827_v45 = vld [vmem:[#allocation69_spill] sm:$0xff]  ;;  %v6828_v22 = vld [vmem:[#allocation70_spill] sm:$0xff] }
 0x8d3   :  { %3127 = vmatpush1.bf16.msra.mxu0 %v6749_v9  ;;  %3168 = vmatpush1.bf16.msra.mxu1 %v6750_v59  ;;  %v6829_v9 = vld [vmem:[#allocation71_spill] sm:$0xff]  ;;  %v6830_v59 = vld [vmem:[#allocation72_spill] sm:$0xff] }
 0x8d4   :  { %3128 = vmatprep.subr.bf16.mxu0 %v6751_v21  ;;  %3169 = vmatprep.subr.bf16.mxu1 %v6752_v28  ;;  %v6831_v21 = vld [vmem:[#allocation73_spill] sm:$0xff]  ;;  %v6832_v28 = vld [vmem:[#allocation74_spill] sm:$0xff] }
 0x8d7   :  { %3129 = vmatpush1.bf16.msra.mxu0 %v6753_v3  ;;  %3170 = vmatpush1.bf16.msra.mxu1 %v6754_v11  ;;  %v6833_v3 = vld [vmem:[#allocation33_spill] sm:$0xff]  ;;  %v6834_v11 = vld [vmem:[#allocation34_spill] sm:$0xff] }
 0x8d8   :  { %3130 = vmatprep.subr.bf16.mxu0 %v6755_v17  ;;  %3171 = vmatprep.subr.bf16.mxu1 %v6756_v44  ;;  %v6835_v17 = vld [vmem:[#allocation35_spill] sm:$0xff]  ;;  %v6836_v44 = vld [vmem:[#allocation36_spill] sm:$0xff] }
 0x8db   :  { %3131 = vmatpush1.bf16.msra.mxu0 %v6757_v33  ;;  %3172 = vmatpush1.bf16.msra.mxu1 %v6758_v61  ;;  %v6837_v33 = vld [vmem:[#allocation37_spill] sm:$0xff] }
 0x8dc   :  { %3132 = vmatprep.subr.bf16.mxu0 %v6759_v52  ;;  %3173 = vmatprep.subr.bf16.mxu1 %v6760_v39  ;;  %v6838_v61 = vld [vmem:[#allocation13_spill] sm:$0xff]  ;;  %v6839_v52 = vld [vmem:[#allocation43_spill] sm:$0xff] }
 0x8dd   :  { %v6840_v39 = vld [vmem:[#allocation45_spill] sm:$0xff] }
 0x8df   :  { %3133 = vmatpush1.bf16.msra.mxu0 %v6761_v1  ;;  %3174 = vmatpush1.bf16.msra.mxu1 %v6762_v55  ;;  %v6841_v1 = vld [vmem:[#allocation44_spill] sm:$0xff]  ;;  %v6842_v55 = vld [vmem:[#allocation46_spill] sm:$0xff] }
 0x8e0   :  { %3134 = vmatprep.subr.bf16.mxu0 %v6763_v23  ;;  %3175 = vmatprep.subr.bf16.mxu1 %v6764_v40  ;;  %v6843_v23 = vld [vmem:[#allocation14_spill] sm:$0xff]  ;;  %v6844_v40 = vld [vmem:[#allocation15_spill] sm:$0xff] }
 0x8e3   :  { %3135 = vmatpush1.bf16.msra.mxu0 %v5597_v62  ;;  %3176 = vmatpush1.bf16.msra.mxu1 %v5600_v12  ;;  %v6821_v62 = vld [vmem:[#allocation39_spill] sm:$0xff]  ;;  %v6822_v12 = vld [vmem:[#allocation41_spill] sm:$0xff] }
 0x8e4   :  { %3136 = vmatprep.subr.bf16.mxu0 %v6765_v53  ;;  %3177 = vmatprep.subr.bf16.mxu1 %v6766_v6  ;;  %v6845_v53 = vld [vmem:[#allocation16_spill] sm:$0xff]  ;;  %v6846_v6 = vld [vmem:[#allocation17_spill] sm:$0xff] }
 0x8e7   :  { %3137 = vmatpush1.bf16.msra.mxu0 %v6767_v51  ;;  %3178 = vmatpush1.bf16.msra.mxu1 %v6768_v60 }
 0x8e8   :  { %3233 = vmatprep.subr.bf16.mxu0 %v5739_v49  ;;  %3274 = vmatprep.subr.bf16.mxu1 %v5742_v34 }
 0x8ea   :  { %3155 = vmatmul.mubr.bf16.vlgmr.msra.gmra.mxu0 %v5860_v13  ;;  %3196 = vmatmul.mubr.bf16.vlgmr.msra.gmra.mxu1 %v5860_v13 }
 0x8eb   :  { %3234 = vmatpush1.bf16.msra.mxu0 %v5747_v46  ;;  %3275 = vmatpush1.bf16.msra.mxu1 %v5750_v41 }
 0x8ec   :  { %3235 = vmatprep.subr.bf16.mxu0 %v6817_v29  ;;  %3276 = vmatprep.subr.bf16.mxu1 %v6818_v16 }
 0x8ed   :  { %3265 = vmatprep.mubr.bf16.mxu0 %v6465_v15  ;;  %3306 = vmatprep.mubr.bf16.mxu1 %v6465_v15 }
 0x8ef   :  { %3236 = vmatpush1.bf16.msra.mxu0 %v6819_v50  ;;  %3277 = vmatpush1.bf16.msra.mxu1 %v6820_v63 }
 0x8f0   :  { %3237 = vmatprep.subr.bf16.mxu0 %v6821_v62  ;;  %3278 = vmatprep.subr.bf16.mxu1 %v6822_v12 }
 0x8f3   :  { %3238 = vmatpush1.bf16.msra.mxu0 %v6823_v8  ;;  %3279 = vmatpush1.bf16.msra.mxu1 %v6824_v42 }
 0x8f4   :  { %3239 = vmatprep.subr.bf16.mxu0 %v6825_v14  ;;  %3280 = vmatprep.subr.bf16.mxu1 %v6826_v0 }
 0x8f7   :  { %3240 = vmatpush1.bf16.msra.mxu0 %v6827_v45  ;;  %3281 = vmatpush1.bf16.msra.mxu1 %v6828_v22 }
 0x8f8   :  { %3241 = vmatprep.subr.bf16.mxu0 %v6829_v9  ;;  %3282 = vmatprep.subr.bf16.mxu1 %v6830_v59 }
 0x8fb   :  { %3242 = vmatpush1.bf16.msra.mxu0 %v6831_v21  ;;  %3283 = vmatpush1.bf16.msra.mxu1 %v6832_v28 }
 0x8fc   :  { %3243 = vmatprep.subr.bf16.mxu0 %v6833_v3  ;;  %3284 = vmatprep.subr.bf16.mxu1 %v6834_v11 }
 0x8ff   :  { %3244 = vmatpush1.bf16.msra.mxu0 %v6835_v17  ;;  %3285 = vmatpush1.bf16.msra.mxu1 %v6836_v44 }
 0x900   :  { %3245 = vmatprep.subr.bf16.mxu0 %v6837_v33  ;;  %3286 = vmatprep.subr.bf16.mxu1 %v6838_v61 }
 0x903   :  { %3246 = vmatpush1.bf16.msra.mxu0 %v6839_v52  ;;  %3287 = vmatpush1.bf16.msra.mxu1 %v6840_v39 }
 0x904   :  { %3247 = vmatprep.subr.bf16.mxu0 %v6841_v1  ;;  %3288 = vmatprep.subr.bf16.mxu1 %v6842_v55  ;;  %v6849_v1 = vld [vmem:[#allocation63_spill] sm:$0xff] }
 0x907   :  { %3248 = vmatpush1.bf16.msra.mxu0 %v6843_v23  ;;  %3289 = vmatpush1.bf16.msra.mxu1 %v6844_v40 }
 0x908   :  { %3316 = vmatprep.subr.bf16.mxu0 %v6845_v53  ;;  %3357 = vmatprep.subr.bf16.mxu1 %v6846_v6 }
 0x96a   :  { %v2956_v51 = vpop.f32.mrf.mxu0  ;;  %v2997_v60 = vpop.f32.mrf.mxu1 }
 0x96b   :  { %v2957_v48 = vadd.f32 %v2956_v51, %v6847_v54  ;;  %v2998_v29 = vadd.f32 %v2997_v60, %v6848_v26  ;;  %v6850_v60 = vld [vmem:[#allocation65_spill] sm:$0xff] }
 0x96c   :  { %v2958_v49 = vpop.f32.mrf.mxu0  ;;  %v2999_v34 = vpop.f32.mrf.mxu1 }
 0x96d   :  { %v2959_v63 = vadd.f32 %v2958_v49, %v4896_v25  ;;  %v3000_v62 = vadd.f32 %v2999_v34, %v6568_v35 }
 0x96e   :  { %v2960_v46 = vpop.f32.mrf.mxu0  ;;  %v3001_v41 = vpop.f32.mrf.mxu1 }
 0x970   :  { %v2961_v13 = vpop.f32.mrf.mxu0  ;;  %v3002_v47 = vpop.f32.mrf.mxu1 }
 0x98a   :  { %v3039_v16 = vpop.f32.mrf.mxu0  ;;  %v3080_v50 = vpop.f32.mrf.mxu1 }
 0x98b   :  { %v3087_v12 = vadd.f32 %v3039_v16, %v2957_v48  ;;  %v3089_v8 = vadd.f32 %v3080_v50, %v2998_v29  ;;  %v6851_v50 = vld [vmem:[#allocation64_spill] sm:$0xff] }
 0x98c   :  { %v3041_v42 = vpop.f32.mrf.mxu0  ;;  %v3082_v14 = vpop.f32.mrf.mxu1 }
 0x98d   :  { %v3610_v0 = vmul.f32 -1.442695, %v3087_v12  ;;  %v3088_v45 = vadd.f32 %v3041_v42, %v2959_v63  ;;  %v3090_v22 = vadd.f32 %v3082_v14, %v3000_v62  ;;  %v6852_v12 = vld [vmem:[#allocation66_spill] sm:$0xff] }
 0x98e   :  { %v3043_v9 = vpop.f32.mrf.mxu0  ;;  %v3084_v59 = vpop.f32.mrf.mxu1 }
 0x98f   :  { %3989 = vpow2.f32 %v3610_v0  ;;  %v3611_v21 = vmul.f32 -1.442695, %v3088_v45 }
 0x990   :  { %v3044_v28 = vpop.f32.mrf.mxu0  ;;  %v3085_v3 = vpop.f32.mrf.mxu1 }
 0x991   :  { %3991 = vpow2.f32 %v3611_v21 }
 0x992   :  { %3993 = vtanh.f32 %v3090_v22 }
 0x99c   :  { %v3990_v11 = vpop.eup %3989 }
 0x99d   :  { %v3100_v17 = vadd.f32 1.0, %v3990_v11 }
 0x99e   :  { %v3992_v44 = vpop.eup %3991 }
 0x99f   :  { %3995 = vrcp.f32 %v3100_v17  ;;  %v3101_v33 = vadd.f32 1.0, %v3992_v44  ;;  %v3994_v39 = vpop.eup %3993  ;;  %v3612_v44 = vmul.f32 -1.442695, %v3089_v8  ;;  %v6864_v8 = vld [vmem:[#allocation80_spill] sm:$0xff] }
 0x9a1   :  { %3997 = vrcp.f32 %v3101_v33 }
 0x9aa   :  { %v3156_v61 = vpop.f32.mrf.mxu0  ;;  %v3197_v52 = vpop.f32.mrf.mxu1 }
 0x9ab   :  { %v3204_v55 = vadd.f32 %v3156_v61, %v6849_v1  ;;  %v3206_v63 = vadd.f32 %v3197_v52, %v6851_v50 }
 0x9ac   :  { %v3996_v23 = vpop.eup %3995  ;;  %v3158_v40 = vpop.f32.mrf.mxu0 }
 0x9ad   :  { %v3199_v53 = vpop.f32.mrf.mxu1  ;;  %v3111_v6 = vmul.f32 %v3996_v23, %v3994_v39  ;;  %v3613_v51 = vmul.f32 -1.442695, %v3204_v55  ;;  %v3205_v49 = vadd.f32 %v3158_v40, %v6850_v60  ;;  %v3615_v62 = vmul.f32 -1.442695, %v3206_v63 }
 0x9ae   :  { %v3998_v34 = vpop.eup %3997  ;;  %v3160_v46 = vpop.f32.mrf.mxu0  ;;  %v3207_v42 = vadd.f32 %v3199_v53, %v6852_v12 }
 0x9af   :  { %v3201_v41 = vpop.f32.mrf.mxu1  ;;  %v3110_v13 = vmul.f32 %v3998_v34, %v5852_v10  ;;  %3999 = vpow2.f32 %v3613_v51  ;;  %v3614_v47 = vmul.f32 -1.442695, %v3205_v49 }
 0x9b0   :  { %v3161_v48 = vpop.f32.mrf.mxu0 }
 0x9b1   :  { %v3202_v29 = vpop.f32.mrf.mxu1  ;;  %v6036_v16 = vadd.f32 %v3111_v6, %v3110_v13  ;;  %4001 = vpow2.f32 %v3614_v47 }
 0x9b2   :  { %4003 = vpow2.f32 %v3615_v62 }
 0x9b3   :  { %4005 = vtanh.f32 %v3207_v42 }
 0x9bc   :  { %v4000_v14 = vpop.eup %3999 }
 0x9bd   :  { %v3217_v0 = vadd.f32 1.0, %v4000_v14 }
 0x9be   :  { %v4002_v45 = vpop.eup %4001 }
 0x9bf   :  { %4007 = vrcp.f32 %v3217_v0  ;;  %v3218_v22 = vadd.f32 1.0, %v4002_v45  ;;  %v4004_v10 = vpop.eup %4003 }
 0x9c0   :  { %v4006_v9 = vpop.eup %4005  ;;  %v3219_v3 = vadd.f32 1.0, %v4004_v10 }
 0x9c1   :  { %4009 = vrcp.f32 %v3218_v22 }
 0x9c2   :  { %4011 = vrcp.f32 %v3219_v3 }
 0x9cc   :  { %v4008_v59 = vpop.eup %4007 }
 0x9cd   :  { %v3228_v21 = vmul.f32 %v4008_v59, %v4006_v9 }
 0x9ce   :  { %v4010_v28 = vpop.eup %4009 }
 0x9cf   :  { %v3227_v11 = vmul.f32 %v4010_v28, %v5857_v4  ;;  %v4012_v33 = vpop.eup %4011 }
 0x9d1   :  { %v3229_v17 = vadd.f32 %v3228_v21, %v3227_v11 }
 0x9d3   :  { %4013 = vtanh.f32 %v3229_v17 }
 0x9d4   :  { %4015 = vpow2.f32 %v3612_v44 }
 0x9d5   :  { %4017 = vtanh.f32 %v6036_v16 }
 0x9e0   :  { %v4014_v61 = vpop.eup %4013 }
 0x9e1   :  { %v3231_v52 = vmul.f32 %v4014_v61, %v4012_v33  ;;  %v4016_v4 = vpop.eup %4015  ;;  %v3619_v33 = vld [vmem:[%s6092_s7] ss:$0 sm:$0xff] }
 0x9e3   :  { %v3232_v39 = vpack.c.bf16 %v3231_v52, %v3231_v52 }
 0x9e5   :  { %3266 = vmatmul.mubr.bf16.vlgmr.msra.gmra.mxu0 %v3232_v39  ;;  %3307 = vmatmul.mubr.bf16.vlgmr.msra.gmra.mxu1 %v3232_v39  ;;  %v3620_v39 = vld [vmem:[#allocation3] ss:$0 sm:$0xff] }
 0x9e6   :  { %3317 = vmatpush1.bf16.msra.mxu0 %v5864_v36  ;;  %3358 = vmatpush1.bf16.msra.mxu1 %v5867_v30  ;;  %v3102_v36 = vadd.f32 1.0, %v4016_v4  ;;  %v6854_v30 = vld [vmem:[#allocation38_spill] sm:$0xff] }
 0x9e7   :  { %3318 = vmatprep.subr.bf16.mxu0 %v5870_v31  ;;  %3359 = vmatprep.subr.bf16.mxu1 %v5873_v38  ;;  %v6855_v31 = vld [vmem:[#allocation55_spill] sm:$0xff]  ;;  %v6856_v38 = vld [vmem:[#allocation57_spill] sm:$0xff] }
 0x9e8   :  { %3348 = vmatprep.mubr.bf16.mxu0 %v6465_v15  ;;  %3389 = vmatprep.mubr.bf16.mxu1 %v6465_v15  ;;  %4019 = vrcp.f32 %v3102_v36  ;;  %v6853_v15 = vld [vmem:[#allocation18_spill] sm:$0xff] }
 0x9ea   :  { %3319 = vmatpush1.bf16.msra.mxu0 %v5878_v19  ;;  %3360 = vmatpush1.bf16.msra.mxu1 %v5881_v27  ;;  %v6857_v19 = vld [vmem:[#allocation56_spill] sm:$0xff]  ;;  %v6858_v27 = vld [vmem:[#allocation58_spill] sm:$0xff] }
 0x9eb   :  { %3320 = vmatprep.subr.bf16.mxu0 %v5884_v2  ;;  %3361 = vmatprep.subr.bf16.mxu1 %v5887_v58  ;;  %v6859_v2 = vld [vmem:[#allocation75_spill] sm:$0xff]  ;;  %v6860_v58 = vld [vmem:[#allocation76_spill] sm:$0xff] }
 0x9ee   :  { %3321 = vmatpush1.bf16.msra.mxu0 %v5890_v24  ;;  %3362 = vmatpush1.bf16.msra.mxu1 %v5893_v56  ;;  %v6861_v24 = vld [vmem:[#allocation77_spill] sm:$0xff]  ;;  %v6862_v56 = vld [vmem:[#allocation78_spill] sm:$0xff] }
 0x9ef   :  { %3322 = vmatprep.subr.bf16.mxu0 %v5897_v57  ;;  %3363 = vmatprep.subr.bf16.mxu1 %v5900_v18  ;;  %v6863_v57 = vld [vmem:[#allocation79_spill] sm:$0xff]  ;;  %v4018_v18 = vpop.eup %4017 }
 0x9f2   :  { %3323 = vmatpush1.bf16.msra.mxu0 %v5903_v37  ;;  %3364 = vmatpush1.bf16.msra.mxu1 %v6853_v15 }
 0x9f3   :  { %3324 = vmatprep.subr.bf16.mxu0 %v6854_v30  ;;  %3365 = vmatprep.subr.bf16.mxu1 %v6855_v31 }
 0x9f5   :  { %v4020_v37 = vpop.eup %4019 }
 0x9f6   :  { %3325 = vmatpush1.bf16.msra.mxu0 %v6856_v38  ;;  %3366 = vmatpush1.bf16.msra.mxu1 %v6857_v19  ;;  %v3114_v1 = vmul.f32 %v4020_v37, %v4018_v18 }
 0x9f7   :  { %3326 = vmatprep.subr.bf16.mxu0 %v6858_v27  ;;  %3367 = vmatprep.subr.bf16.mxu1 %v6859_v2 }
 0x9f8   :  { %v3315_v55 = vpack.c.bf16 %v3114_v1, %v3114_v1 }
 0x9fa   :  { %3327 = vmatpush1.bf16.msra.mxu0 %v6860_v58  ;;  %3368 = vmatpush1.bf16.msra.mxu1 %v6861_v24 }
 0x9fb   :  { %3328 = vmatprep.subr.bf16.mxu0 %v6862_v56  ;;  %3369 = vmatprep.subr.bf16.mxu1 %v6863_v57 }
 0x9fe   :  { %3329 = vmatpush1.bf16.msra.mxu0 %v6864_v8  ;;  %3370 = vmatpush1.bf16.msra.mxu1 %v5942_v5 }
 0x9ff   :  { %3330 = vmatprep.subr.bf16.mxu0 %v5945_v32  ;;  %3371 = vmatprep.subr.bf16.mxu1 %v5948_v43 }
 0xa02   :  { %3331 = vmatpush1.bf16.msra.mxu0 %v5951_v20  ;;  %3372 = vmatpush1.bf16.msra.mxu1 %v5954_v7 }
 0xa05   :  { %3349 = vmatmul.mubr.bf16.vlgmr.msra.gmra.mxu0 %v3315_v55  ;;  %3390 = vmatmul.mubr.bf16.vlgmr.msra.gmra.mxu1 %v3315_v55 }
 0xaa5   :  { %v3267_v23 = vpop.f32.mrf.mxu0  ;;  %v3308_v40 = vpop.f32.mrf.mxu1 }
 0xaa6   :  { %v3268_v32 = vadd.f32 %v3267_v23, %v6847_v54  ;;  %v3309_v12 = vadd.f32 %v3308_v40, %v6848_v26 }
 0xaa7   :  { %v3269_v53 = vpop.f32.mrf.mxu0  ;;  %v3310_v6 = vpop.f32.mrf.mxu1 }
 0xaa8   :  { %v3270_v46 = vadd.f32 %v3269_v53, %v4896_v25  ;;  %v3311_v54 = vadd.f32 %v3310_v6, %v6568_v35 }
 0xaa9   :  { %v3271_v51 = vpop.f32.mrf.mxu0  ;;  %v3312_v60 = vpop.f32.mrf.mxu1 }
 0xaab   :  { %v3272_v49 = vpop.f32.mrf.mxu0  ;;  %v3313_v5 = vpop.f32.mrf.mxu1 }
 0xac5   :  { %v3350_v34 = vpop.f32.mrf.mxu0  ;;  %v3391_v43 = vpop.f32.mrf.mxu1 }
 0xac6   :  { %v3398_v20 = vadd.f32 %v3350_v34, %v3268_v32  ;;  %v3400_v42 = vadd.f32 %v3391_v43, %v3309_v12 }
 0xac7   :  { %v3352_v41 = vpop.f32.mrf.mxu0  ;;  %v3393_v7 = vpop.f32.mrf.mxu1 }
 0xac8   :  { %v3616_v13 = vmul.f32 -1.442695, %v3398_v20  ;;  %v3399_v47 = vadd.f32 %v3352_v41, %v3270_v46  ;;  %v3618_v14 = vmul.f32 -1.442695, %v3400_v42  ;;  %v3401_v25 = vadd.f32 %v3393_v7, %v3311_v54 }
 0xac9   :  { %v3354_v48 = vpop.f32.mrf.mxu0  ;;  %v3395_v29 = vpop.f32.mrf.mxu1 }
 0xaca   :  { %4021 = vpow2.f32 %v3616_v13  ;;  %v3617_v50 = vmul.f32 -1.442695, %v3399_v47 }
 0xacb   :  { %v3355_v63 = vpop.f32.mrf.mxu0  ;;  %v3396_v62 = vpop.f32.mrf.mxu1 }
 0xacc   :  { %4023 = vpow2.f32 %v3617_v50 }
 0xacd   :  { %4025 = vpow2.f32 %v3618_v14 }
 0xad7   :  { %v4022_v0 = vpop.eup %4021 }
 0xad8   :  { %v3411_v45 = vadd.f32 1.0, %v4022_v0 }
 0xad9   :  { %v4024_v22 = vpop.eup %4023 }
 0xada   :  { %4027 = vrcp.f32 %v3411_v45  ;;  %v3412_v10 = vadd.f32 1.0, %v4024_v22  ;;  %v4026_v9 = vpop.eup %4025 }
 0xadb   :  { %4029 = vtanh.f32 %v3401_v25  ;;  %v3413_v3 = vadd.f32 1.0, %v4026_v9 }
 0xadc   :  { %4031 = vrcp.f32 %v3412_v10 }
 0xadd   :  { %4033 = vrcp.f32 %v3413_v3 }
 0xae7   :  { %v4028_v59 = vpop.eup %4027 }
 0xae8   :  { %v4030_v21 = vpop.eup %4029 }
 0xae9   :  { %v4032_v28 = vpop.eup %4031  ;;  %v3422_v11 = vmul.f32 %v4030_v21, %v4028_v59 }
 0xaea   :  { %v3421_v26 = vmul.f32 %v4032_v28, %v6036_v16  ;;  %v4034_v35 = vpop.eup %4033 }
 0xaec   :  { %v3423_v17 = vadd.f32 %v3422_v11, %v3421_v26 }
 0xaee   :  { %4035 = vtanh.f32 %v3423_v17 }
 0xafb   :  { %v4036_v44 = vpop.eup %4035 }
 0xafc   :  { %v3425_v61 = vmul.f32 %v4036_v44, %v4034_v35 }
 0xafe   :  { %v3433_v52 = vmul.f32 %v3619_v33, %v3425_v61 }
 0xb00   :  { %3434 = vadd.xlane.f32.xlu0 %v3433_v52 }
 0xb89   :  { %v3435_v4 = vpop.xlane.xlu0 %3434 }
 0xb8a   :  { %v3443_v36 = vadd.f32 %v3620_v39, %v3435_v4 }
 0xb8c   :  { %3445 = vst.msk [vmem:[%s6094_s9] sm:$0xff] %vm3444_vm1, %v3443_v36 }
 0xb8d   :  { %3450 = vsyncpa [#allocation5], 1 }
 0xb8e   :  { %3451 = vsyncpa [#allocation7], 1 }

</bundles_post_ra>
